<compile_context>
chip_gen: v6e
topology: v6e:2x2x1
jax: 0.10.0
libtpu: 0.0.40
codegen_flags: <defaults>
</compile_context>

<pallas_src>
import functools

import jax
import jax.numpy as jnp
from jax.experimental import pallas as pl
from jax.experimental.pallas import tpu as pltpu


LRELU_SLOPE = 0.02
BN_EPS = 1e-5
LANE = 128


def _vmem_spec():
    return pl.BlockSpec(memory_space=pltpu.MemorySpace.VMEM)


def _round_up(n, m):
    return ((n + m - 1) // m) * m


# --------------------------- spectral norm (prep) ---------------------------

def spectral_norm_weight(w, u0, eps=1e-12):
    # SpectralNorm._update_u_v with power_iterations=1 (u is the persisted,
    # l2-normalized buffer; v is recomputed from u, as in the reference).
    h = w.shape[0]
    wm = w.reshape(h, -1)

    def l2n(v):
        return v / (jnp.linalg.norm(v) + eps)

    u = l2n(u0)
    v = l2n(wm.T @ u)
    u = l2n(wm @ v)
    sigma = jnp.dot(u, wm @ v)
    return w / sigma


# --------------------- one-time operand construction ------------------------

def _build_layer_plan(w_sn, bias, gamma, beta, stride, Hin, Win, in_width,
                      batch, is_last, mxu_dtype):
    """Build the matrices the fused kernel consumes for one layer.

    Kernel activation layout: one (B*H, C*W) array, batch stacked on sublanes,
    channel-major columns zero-padded on the lane axis to `out_width`
    (a multiple of 128).
    """
    Cin, Cout, kH, kW = w_sn.shape
    Hout = (Hin - 1) * stride + kH
    Wout = (Win - 1) * stride + kW
    cw = Cout * Wout
    out_width = _round_up(cw, LANE)
    assert Cin * Win <= in_width

    # W-scatter selector: SW[kw, iw, ow] = 1  iff  ow == stride*iw + kw
    iw = jnp.arange(Win)
    ow = jnp.arange(Wout)
    kw = jnp.arange(kW)
    SW = (ow[None, None, :] ==
          stride * iw[None, :, None] + kw[:, None, None]).astype(jnp.float32)

    # R[kh, ci*Win+iw, co*Wout+ow] = sum_kw w[ci,co,kh,kw] * SW[kw,iw,ow]
    # R_wide concatenates the kH blocks along the output (lane) axis so the
    # whole conv-transpose channel mix is ONE wide matmul.
    R = jnp.einsum('cdhk,kiw->hcidw', w_sn, SW).reshape(kH, Cin * Win, cw)
    R = jnp.pad(R, ((0, 0), (0, in_width - Cin * Win), (0, out_width - cw)))
    R_wide = jnp.transpose(R, (1, 0, 2)).reshape(in_width, kH * out_width)
    R_wide = R_wide.astype(mxu_dtype)                   # bf16 MXU operand

    # H-scatter selector, block-diagonal over the batch:
    #   SH_b[kh, b*Hout+oh, b'*Hin+ih] = (b==b') * (oh == stride*ih + kh)
    ih = jnp.arange(Hin)
    oh = jnp.arange(Hout)
    kh = jnp.arange(kH)
    SH = (oh[None, :, None] ==
          stride * ih[None, None, :] + kh[:, None, None]).astype(jnp.float32)
    eyeB = jnp.eye(batch, dtype=jnp.float32)
    SH_b = jnp.einsum('bc,koi->kboci', eyeB, SH).reshape(
        kH, batch * Hout, batch * Hin)                  # kept f32 (tiny, exact)

    bias_row = jnp.pad(jnp.repeat(bias, Wout),
                       (0, out_width - cw))[None, :].astype(jnp.float32)

    arrays = [R_wide, SH_b, bias_row]
    if not is_last:
        # Skinny per-channel reduce / expand matrices (replace the old Q).
        col = jnp.repeat(jnp.arange(Cout), Wout)                       # (cw,)
        red_cw = (col[:, None] == jnp.arange(Cout)[None, :]).astype(jnp.float32)
        RED = jnp.pad(red_cw, ((0, out_width - cw), (0, 0)))  # (out_w, Cout)
        EXP = RED.T                                            # (Cout, out_w)
        gb = jnp.stack([gamma, beta], axis=0).astype(jnp.float32)  # (2, Cout)
        arrays.extend([RED, EXP, gb])

    cfg = dict(kH=int(kH), Hout=int(Hout), Wout=int(Wout), Cout=int(Cout),
               out_width=int(out_width), is_last=bool(is_last))
    return arrays, cfg


def prepare_params(params, batch, in_hw=(1, 1), mxu_dtype=jnp.bfloat16):
    """Spectral norm + kernel-operand construction. Runs once, off the
    per-forward critical path."""
    Hin, Win = in_hw
    in_width0 = _round_up(params[0]['w'].shape[0] * Win, LANE)
    in_width = in_width0
    arrays, cfgs = [], []
    n_layers = len(params)
    for i, p in enumerate(params):
        w_sn = spectral_norm_weight(p['w'], p['u'])
        is_last = (i == n_layers - 1)
        arrs, cfg = _build_layer_plan(w_sn, p['b'], p['gamma'], p['beta'],
                                      p['stride'], Hin, Win, in_width,
                                      batch, is_last, mxu_dtype)
        arrays.extend(arrs)
        cfgs.append(cfg)
        Hin, Win, in_width = cfg['Hout'], cfg['Wout'], cfg['out_width']
    return dict(arrays=arrays, cfgs=cfgs, batch=int(batch),
                in_width0=int(in_width0), mxu_dtype=mxu_dtype)


# ------------------------------ fused kernel --------------------------------

def _make_fused_kernel(cfgs, batch, mxu_dtype):
    def kernel(*refs):
        x_ref = refs[0]
        o_ref = refs[-1]
        prm = refs[1:-1]

        # Batch-stacked activations: one (B*H, width) f32 value.
        a = x_ref[...]
        idx = 0
        for cfg in cfgs:
            kH, out_w = cfg['kH'], cfg['out_width']
            r_wide = prm[idx][...]            # (in_w, kH*out_w)  bf16
            sh_ref = prm[idx + 1]             # (kH, B*Hout, B*Hin) f32
            bias_row = prm[idx + 2][...]      # (1, out_w)         f32
            if cfg['is_last']:
                idx += 3
            else:
                red = prm[idx + 3][...]       # (out_w, Cout) f32
                exp = prm[idx + 4][...]       # (Cout, out_w) f32
                gb = prm[idx + 5][...]        # (2, Cout)     f32
                idx += 6

            # ConvTranspose2d: one wide bf16 MXU matmul covering all batch
            # elements and kernel rows, then kH tiny f32 H-scatter matmuls.
            t = jnp.dot(a.astype(mxu_dtype), r_wide,
                        preferred_element_type=jnp.float32)  # (B*Hin, kH*out_w)
            z = None
            for kh in range(kH):
                tk = t[:, kh * out_w:(kh + 1) * out_w]       # 128-aligned slice
                zk = jnp.dot(sh_ref[kh], tk,
                             preferred_element_type=jnp.float32)
                z = zk if z is None else z + zk
            z = z + bias_row                                  # (B*Hout, out_w)

            if cfg['is_last']:
                o_ref[...] = jnp.tanh(z)
            else:
                # BatchNorm2d (training-mode batch statistics, biased variance)
                # + LeakyReLU(0.02), all in f32.  Per-channel stats via skinny
                # reduce/expand matmuls (no width x width Q operand).
                inv_n = 1.0 / float(batch * cfg['Hout'] * cfg['Wout'])
                s1 = jnp.sum(z, axis=0, keepdims=True)        # (1, out_w)
                s2 = jnp.sum(z * z, axis=0, keepdims=True)
                mean_c = jnp.dot(s1, red,
                                 preferred_element_type=jnp.float32) * inv_n
                ex2_c = jnp.dot(s2, red,
                                preferred_element_type=jnp.float32) * inv_n
                var_c = ex2_c - mean_c * mean_c               # (1, Cout)
                scale_c = gb[0:1, :] * jax.lax.rsqrt(var_c + BN_EPS)
                shift_c = gb[1:2, :] - mean_c * scale_c
                scale_row = jnp.dot(scale_c, exp,
                                    preferred_element_type=jnp.float32)
                shift_row = jnp.dot(shift_c, exp,
                                    preferred_element_type=jnp.float32)
                v = z * scale_row + shift_row
                a = jnp.maximum(v, LRELU_SLOPE * v)           # LeakyReLU(0.02)

    return kernel


def generator_x_forward(prep, x_nchw):
    cfgs = prep['cfgs']
    batch = prep['batch']
    B, Cin, Hin, Win = x_nchw.shape
    assert B == batch, (B, batch)

    # NCHW -> (B*H, C*W): batch stacked on sublanes, channel-major lanes,
    # zero-padded to 128 lanes so the first matmul load is lane-dense.
    x2 = jnp.transpose(x_nchw, (0, 2, 1, 3)).reshape(B * Hin, Cin * Win)
    x2 = jnp.pad(x2.astype(jnp.float32),
                 ((0, 0), (0, prep['in_width0'] - Cin * Win)))

    last = cfgs[-1]
    Hout, Wout, Cout = last['Hout'], last['Wout'], last['Cout']
    out_width = last['out_width']

    kernel = _make_fused_kernel(cfgs, batch, prep['mxu_dtype'])
    inputs = [x2] + list(prep['arrays'])
    out = pl.pallas_call(
        kernel,
        out_shape=jax.ShapeDtypeStruct((B * Hout, out_width), jnp.float32),
        in_specs=[_vmem_spec()] * len(inputs),
        out_specs=_vmem_spec(),
    )(*inputs)

    y = out.reshape(B, Hout, out_width)[:, :, :Cout * Wout]
    y = y.reshape(B, Hout, Cout, Wout)
    return jnp.transpose(y, (0, 2, 1, 3))                         # NCHW


# ------------------------------ params / ref ---------------------------------

def init_params(key, zd=32, ch=1):
    # (Cin, Cout, kernel, stride) for conv1..conv5, as in GeneratorX.__init__.
    layer_defs = [
        (zd, zd, 3, 1),
        (zd, zd // 2, 3, 2),
        (zd // 2, zd // 4, 3, 2),
        (zd // 4, zd // 4, 3, 2),
        (zd // 4, ch, 2, 1),
    ]
    params = []
    for cin, cout, ksz, stride in layer_defs:
        key, kw_, kb_, ku_ = jax.random.split(key, 4)
        params.append(dict(
            w=0.1 * jax.random.normal(kw_, (cin, cout, ksz, ksz), jnp.float32),
            b=0.05 * jax.random.normal(kb_, (cout,), jnp.float32),
            u=jax.random.normal(ku_, (cin,), jnp.float32),
            gamma=jnp.ones((cout,), jnp.float32),   # BatchNorm2d default weight
            beta=jnp.zeros((cout,), jnp.float32),   # BatchNorm2d default bias
            stride=stride,
        ))
    return params


def reference_forward(params, x_nchw):
    # Plain-JAX f32 reference (independent lowering of the same math), used
    # only for the correctness check in __main__.
    x = jnp.transpose(x_nchw, (0, 2, 3, 1)).astype(jnp.float32)   # NHWC
    n_layers = len(params)
    for i, p in enumerate(params):
        w = spectral_norm_weight(p['w'], p['u'])
        B, Hin, Win, Cin = x.shape
        _, Cout, kH, kW = w.shape
        s = p['stride']
        Hout = (Hin - 1) * s + kH
        Wout = (Win - 1) * s + kW
        wmat = jnp.transpose(w, (0, 2, 3, 1)).reshape(Cin, kH * kW * Cout)
        y = (x.reshape(B * Hin * Win, Cin) @ wmat).reshape(
            B, Hin, Win, kH, kW, Cout)
        out = jnp.zeros((B, Hout, Wout, Cout), jnp.float32)
        for kh in range(kH):
            for kw in range(kW):
                out = out.at[:, kh:kh + s * Hin:s,
                             kw:kw + s * Win:s, :].add(y[:, :, :, kh, kw, :])
        out = out + p['b'].reshape(1, 1, 1, -1)
        if i < n_layers - 1:
            mean = jnp.mean(out, axis=(0, 1, 2), keepdims=True)
            var = jnp.mean((out - mean) ** 2, axis=(0, 1, 2), keepdims=True)
            out = ((out - mean) * jax.lax.rsqrt(var + BN_EPS)
                   * p['gamma'].reshape(1, 1, 1, -1)
                   + p['beta'].reshape(1, 1, 1, -1))
            out = jnp.where(out >= 0, out, LRELU_SLOPE * out)
        else:
            out = jnp.tanh(out)
        x = out
    return jnp.transpose(x, (0, 3, 1, 2))


if __name__ == "__main__":
    zd, ch, batch = 32, 1, 2                    # small shapes: zd=32 latent
    key = jax.random.PRNGKey(0)
    key, xkey = jax.random.split(key)
    x = jax.random.normal(xkey, (batch, zd, 1, 1), jnp.float32)   # NCHW latent

    params = init_params(key, zd=zd, ch=ch)
    prep = prepare_params(params, batch=batch, in_hw=(1, 1))      # one-time

    fwd = jax.jit(functools.partial(generator_x_forward, prep))
    out = jax.block_until_ready(fwd(x))

    # 1x1 -> 3 -> 7 -> 15 -> 31 -> 32 spatial, channel ch.
    assert out.shape == (batch, ch, 32, 32), out.shape
    assert bool(jnp.all(jnp.isfinite(out)))
    assert bool(jnp.all(jnp.abs(out) <= 1.0 + 1e-6))              # tanh range

    ref = reference_forward(params, x)
    err = float(jnp.max(jnp.abs(out - ref)))
    # Conv matmuls run with bf16 MXU operands (f32 accumulate, f32 BN stats),
    # so allow a bf16-level tolerance vs. the all-f32 reference.
    assert err < 3e-2, f"max abs err vs reference: {err}"

    print("KERNEL_OK")
</pallas_src>

<mosaic_0001>
module attributes {stable_mosaic.version = 11 : i64} {
  func.func @kernel(%arg0: memref<2x128xf32, #tpu.memory_space<vmem>>, %arg1: memref<128x384xbf16, #tpu.memory_space<vmem>>, %arg2: memref<3x6x2xf32, #tpu.memory_space<vmem>>, %arg3: memref<1x128xf32, #tpu.memory_space<vmem>>, %arg4: memref<128x32xf32, #tpu.memory_space<vmem>>, %arg5: memref<32x128xf32, #tpu.memory_space<vmem>>, %arg6: memref<2x32xf32, #tpu.memory_space<vmem>>, %arg7: memref<128x384xbf16, #tpu.memory_space<vmem>>, %arg8: memref<3x14x6xf32, #tpu.memory_space<vmem>>, %arg9: memref<1x128xf32, #tpu.memory_space<vmem>>, %arg10: memref<128x16xf32, #tpu.memory_space<vmem>>, %arg11: memref<16x128xf32, #tpu.memory_space<vmem>>, %arg12: memref<2x16xf32, #tpu.memory_space<vmem>>, %arg13: memref<128x384xbf16, #tpu.memory_space<vmem>>, %arg14: memref<3x30x14xf32, #tpu.memory_space<vmem>>, %arg15: memref<1x128xf32, #tpu.memory_space<vmem>>, %arg16: memref<128x8xf32, #tpu.memory_space<vmem>>, %arg17: memref<8x128xf32, #tpu.memory_space<vmem>>, %arg18: memref<2x8xf32, #tpu.memory_space<vmem>>, %arg19: memref<128x768xbf16, #tpu.memory_space<vmem>>, %arg20: memref<3x62x30xf32, #tpu.memory_space<vmem>>, %arg21: memref<1x256xf32, #tpu.memory_space<vmem>>, %arg22: memref<256x8xf32, #tpu.memory_space<vmem>>, %arg23: memref<8x256xf32, #tpu.memory_space<vmem>>, %arg24: memref<2x8xf32, #tpu.memory_space<vmem>>, %arg25: memref<256x256xbf16, #tpu.memory_space<vmem>>, %arg26: memref<2x64x62xf32, #tpu.memory_space<vmem>>, %arg27: memref<1x128xf32, #tpu.memory_space<vmem>>, %arg28: memref<64x128xf32, #tpu.memory_space<vmem>>) attributes {dimension_semantics = [], scalar_prefetch = 0 : i64, scratch_operands = 0 : i64, tpu.core_type = #tpu.core_type<tc>} {
    %c0 = arith.constant 0 : index
    %c0_0 = arith.constant 0 : index
    %0 = vector.load %arg0[%c0, %c0_0] : memref<2x128xf32, #tpu.memory_space<vmem>>, vector<2x128xf32>
    %c0_1 = arith.constant 0 : index
    %c0_2 = arith.constant 0 : index
    %1 = vector.load %arg1[%c0_1, %c0_2] : memref<128x384xbf16, #tpu.memory_space<vmem>>, vector<128x384xbf16>
    %c0_3 = arith.constant 0 : index
    %c0_4 = arith.constant 0 : index
    %2 = vector.load %arg3[%c0_3, %c0_4] : memref<1x128xf32, #tpu.memory_space<vmem>>, vector<1x128xf32>
    %c0_5 = arith.constant 0 : index
    %c0_6 = arith.constant 0 : index
    %3 = vector.load %arg4[%c0_5, %c0_6] : memref<128x32xf32, #tpu.memory_space<vmem>>, vector<128x32xf32>
    %c0_7 = arith.constant 0 : index
    %c0_8 = arith.constant 0 : index
    %4 = vector.load %arg5[%c0_7, %c0_8] : memref<32x128xf32, #tpu.memory_space<vmem>>, vector<32x128xf32>
    %c0_9 = arith.constant 0 : index
    %c0_10 = arith.constant 0 : index
    %5 = vector.load %arg6[%c0_9, %c0_10] : memref<2x32xf32, #tpu.memory_space<vmem>>, vector<2x32xf32>
    %6 = arith.truncf %0 : vector<2x128xf32> to vector<2x128xbf16>
    %cst = arith.constant dense<0.000000e+00> : vector<2x384xf32>
    %7 = tpu.matmul %6, %1, %cst {dimension_numbers = #tpu.dot_dimension_numbers<[1], [0], [0], [1], [0, 0, 1, 1], [], []>} : vector<2x128xbf16>, vector<128x384xbf16>, vector<2x384xf32> -> vector<2x384xf32>
    %8 = vector.extract_strided_slice %7 {offsets = [0, 0], sizes = [2, 128], strides = [1, 1]} : vector<2x384xf32> to vector<2x128xf32>
    %c0_11 = arith.constant 0 : index
    %c0_12 = arith.constant 0 : index
    %c0_13 = arith.constant 0 : index
    %9 = vector.load %arg2[%c0_11, %c0_12, %c0_13] : memref<3x6x2xf32, #tpu.memory_space<vmem>>, vector<1x6x2xf32>
    %10 = vector.shape_cast %9 : vector<1x6x2xf32> to vector<6x2xf32>
    %cst_14 = arith.constant dense<0.000000e+00> : vector<6x128xf32>
    %11 = tpu.matmul %10, %8, %cst_14 {dimension_numbers = #tpu.dot_dimension_numbers<[1], [0], [0], [1], [0, 0, 1, 1], [], []>} : vector<6x2xf32>, vector<2x128xf32>, vector<6x128xf32> -> vector<6x128xf32>
    %12 = vector.extract_strided_slice %7 {offsets = [0, 128], sizes = [2, 128], strides = [1, 1]} : vector<2x384xf32> to vector<2x128xf32>
    %c1 = arith.constant 1 : index
    %c0_15 = arith.constant 0 : index
    %c0_16 = arith.constant 0 : index
    %13 = vector.load %arg2[%c1, %c0_15, %c0_16] : memref<3x6x2xf32, #tpu.memory_space<vmem>>, vector<1x6x2xf32>
    %14 = vector.shape_cast %13 : vector<1x6x2xf32> to vector<6x2xf32>
    %cst_17 = arith.constant dense<0.000000e+00> : vector<6x128xf32>
    %15 = tpu.matmul %14, %12, %cst_17 {dimension_numbers = #tpu.dot_dimension_numbers<[1], [0], [0], [1], [0, 0, 1, 1], [], []>} : vector<6x2xf32>, vector<2x128xf32>, vector<6x128xf32> -> vector<6x128xf32>
    %16 = arith.addf %11, %15 : vector<6x128xf32>
    %17 = vector.extract_strided_slice %7 {offsets = [0, 256], sizes = [2, 128], strides = [1, 1]} : vector<2x384xf32> to vector<2x128xf32>
    %c2 = arith.constant 2 : index
    %c0_18 = arith.constant 0 : index
    %c0_19 = arith.constant 0 : index
    %18 = vector.load %arg2[%c2, %c0_18, %c0_19] : memref<3x6x2xf32, #tpu.memory_space<vmem>>, vector<1x6x2xf32>
    %19 = vector.shape_cast %18 : vector<1x6x2xf32> to vector<6x2xf32>
    %cst_20 = arith.constant dense<0.000000e+00> : vector<6x128xf32>
    %20 = tpu.matmul %19, %17, %cst_20 {dimension_numbers = #tpu.dot_dimension_numbers<[1], [0], [0], [1], [0, 0, 1, 1], [], []>} : vector<6x2xf32>, vector<2x128xf32>, vector<6x128xf32> -> vector<6x128xf32>
    %21 = arith.addf %16, %20 : vector<6x128xf32>
    %22 = vector.broadcast %2 : vector<1x128xf32> to vector<6x128xf32>
    %23 = arith.addf %21, %22 : vector<6x128xf32>
    %cst_21 = arith.constant dense<0.000000e+00> : vector<128xf32>
    %24 = vector.multi_reduction <add>, %23, %cst_21 [0] : vector<6x128xf32> to vector<128xf32>
    %25 = vector.shape_cast %24 : vector<128xf32> to vector<1x128xf32>
    %26 = arith.mulf %23, %23 : vector<6x128xf32>
    %cst_22 = arith.constant dense<0.000000e+00> : vector<128xf32>
    %27 = vector.multi_reduction <add>, %26, %cst_22 [0] : vector<6x128xf32> to vector<128xf32>
    %28 = vector.shape_cast %27 : vector<128xf32> to vector<1x128xf32>
    %cst_23 = arith.constant dense<0.000000e+00> : vector<1x32xf32>
    %29 = tpu.matmul %25, %3, %cst_23 {dimension_numbers = #tpu.dot_dimension_numbers<[1], [0], [0], [1], [0, 0, 1, 1], [], []>} : vector<1x128xf32>, vector<128x32xf32>, vector<1x32xf32> -> vector<1x32xf32>
    %cst_24 = arith.constant 0.055555556 : f32
    %30 = vector.broadcast %cst_24 : f32 to vector<1x32xf32>
    %31 = arith.mulf %29, %30 : vector<1x32xf32>
    %cst_25 = arith.constant dense<0.000000e+00> : vector<1x32xf32>
    %32 = tpu.matmul %28, %3, %cst_25 {dimension_numbers = #tpu.dot_dimension_numbers<[1], [0], [0], [1], [0, 0, 1, 1], [], []>} : vector<1x128xf32>, vector<128x32xf32>, vector<1x32xf32> -> vector<1x32xf32>
    %cst_26 = arith.constant 0.055555556 : f32
    %33 = vector.broadcast %cst_26 : f32 to vector<1x32xf32>
    %34 = arith.mulf %32, %33 : vector<1x32xf32>
    %35 = arith.mulf %31, %31 : vector<1x32xf32>
    %36 = arith.subf %34, %35 : vector<1x32xf32>
    %37 = vector.extract_strided_slice %5 {offsets = [0, 0], sizes = [1, 32], strides = [1, 1]} : vector<2x32xf32> to vector<1x32xf32>
    %cst_27 = arith.constant 9.99999974E-6 : f32
    %38 = vector.broadcast %cst_27 : f32 to vector<1x32xf32>
    %39 = arith.addf %36, %38 : vector<1x32xf32>
    %40 = math.rsqrt %39 : vector<1x32xf32>
    %41 = arith.mulf %37, %40 : vector<1x32xf32>
    %42 = vector.extract_strided_slice %5 {offsets = [1, 0], sizes = [1, 32], strides = [1, 1]} : vector<2x32xf32> to vector<1x32xf32>
    %43 = arith.mulf %31, %41 : vector<1x32xf32>
    %44 = arith.subf %42, %43 : vector<1x32xf32>
    %cst_28 = arith.constant dense<0.000000e+00> : vector<1x128xf32>
    %45 = tpu.matmul %41, %4, %cst_28 {dimension_numbers = #tpu.dot_dimension_numbers<[1], [0], [0], [1], [0, 0, 1, 1], [], []>} : vector<1x32xf32>, vector<32x128xf32>, vector<1x128xf32> -> vector<1x128xf32>
    %cst_29 = arith.constant dense<0.000000e+00> : vector<1x128xf32>
    %46 = tpu.matmul %44, %4, %cst_29 {dimension_numbers = #tpu.dot_dimension_numbers<[1], [0], [0], [1], [0, 0, 1, 1], [], []>} : vector<1x32xf32>, vector<32x128xf32>, vector<1x128xf32> -> vector<1x128xf32>
    %47 = vector.broadcast %45 : vector<1x128xf32> to vector<6x128xf32>
    %48 = arith.mulf %23, %47 : vector<6x128xf32>
    %49 = vector.broadcast %46 : vector<1x128xf32> to vector<6x128xf32>
    %50 = arith.addf %48, %49 : vector<6x128xf32>
    %cst_30 = arith.constant 2.000000e-02 : f32
    %51 = vector.broadcast %cst_30 : f32 to vector<6x128xf32>
    %52 = arith.mulf %51, %50 : vector<6x128xf32>
    %53 = arith.maximumf %50, %52 : vector<6x128xf32>
    %c0_31 = arith.constant 0 : index
    %c0_32 = arith.constant 0 : index
    %54 = vector.load %arg7[%c0_31, %c0_32] : memref<128x384xbf16, #tpu.memory_space<vmem>>, vector<128x384xbf16>
    %c0_33 = arith.constant 0 : index
    %c0_34 = arith.constant 0 : index
    %55 = vector.load %arg9[%c0_33, %c0_34] : memref<1x128xf32, #tpu.memory_space<vmem>>, vector<1x128xf32>
    %c0_35 = arith.constant 0 : index
    %c0_36 = arith.constant 0 : index
    %56 = vector.load %arg10[%c0_35, %c0_36] : memref<128x16xf32, #tpu.memory_space<vmem>>, vector<128x16xf32>
    %c0_37 = arith.constant 0 : index
    %c0_38 = arith.constant 0 : index
    %57 = vector.load %arg11[%c0_37, %c0_38] : memref<16x128xf32, #tpu.memory_space<vmem>>, vector<16x128xf32>
    %c0_39 = arith.constant 0 : index
    %c0_40 = arith.constant 0 : index
    %58 = vector.load %arg12[%c0_39, %c0_40] : memref<2x16xf32, #tpu.memory_space<vmem>>, vector<2x16xf32>
    %59 = arith.truncf %53 : vector<6x128xf32> to vector<6x128xbf16>
    %cst_41 = arith.constant dense<0.000000e+00> : vector<6x384xf32>
    %60 = tpu.matmul %59, %54, %cst_41 {dimension_numbers = #tpu.dot_dimension_numbers<[1], [0], [0], [1], [0, 0, 1, 1], [], []>} : vector<6x128xbf16>, vector<128x384xbf16>, vector<6x384xf32> -> vector<6x384xf32>
    %61 = vector.extract_strided_slice %60 {offsets = [0, 0], sizes = [6, 128], strides = [1, 1]} : vector<6x384xf32> to vector<6x128xf32>
    %c0_42 = arith.constant 0 : index
    %c0_43 = arith.constant 0 : index
    %c0_44 = arith.constant 0 : index
    %62 = vector.load %arg8[%c0_42, %c0_43, %c0_44] : memref<3x14x6xf32, #tpu.memory_space<vmem>>, vector<1x14x6xf32>
    %63 = vector.shape_cast %62 : vector<1x14x6xf32> to vector<14x6xf32>
    %cst_45 = arith.constant dense<0.000000e+00> : vector<14x128xf32>
    %64 = tpu.matmul %63, %61, %cst_45 {dimension_numbers = #tpu.dot_dimension_numbers<[1], [0], [0], [1], [0, 0, 1, 1], [], []>} : vector<14x6xf32>, vector<6x128xf32>, vector<14x128xf32> -> vector<14x128xf32>
    %65 = vector.extract_strided_slice %60 {offsets = [0, 128], sizes = [6, 128], strides = [1, 1]} : vector<6x384xf32> to vector<6x128xf32>
    %c1_46 = arith.constant 1 : index
    %c0_47 = arith.constant 0 : index
    %c0_48 = arith.constant 0 : index
    %66 = vector.load %arg8[%c1_46, %c0_47, %c0_48] : memref<3x14x6xf32, #tpu.memory_space<vmem>>, vector<1x14x6xf32>
    %67 = vector.shape_cast %66 : vector<1x14x6xf32> to vector<14x6xf32>
    %cst_49 = arith.constant dense<0.000000e+00> : vector<14x128xf32>
    %68 = tpu.matmul %67, %65, %cst_49 {dimension_numbers = #tpu.dot_dimension_numbers<[1], [0], [0], [1], [0, 0, 1, 1], [], []>} : vector<14x6xf32>, vector<6x128xf32>, vector<14x128xf32> -> vector<14x128xf32>
    %69 = arith.addf %64, %68 : vector<14x128xf32>
    %70 = vector.extract_strided_slice %60 {offsets = [0, 256], sizes = [6, 128], strides = [1, 1]} : vector<6x384xf32> to vector<6x128xf32>
    %c2_50 = arith.constant 2 : index
    %c0_51 = arith.constant 0 : index
    %c0_52 = arith.constant 0 : index
    %71 = vector.load %arg8[%c2_50, %c0_51, %c0_52] : memref<3x14x6xf32, #tpu.memory_space<vmem>>, vector<1x14x6xf32>
    %72 = vector.shape_cast %71 : vector<1x14x6xf32> to vector<14x6xf32>
    %cst_53 = arith.constant dense<0.000000e+00> : vector<14x128xf32>
    %73 = tpu.matmul %72, %70, %cst_53 {dimension_numbers = #tpu.dot_dimension_numbers<[1], [0], [0], [1], [0, 0, 1, 1], [], []>} : vector<14x6xf32>, vector<6x128xf32>, vector<14x128xf32> -> vector<14x128xf32>
    %74 = arith.addf %69, %73 : vector<14x128xf32>
    %75 = vector.broadcast %55 : vector<1x128xf32> to vector<14x128xf32>
    %76 = arith.addf %74, %75 : vector<14x128xf32>
    %cst_54 = arith.constant dense<0.000000e+00> : vector<128xf32>
    %77 = vector.multi_reduction <add>, %76, %cst_54 [0] : vector<14x128xf32> to vector<128xf32>
    %78 = vector.shape_cast %77 : vector<128xf32> to vector<1x128xf32>
    %79 = arith.mulf %76, %76 : vector<14x128xf32>
    %cst_55 = arith.constant dense<0.000000e+00> : vector<128xf32>
    %80 = vector.multi_reduction <add>, %79, %cst_55 [0] : vector<14x128xf32> to vector<128xf32>
    %81 = vector.shape_cast %80 : vector<128xf32> to vector<1x128xf32>
    %cst_56 = arith.constant dense<0.000000e+00> : vector<1x16xf32>
    %82 = tpu.matmul %78, %56, %cst_56 {dimension_numbers = #tpu.dot_dimension_numbers<[1], [0], [0], [1], [0, 0, 1, 1], [], []>} : vector<1x128xf32>, vector<128x16xf32>, vector<1x16xf32> -> vector<1x16xf32>
    %cst_57 = arith.constant 0.0102040814 : f32
    %83 = vector.broadcast %cst_57 : f32 to vector<1x16xf32>
    %84 = arith.mulf %82, %83 : vector<1x16xf32>
    %cst_58 = arith.constant dense<0.000000e+00> : vector<1x16xf32>
    %85 = tpu.matmul %81, %56, %cst_58 {dimension_numbers = #tpu.dot_dimension_numbers<[1], [0], [0], [1], [0, 0, 1, 1], [], []>} : vector<1x128xf32>, vector<128x16xf32>, vector<1x16xf32> -> vector<1x16xf32>
    %cst_59 = arith.constant 0.0102040814 : f32
    %86 = vector.broadcast %cst_59 : f32 to vector<1x16xf32>
    %87 = arith.mulf %85, %86 : vector<1x16xf32>
    %88 = arith.mulf %84, %84 : vector<1x16xf32>
    %89 = arith.subf %87, %88 : vector<1x16xf32>
    %90 = vector.extract_strided_slice %58 {offsets = [0, 0], sizes = [1, 16], strides = [1, 1]} : vector<2x16xf32> to vector<1x16xf32>
    %cst_60 = arith.constant 9.99999974E-6 : f32
    %91 = vector.broadcast %cst_60 : f32 to vector<1x16xf32>
    %92 = arith.addf %89, %91 : vector<1x16xf32>
    %93 = math.rsqrt %92 : vector<1x16xf32>
    %94 = arith.mulf %90, %93 : vector<1x16xf32>
    %95 = vector.extract_strided_slice %58 {offsets = [1, 0], sizes = [1, 16], strides = [1, 1]} : vector<2x16xf32> to vector<1x16xf32>
    %96 = arith.mulf %84, %94 : vector<1x16xf32>
    %97 = arith.subf %95, %96 : vector<1x16xf32>
    %cst_61 = arith.constant dense<0.000000e+00> : vector<1x128xf32>
    %98 = tpu.matmul %94, %57, %cst_61 {dimension_numbers = #tpu.dot_dimension_numbers<[1], [0], [0], [1], [0, 0, 1, 1], [], []>} : vector<1x16xf32>, vector<16x128xf32>, vector<1x128xf32> -> vector<1x128xf32>
    %cst_62 = arith.constant dense<0.000000e+00> : vector<1x128xf32>
    %99 = tpu.matmul %97, %57, %cst_62 {dimension_numbers = #tpu.dot_dimension_numbers<[1], [0], [0], [1], [0, 0, 1, 1], [], []>} : vector<1x16xf32>, vector<16x128xf32>, vector<1x128xf32> -> vector<1x128xf32>
    %100 = vector.broadcast %98 : vector<1x128xf32> to vector<14x128xf32>
    %101 = arith.mulf %76, %100 : vector<14x128xf32>
    %102 = vector.broadcast %99 : vector<1x128xf32> to vector<14x128xf32>
    %103 = arith.addf %101, %102 : vector<14x128xf32>
    %cst_63 = arith.constant 2.000000e-02 : f32
    %104 = vector.broadcast %cst_63 : f32 to vector<14x128xf32>
    %105 = arith.mulf %104, %103 : vector<14x128xf32>
    %106 = arith.maximumf %103, %105 : vector<14x128xf32>
    %c0_64 = arith.constant 0 : index
    %c0_65 = arith.constant 0 : index
    %107 = vector.load %arg13[%c0_64, %c0_65] : memref<128x384xbf16, #tpu.memory_space<vmem>>, vector<128x384xbf16>
    %c0_66 = arith.constant 0 : index
    %c0_67 = arith.constant 0 : index
    %108 = vector.load %arg15[%c0_66, %c0_67] : memref<1x128xf32, #tpu.memory_space<vmem>>, vector<1x128xf32>
    %c0_68 = arith.constant 0 : index
    %c0_69 = arith.constant 0 : index
    %109 = vector.load %arg16[%c0_68, %c0_69] : memref<128x8xf32, #tpu.memory_space<vmem>>, vector<128x8xf32>
    %c0_70 = arith.constant 0 : index
    %c0_71 = arith.constant 0 : index
    %110 = vector.load %arg17[%c0_70, %c0_71] : memref<8x128xf32, #tpu.memory_space<vmem>>, vector<8x128xf32>
    %c0_72 = arith.constant 0 : index
    %c0_73 = arith.constant 0 : index
    %111 = vector.load %arg18[%c0_72, %c0_73] : memref<2x8xf32, #tpu.memory_space<vmem>>, vector<2x8xf32>
    %112 = arith.truncf %106 : vector<14x128xf32> to vector<14x128xbf16>
    %cst_74 = arith.constant dense<0.000000e+00> : vector<14x384xf32>
    %113 = tpu.matmul %112, %107, %cst_74 {dimension_numbers = #tpu.dot_dimension_numbers<[1], [0], [0], [1], [0, 0, 1, 1], [], []>} : vector<14x128xbf16>, vector<128x384xbf16>, vector<14x384xf32> -> vector<14x384xf32>
    %114 = vector.extract_strided_slice %113 {offsets = [0, 0], sizes = [14, 128], strides = [1, 1]} : vector<14x384xf32> to vector<14x128xf32>
    %c0_75 = arith.constant 0 : index
    %c0_76 = arith.constant 0 : index
    %c0_77 = arith.constant 0 : index
    %115 = vector.load %arg14[%c0_75, %c0_76, %c0_77] : memref<3x30x14xf32, #tpu.memory_space<vmem>>, vector<1x30x14xf32>
    %116 = vector.shape_cast %115 : vector<1x30x14xf32> to vector<30x14xf32>
    %cst_78 = arith.constant dense<0.000000e+00> : vector<30x128xf32>
    %117 = tpu.matmul %116, %114, %cst_78 {dimension_numbers = #tpu.dot_dimension_numbers<[1], [0], [0], [1], [0, 0, 1, 1], [], []>} : vector<30x14xf32>, vector<14x128xf32>, vector<30x128xf32> -> vector<30x128xf32>
    %118 = vector.extract_strided_slice %113 {offsets = [0, 128], sizes = [14, 128], strides = [1, 1]} : vector<14x384xf32> to vector<14x128xf32>
    %c1_79 = arith.constant 1 : index
    %c0_80 = arith.constant 0 : index
    %c0_81 = arith.constant 0 : index
    %119 = vector.load %arg14[%c1_79, %c0_80, %c0_81] : memref<3x30x14xf32, #tpu.memory_space<vmem>>, vector<1x30x14xf32>
    %120 = vector.shape_cast %119 : vector<1x30x14xf32> to vector<30x14xf32>
    %cst_82 = arith.constant dense<0.000000e+00> : vector<30x128xf32>
    %121 = tpu.matmul %120, %118, %cst_82 {dimension_numbers = #tpu.dot_dimension_numbers<[1], [0], [0], [1], [0, 0, 1, 1], [], []>} : vector<30x14xf32>, vector<14x128xf32>, vector<30x128xf32> -> vector<30x128xf32>
    %122 = arith.addf %117, %121 : vector<30x128xf32>
    %123 = vector.extract_strided_slice %113 {offsets = [0, 256], sizes = [14, 128], strides = [1, 1]} : vector<14x384xf32> to vector<14x128xf32>
    %c2_83 = arith.constant 2 : index
    %c0_84 = arith.constant 0 : index
    %c0_85 = arith.constant 0 : index
    %124 = vector.load %arg14[%c2_83, %c0_84, %c0_85] : memref<3x30x14xf32, #tpu.memory_space<vmem>>, vector<1x30x14xf32>
    %125 = vector.shape_cast %124 : vector<1x30x14xf32> to vector<30x14xf32>
    %cst_86 = arith.constant dense<0.000000e+00> : vector<30x128xf32>
    %126 = tpu.matmul %125, %123, %cst_86 {dimension_numbers = #tpu.dot_dimension_numbers<[1], [0], [0], [1], [0, 0, 1, 1], [], []>} : vector<30x14xf32>, vector<14x128xf32>, vector<30x128xf32> -> vector<30x128xf32>
    %127 = arith.addf %122, %126 : vector<30x128xf32>
    %128 = vector.broadcast %108 : vector<1x128xf32> to vector<30x128xf32>
    %129 = arith.addf %127, %128 : vector<30x128xf32>
    %cst_87 = arith.constant dense<0.000000e+00> : vector<128xf32>
    %130 = vector.multi_reduction <add>, %129, %cst_87 [0] : vector<30x128xf32> to vector<128xf32>
    %131 = vector.shape_cast %130 : vector<128xf32> to vector<1x128xf32>
    %132 = arith.mulf %129, %129 : vector<30x128xf32>
    %cst_88 = arith.constant dense<0.000000e+00> : vector<128xf32>
    %133 = vector.multi_reduction <add>, %132, %cst_88 [0] : vector<30x128xf32> to vector<128xf32>
    %134 = vector.shape_cast %133 : vector<128xf32> to vector<1x128xf32>
    %cst_89 = arith.constant dense<0.000000e+00> : vector<1x8xf32>
    %135 = tpu.matmul %131, %109, %cst_89 {dimension_numbers = #tpu.dot_dimension_numbers<[1], [0], [0], [1], [0, 0, 1, 1], [], []>} : vector<1x128xf32>, vector<128x8xf32>, vector<1x8xf32> -> vector<1x8xf32>
    %cst_90 = arith.constant 0.00222222228 : f32
    %136 = vector.broadcast %cst_90 : f32 to vector<1x8xf32>
    %137 = arith.mulf %135, %136 : vector<1x8xf32>
    %cst_91 = arith.constant dense<0.000000e+00> : vector<1x8xf32>
    %138 = tpu.matmul %134, %109, %cst_91 {dimension_numbers = #tpu.dot_dimension_numbers<[1], [0], [0], [1], [0, 0, 1, 1], [], []>} : vector<1x128xf32>, vector<128x8xf32>, vector<1x8xf32> -> vector<1x8xf32>
    %cst_92 = arith.constant 0.00222222228 : f32
    %139 = vector.broadcast %cst_92 : f32 to vector<1x8xf32>
    %140 = arith.mulf %138, %139 : vector<1x8xf32>
    %141 = arith.mulf %137, %137 : vector<1x8xf32>
    %142 = arith.subf %140, %141 : vector<1x8xf32>
    %143 = vector.extract_strided_slice %111 {offsets = [0, 0], sizes = [1, 8], strides = [1, 1]} : vector<2x8xf32> to vector<1x8xf32>
    %cst_93 = arith.constant 9.99999974E-6 : f32
    %144 = vector.broadcast %cst_93 : f32 to vector<1x8xf32>
    %145 = arith.addf %142, %144 : vector<1x8xf32>
    %146 = math.rsqrt %145 : vector<1x8xf32>
    %147 = arith.mulf %143, %146 : vector<1x8xf32>
    %148 = vector.extract_strided_slice %111 {offsets = [1, 0], sizes = [1, 8], strides = [1, 1]} : vector<2x8xf32> to vector<1x8xf32>
    %149 = arith.mulf %137, %147 : vector<1x8xf32>
    %150 = arith.subf %148, %149 : vector<1x8xf32>
    %cst_94 = arith.constant dense<0.000000e+00> : vector<1x128xf32>
    %151 = tpu.matmul %147, %110, %cst_94 {dimension_numbers = #tpu.dot_dimension_numbers<[1], [0], [0], [1], [0, 0, 1, 1], [], []>} : vector<1x8xf32>, vector<8x128xf32>, vector<1x128xf32> -> vector<1x128xf32>
    %cst_95 = arith.constant dense<0.000000e+00> : vector<1x128xf32>
    %152 = tpu.matmul %150, %110, %cst_95 {dimension_numbers = #tpu.dot_dimension_numbers<[1], [0], [0], [1], [0, 0, 1, 1], [], []>} : vector<1x8xf32>, vector<8x128xf32>, vector<1x128xf32> -> vector<1x128xf32>
    %153 = vector.broadcast %151 : vector<1x128xf32> to vector<30x128xf32>
    %154 = arith.mulf %129, %153 : vector<30x128xf32>
    %155 = vector.broadcast %152 : vector<1x128xf32> to vector<30x128xf32>
    %156 = arith.addf %154, %155 : vector<30x128xf32>
    %cst_96 = arith.constant 2.000000e-02 : f32
    %157 = vector.broadcast %cst_96 : f32 to vector<30x128xf32>
    %158 = arith.mulf %157, %156 : vector<30x128xf32>
    %159 = arith.maximumf %156, %158 : vector<30x128xf32>
    %c0_97 = arith.constant 0 : index
    %c0_98 = arith.constant 0 : index
    %160 = vector.load %arg19[%c0_97, %c0_98] : memref<128x768xbf16, #tpu.memory_space<vmem>>, vector<128x768xbf16>
    %c0_99 = arith.constant 0 : index
    %c0_100 = arith.constant 0 : index
    %161 = vector.load %arg21[%c0_99, %c0_100] : memref<1x256xf32, #tpu.memory_space<vmem>>, vector<1x256xf32>
    %c0_101 = arith.constant 0 : index
    %c0_102 = arith.constant 0 : index
    %162 = vector.load %arg22[%c0_101, %c0_102] : memref<256x8xf32, #tpu.memory_space<vmem>>, vector<256x8xf32>
    %c0_103 = arith.constant 0 : index
    %c0_104 = arith.constant 0 : index
    %163 = vector.load %arg23[%c0_103, %c0_104] : memref<8x256xf32, #tpu.memory_space<vmem>>, vector<8x256xf32>
    %c0_105 = arith.constant 0 : index
    %c0_106 = arith.constant 0 : index
    %164 = vector.load %arg24[%c0_105, %c0_106] : memref<2x8xf32, #tpu.memory_space<vmem>>, vector<2x8xf32>
    %165 = arith.truncf %159 : vector<30x128xf32> to vector<30x128xbf16>
    %cst_107 = arith.constant dense<0.000000e+00> : vector<30x768xf32>
    %166 = tpu.matmul %165, %160, %cst_107 {dimension_numbers = #tpu.dot_dimension_numbers<[1], [0], [0], [1], [0, 0, 1, 1], [], []>} : vector<30x128xbf16>, vector<128x768xbf16>, vector<30x768xf32> -> vector<30x768xf32>
    %167 = vector.extract_strided_slice %166 {offsets = [0, 0], sizes = [30, 256], strides = [1, 1]} : vector<30x768xf32> to vector<30x256xf32>
    %c0_108 = arith.constant 0 : index
    %c0_109 = arith.constant 0 : index
    %c0_110 = arith.constant 0 : index
    %168 = vector.load %arg20[%c0_108, %c0_109, %c0_110] : memref<3x62x30xf32, #tpu.memory_space<vmem>>, vector<1x62x30xf32>
    %169 = vector.shape_cast %168 : vector<1x62x30xf32> to vector<62x30xf32>
    %cst_111 = arith.constant dense<0.000000e+00> : vector<62x256xf32>
    %170 = tpu.matmul %169, %167, %cst_111 {dimension_numbers = #tpu.dot_dimension_numbers<[1], [0], [0], [1], [0, 0, 1, 1], [], []>} : vector<62x30xf32>, vector<30x256xf32>, vector<62x256xf32> -> vector<62x256xf32>
    %171 = vector.extract_strided_slice %166 {offsets = [0, 256], sizes = [30, 256], strides = [1, 1]} : vector<30x768xf32> to vector<30x256xf32>
    %c1_112 = arith.constant 1 : index
    %c0_113 = arith.constant 0 : index
    %c0_114 = arith.constant 0 : index
    %172 = vector.load %arg20[%c1_112, %c0_113, %c0_114] : memref<3x62x30xf32, #tpu.memory_space<vmem>>, vector<1x62x30xf32>
    %173 = vector.shape_cast %172 : vector<1x62x30xf32> to vector<62x30xf32>
    %cst_115 = arith.constant dense<0.000000e+00> : vector<62x256xf32>
    %174 = tpu.matmul %173, %171, %cst_115 {dimension_numbers = #tpu.dot_dimension_numbers<[1], [0], [0], [1], [0, 0, 1, 1], [], []>} : vector<62x30xf32>, vector<30x256xf32>, vector<62x256xf32> -> vector<62x256xf32>
    %175 = arith.addf %170, %174 : vector<62x256xf32>
    %176 = vector.extract_strided_slice %166 {offsets = [0, 512], sizes = [30, 256], strides = [1, 1]} : vector<30x768xf32> to vector<30x256xf32>
    %c2_116 = arith.constant 2 : index
    %c0_117 = arith.constant 0 : index
    %c0_118 = arith.constant 0 : index
    %177 = vector.load %arg20[%c2_116, %c0_117, %c0_118] : memref<3x62x30xf32, #tpu.memory_space<vmem>>, vector<1x62x30xf32>
    %178 = vector.shape_cast %177 : vector<1x62x30xf32> to vector<62x30xf32>
    %cst_119 = arith.constant dense<0.000000e+00> : vector<62x256xf32>
    %179 = tpu.matmul %178, %176, %cst_119 {dimension_numbers = #tpu.dot_dimension_numbers<[1], [0], [0], [1], [0, 0, 1, 1], [], []>} : vector<62x30xf32>, vector<30x256xf32>, vector<62x256xf32> -> vector<62x256xf32>
    %180 = arith.addf %175, %179 : vector<62x256xf32>
    %181 = vector.broadcast %161 : vector<1x256xf32> to vector<62x256xf32>
    %182 = arith.addf %180, %181 : vector<62x256xf32>
    %cst_120 = arith.constant dense<0.000000e+00> : vector<256xf32>
    %183 = vector.multi_reduction <add>, %182, %cst_120 [0] : vector<62x256xf32> to vector<256xf32>
    %184 = vector.shape_cast %183 : vector<256xf32> to vector<1x256xf32>
    %185 = arith.mulf %182, %182 : vector<62x256xf32>
    %cst_121 = arith.constant dense<0.000000e+00> : vector<256xf32>
    %186 = vector.multi_reduction <add>, %185, %cst_121 [0] : vector<62x256xf32> to vector<256xf32>
    %187 = vector.shape_cast %186 : vector<256xf32> to vector<1x256xf32>
    %cst_122 = arith.constant dense<0.000000e+00> : vector<1x8xf32>
    %188 = tpu.matmul %184, %162, %cst_122 {dimension_numbers = #tpu.dot_dimension_numbers<[1], [0], [0], [1], [0, 0, 1, 1], [], []>} : vector<1x256xf32>, vector<256x8xf32>, vector<1x8xf32> -> vector<1x8xf32>
    %cst_123 = arith.constant 5.20291389E-4 : f32
    %189 = vector.broadcast %cst_123 : f32 to vector<1x8xf32>
    %190 = arith.mulf %188, %189 : vector<1x8xf32>
    %cst_124 = arith.constant dense<0.000000e+00> : vector<1x8xf32>
    %191 = tpu.matmul %187, %162, %cst_124 {dimension_numbers = #tpu.dot_dimension_numbers<[1], [0], [0], [1], [0, 0, 1, 1], [], []>} : vector<1x256xf32>, vector<256x8xf32>, vector<1x8xf32> -> vector<1x8xf32>
    %cst_125 = arith.constant 5.20291389E-4 : f32
    %192 = vector.broadcast %cst_125 : f32 to vector<1x8xf32>
    %193 = arith.mulf %191, %192 : vector<1x8xf32>
    %194 = arith.mulf %190, %190 : vector<1x8xf32>
    %195 = arith.subf %193, %194 : vector<1x8xf32>
    %196 = vector.extract_strided_slice %164 {offsets = [0, 0], sizes = [1, 8], strides = [1, 1]} : vector<2x8xf32> to vector<1x8xf32>
    %cst_126 = arith.constant 9.99999974E-6 : f32
    %197 = vector.broadcast %cst_126 : f32 to vector<1x8xf32>
    %198 = arith.addf %195, %197 : vector<1x8xf32>
    %199 = math.rsqrt %198 : vector<1x8xf32>
    %200 = arith.mulf %196, %199 : vector<1x8xf32>
    %201 = vector.extract_strided_slice %164 {offsets = [1, 0], sizes = [1, 8], strides = [1, 1]} : vector<2x8xf32> to vector<1x8xf32>
    %202 = arith.mulf %190, %200 : vector<1x8xf32>
    %203 = arith.subf %201, %202 : vector<1x8xf32>
    %cst_127 = arith.constant dense<0.000000e+00> : vector<1x256xf32>
    %204 = tpu.matmul %200, %163, %cst_127 {dimension_numbers = #tpu.dot_dimension_numbers<[1], [0], [0], [1], [0, 0, 1, 1], [], []>} : vector<1x8xf32>, vector<8x256xf32>, vector<1x256xf32> -> vector<1x256xf32>
    %cst_128 = arith.constant dense<0.000000e+00> : vector<1x256xf32>
    %205 = tpu.matmul %203, %163, %cst_128 {dimension_numbers = #tpu.dot_dimension_numbers<[1], [0], [0], [1], [0, 0, 1, 1], [], []>} : vector<1x8xf32>, vector<8x256xf32>, vector<1x256xf32> -> vector<1x256xf32>
    %206 = vector.broadcast %204 : vector<1x256xf32> to vector<62x256xf32>
    %207 = arith.mulf %182, %206 : vector<62x256xf32>
    %208 = vector.broadcast %205 : vector<1x256xf32> to vector<62x256xf32>
    %209 = arith.addf %207, %208 : vector<62x256xf32>
    %cst_129 = arith.constant 2.000000e-02 : f32
    %210 = vector.broadcast %cst_129 : f32 to vector<62x256xf32>
    %211 = arith.mulf %210, %209 : vector<62x256xf32>
    %212 = arith.maximumf %209, %211 : vector<62x256xf32>
    %c0_130 = arith.constant 0 : index
    %c0_131 = arith.constant 0 : index
    %213 = vector.load %arg25[%c0_130, %c0_131] : memref<256x256xbf16, #tpu.memory_space<vmem>>, vector<256x256xbf16>
    %c0_132 = arith.constant 0 : index
    %c0_133 = arith.constant 0 : index
    %214 = vector.load %arg27[%c0_132, %c0_133] : memref<1x128xf32, #tpu.memory_space<vmem>>, vector<1x128xf32>
    %215 = arith.truncf %212 : vector<62x256xf32> to vector<62x256xbf16>
    %cst_134 = arith.constant dense<0.000000e+00> : vector<62x256xf32>
    %216 = tpu.matmul %215, %213, %cst_134 {dimension_numbers = #tpu.dot_dimension_numbers<[1], [0], [0], [1], [0, 0, 1, 1], [], []>} : vector<62x256xbf16>, vector<256x256xbf16>, vector<62x256xf32> -> vector<62x256xf32>
    %217 = vector.extract_strided_slice %216 {offsets = [0, 0], sizes = [62, 128], strides = [1, 1]} : vector<62x256xf32> to vector<62x128xf32>
    %c0_135 = arith.constant 0 : index
    %c0_136 = arith.constant 0 : index
    %c0_137 = arith.constant 0 : index
    %218 = vector.load %arg26[%c0_135, %c0_136, %c0_137] : memref<2x64x62xf32, #tpu.memory_space<vmem>>, vector<1x64x62xf32>
    %219 = vector.shape_cast %218 : vector<1x64x62xf32> to vector<64x62xf32>
    %cst_138 = arith.constant dense<0.000000e+00> : vector<64x128xf32>
    %220 = tpu.matmul %219, %217, %cst_138 {dimension_numbers = #tpu.dot_dimension_numbers<[1], [0], [0], [1], [0, 0, 1, 1], [], []>} : vector<64x62xf32>, vector<62x128xf32>, vector<64x128xf32> -> vector<64x128xf32>
    %221 = vector.extract_strided_slice %216 {offsets = [0, 128], sizes = [62, 128], strides = [1, 1]} : vector<62x256xf32> to vector<62x128xf32>
    %c1_139 = arith.constant 1 : index
    %c0_140 = arith.constant 0 : index
    %c0_141 = arith.constant 0 : index
    %222 = vector.load %arg26[%c1_139, %c0_140, %c0_141] : memref<2x64x62xf32, #tpu.memory_space<vmem>>, vector<1x64x62xf32>
    %223 = vector.shape_cast %222 : vector<1x64x62xf32> to vector<64x62xf32>
    %cst_142 = arith.constant dense<0.000000e+00> : vector<64x128xf32>
    %224 = tpu.matmul %223, %221, %cst_142 {dimension_numbers = #tpu.dot_dimension_numbers<[1], [0], [0], [1], [0, 0, 1, 1], [], []>} : vector<64x62xf32>, vector<62x128xf32>, vector<64x128xf32> -> vector<64x128xf32>
    %225 = arith.addf %220, %224 : vector<64x128xf32>
    %226 = vector.broadcast %214 : vector<1x128xf32> to vector<64x128xf32>
    %227 = arith.addf %225, %226 : vector<64x128xf32>
    %228 = math.tanh %227 : vector<64x128xf32>
    %c0_143 = arith.constant 0 : index
    %c0_144 = arith.constant 0 : index
    %229 = vector.load %arg28[%c0_143, %c0_144] : memref<64x128xf32, #tpu.memory_space<vmem>>, vector<64x128xf32>
    tpu.vector_store %arg28[%c0_143, %c0_144], %228 {strides = array<i32>} : memref<64x128xf32, #tpu.memory_space<vmem>>, vector<64x128xf32>,
    return
  }
}

</mosaic_0001>

<bundles_post_ra>
// kernel: generator_x_forward.1
= control target key start
LH: loop header
LB: loop body
LE: loop exit
PB: predicated region body
PF: predicated region fallthrough
CT: control target
= control target key end

     0   :  { %s7606_s0 = inlined_call_operand.vmem [shape: f32[2,128], index: 0, kind: input, shape index: {}]   ;;  %s7607_s1 = inlined_call_operand.hbm [shape: bf16[128,384], index: 1, kind: input, shape index: {}]   ;;  %s7608_s2 = inlined_call_operand.hbm [shape: f32[3,6,2], index: 2, kind: input, shape index: {}]   ;;  %s7609_s3 = inlined_call_operand.hbm [shape: f32[1,128], index: 3, kind: input, shape index: {}]   ;;  %s7610_s4 = inlined_call_operand.hbm [shape: f32[128,32], index: 4, kind: input, shape index: {}]   ;;  %s7611_s5 = inlined_call_operand.hbm [shape: f32[32,128], index: 5, kind: input, shape index: {}]   ;;  %s7612_s6 = inlined_call_operand.hbm [shape: f32[2,32], index: 6, kind: input, shape index: {}]   ;;  %s7613_s7 = inlined_call_operand.hbm [shape: bf16[128,384], index: 7, kind: input, shape index: {}]   ;;  %s7614_s8 = inlined_call_operand.hbm [shape: f32[3,14,6], index: 8, kind: input, shape index: {}]   ;;  %s7615_s9 = inlined_call_operand.hbm [shape: f32[1,128], index: 9, kind: input, shape index: {}]   ;;  %s7616_s10 = inlined_call_operand.hbm [shape: f32[128,16], index: 10, kind: input, shape index: {}]   ;;  %s7617_s11 = inlined_call_operand.vmem [shape: f32[16,128], index: 11, kind: input, shape index: {}]   ;;  %s7618_s12 = inlined_call_operand.hbm [shape: f32[2,16], index: 12, kind: input, shape index: {}]   ;;  %s7619_s13 = inlined_call_operand.hbm [shape: bf16[128,384], index: 13, kind: input, shape index: {}]   ;;  %s7620_s14 = inlined_call_operand.hbm [shape: f32[3,30,14], index: 14, kind: input, shape index: {}]   ;;  %s7621_s15 = inlined_call_operand.hbm [shape: f32[1,128], index: 15, kind: input, shape index: {}]   ;;  %s7622_s16 = inlined_call_operand.hbm [shape: f32[128,8], index: 16, kind: input, shape index: {}]   ;;  %s7623_s17 = inlined_call_operand.hbm [shape: f32[8,128], index: 17, kind: input, shape index: {}]   ;;  %s7624_s18 = inlined_call_operand.vmem [shape: f32[2,8], index: 18, kind: input, shape index: {}, may-alias: {18,24}]   ;;  %s7625_s19 = inlined_call_operand.hbm [shape: bf16[128,768], index: 19, kind: input, shape index: {}]   ;;  %s7626_s20 = inlined_call_operand.hbm [shape: f32[3,62,30], index: 20, kind: input, shape index: {}]   ;;  %s7627_s21 = inlined_call_operand.vmem [shape: f32[1,256], index: 21, kind: input, shape index: {}]   ;;  %s7628_s22 = inlined_call_operand.hbm [shape: f32[256,8], index: 22, kind: input, shape index: {}]   ;;  %s7629_s23 = inlined_call_operand.vmem [shape: f32[8,256], index: 23, kind: input, shape index: {}]   ;;  %s7630_s24 = inlined_call_operand.vmem [shape: f32[2,8], index: 24, kind: input, shape index: {}, may-alias: {18,24}]   ;;  %s7631_s25 = inlined_call_operand.hbm [shape: bf16[256,256], index: 25, kind: input, shape index: {}]   ;;  %s7632_s26 = inlined_call_operand.hbm [shape: f32[2,64,62], index: 26, kind: input, shape index: {}]   ;;  %s7633_s27 = inlined_call_operand.vmem [shape: f32[1,128], index: 27, kind: input, shape index: {}]   ;;  %s7634_s28 = inlined_call_operand.vmem [shape: f32[64,128], index: 28, kind: output, shape index: {}]  }
   0x1   :  { %7637 = sst [smem:[#allocation45_spill]] %s7606_s0 }
   0x2   :  { %7638 = sst [smem:[#allocation46_spill]] %s7607_s1 }
   0x3   :  { %7639 = sst [smem:[#allocation47_spill]] %s7608_s2 }
   0x4   :  { %7640 = sst [smem:[#allocation48_spill]] %s7609_s3 }
   0x5   :  { %7641 = sst [smem:[#allocation49_spill]] %s7610_s4 }
   0x6   :  { %7642 = sst [smem:[#allocation50_spill]] %s7611_s5 }
   0x7   :  { %7643 = sst [smem:[#allocation51_spill]] %s7612_s6 }
   0x8   :  { %7644 = sst [smem:[#allocation52_spill]] %s7613_s7 }
   0x9   :  { %7645 = sst [smem:[#allocation53_spill]] %s7614_s8 }
   0xa   :  { %7646 = sst [smem:[#allocation54_spill]] %s7615_s9 }
   0xb   :  { %7647 = sst [smem:[#allocation55_spill]] %s7616_s10 }
   0xc   :  { %7648 = sst [smem:[#allocation56_spill]] %s7617_s11 }
   0xd   :  { %7649 = sst [smem:[#allocation57_spill]] %s7618_s12 }
   0xe   :  { %7650 = sst [smem:[#allocation58_spill]] %s7634_s28 }
   0xf   :  { %33 = vsyncpa [#allocation3], 0 }
  0x10   :  { %34 = vsyncpa [#allocation5], 0 }
  0x11   :  { %35 = vsyncpa [#allocation8], 0 }
  0x12   :  { %36 = vsyncpa [#allocation11], 0 }
  0x13   :  { %37 = vsyncpa [#allocation14], 0 }
  0x14   :  { %38 = vsyncpa [#allocation17], 0 }
  0x15   :  { %39 = vsyncpa [#allocation20], 0 }
  0x16   :  { %40 = vsyncpa [#allocation23], 0 }
  0x17   :  { %41 = vsyncpa [#allocation26], 0 }
  0x18   :  { %42 = vsyncpa [#allocation29], 0 }
  0x19   :  { %43 = vsyncpa [#allocation32], 0  ;;  %s6730_s8 = smov [#allocation4]  }
  0x1a   :  { %s63_s5 = sshll.u32 %s6730_s8, 4  ;;  %s64_s5 = int_to_ptr.vmem [resolvable:$true] %s63_s5 }
  0x1b   :  { %s6296_s9 = scalar_lea.vmem %s64_s5, 384  ;;  %p6301_p1 = scmp.lt.s32.totalorder %s64_s5, %s64_s5 }
  0x1c   :  { %p6297_p0 = scmp.ne.s32.totalorder %s64_s5, %s6296_s9  ;;  %p6302_p2 = scmp.lt.s32.totalorder %s6296_s9, %s6296_s9 }
  0x1e   :  { %p6303_p3 = por %p6302_p2, %p6301_p1 }
  0x20   :  { %p6304_p4 = pnand %p6303_p3, %p6297_p0 }
  0x22   :  { %6307 = shalt.err (!%p6304_p4)
}
  0x23   :  { %s6731_s30 = smov 128   ;;  %s6732_s3 = smov 8  }
  0x24   :  { %s7651_s0 = sld [smem:[#allocation47_spill]]  ;;  %s6733_s11 = smov [#allocation7]  }
  0x25   :  { %s85_s29 = sshll.u32 %s6733_s11, 4  ;;  %s6734_s2 = smov [#allocation10]   ;;  %s86_s29 = int_to_ptr.vmem [resolvable:$true] %s85_s29 }
  0x26   :  { %s110_s7 = sshll.u32 %s6734_s2, 4  ;;  %s6316_s12 = scalar_lea.vmem %s86_s29, 2048  ;;  %s111_s7 = int_to_ptr.vmem [resolvable:$true] %s110_s7 }
  0x27   :  { %p6317_p5 = scmp.ne.s32.totalorder %s86_s29, %s6316_s12  ;;  %p6321_p6 = scmp.lt.s32.totalorder %s86_s29, %s86_s29 }
  0x28   :  { %p6322_p7 = scmp.lt.s32.totalorder %s6316_s12, %s6316_s12 }
  0x2a   :  { %69 = dma.hbm_to_vmem [thread:$0]  %s7651_s0, 384, %s64_s5, [#allocation5], %s6731_s30, %s6731_s30, %s6732_s3  }
  0x2b   :  { %p6323_p8 = por %p6322_p7, %p6321_p6 }
  0x2d   :  { %p6324_p9 = pnand %p6323_p8, %p6317_p5 }
  0x2f   :  { %6327 = shalt.err (!%p6324_p9)
}
  0x30   :  { %s7652_s8 = sld [smem:[#allocation49_spill]]  ;;  %s6336_s5 = scalar_lea.vmem %s111_s7, 32 }
  0x31   :  { %p6337_p10 = scmp.ne.s32.totalorder %s111_s7, %s6336_s5  ;;  %p6341_p11 = scmp.lt.s32.totalorder %s111_s7, %s111_s7 }
  0x32   :  { %p6342_p12 = scmp.lt.s32.totalorder %s6336_s5, %s6336_s5 }
  0x34   :  { %p6343_p13 = por %p6342_p12, %p6341_p11 }
  0x36   :  { %91 = dma.hbm_to_vmem [thread:$0]  %s7652_s8, 2048, %s86_s29, [#allocation8], %s6731_s30, %s6731_s30, %s6732_s3  }
  0x37   :  { %p6344_p0 = pnand %p6343_p13, %p6337_p10 }
  0x39   :  { %6347 = shalt.err (!%p6344_p0)
}
  0x3a   :  { %s7653_s10 = sld [smem:[#allocation51_spill]]  ;;  %s6735_s0 = smov [#allocation13]  }
  0x3b   :  { %s131_s11 = sshll.u32 %s6735_s0, 4  ;;  %s6736_s2 = smov [#allocation16]   ;;  %s132_s11 = int_to_ptr.vmem [resolvable:$true] %s131_s11 }
  0x3c   :  { %s153_s12 = sshll.u32 %s6736_s2, 4  ;;  %s6356_s28 = scalar_lea.vmem %s132_s11, 768  ;;  %s154_s12 = int_to_ptr.vmem [resolvable:$true] %s153_s12 }
  0x3d   :  { %p6357_p1 = scmp.ne.s32.totalorder %s132_s11, %s6356_s28  ;;  %p6361_p2 = scmp.lt.s32.totalorder %s132_s11, %s132_s11 }
  0x3e   :  { %p6362_p3 = scmp.lt.s32.totalorder %s6356_s28, %s6356_s28 }
  0x40   :  { %113 = dma.hbm_to_vmem [thread:$0]  %s7653_s10, 32, %s111_s7, [#allocation11]  }
  0x41   :  { %p6363_p4 = por %p6362_p3, %p6361_p2 }
  0x43   :  { %p6364_p5 = pnand %p6363_p4, %p6357_p1 }
  0x45   :  { %6367 = shalt.err (!%p6364_p5)
}
  0x46   :  { %s7654_s4 = sld [smem:[#allocation53_spill]]  ;;  %s6376_s7 = scalar_lea.vmem %s154_s12, 2048 }
  0x47   :  { %p6377_p6 = scmp.ne.s32.totalorder %s154_s12, %s6376_s7  ;;  %p6381_p7 = scmp.lt.s32.totalorder %s154_s12, %s154_s12 }
  0x48   :  { %p6382_p8 = scmp.lt.s32.totalorder %s6376_s7, %s6376_s7 }
  0x4a   :  { %p6383_p9 = por %p6382_p8, %p6381_p7 }
  0x4c   :  { %137 = dma.hbm_to_vmem [thread:$0]  %s7654_s4, 768, %s132_s11, [#allocation14], %s6731_s30, %s6731_s30, %s6732_s3  }
  0x4d   :  { %p6384_p10 = pnand %p6383_p9, %p6377_p6 }
  0x4f   :  { %6387 = shalt.err (!%p6384_p10)
}
  0x50   :  { %s7655_s5 = sld [smem:[#allocation55_spill]]  ;;  %s6737_s9 = smov [#allocation19]  }
  0x51   :  { %s177_s6 = sshll.u32 %s6737_s9, 4  ;;  %s6738_s10 = smov [#allocation22]   ;;  %s178_s6 = int_to_ptr.vmem [resolvable:$true] %s177_s6 }
  0x52   :  { %s202_s0 = sshll.u32 %s6738_s10, 4  ;;  %s6396_s11 = scalar_lea.vmem %s178_s6, 3072  ;;  %s203_s0 = int_to_ptr.vmem [resolvable:$true] %s202_s0 }
  0x53   :  { %p6397_p11 = scmp.ne.s32.totalorder %s178_s6, %s6396_s11  ;;  %p6401_p12 = scmp.lt.s32.totalorder %s178_s6, %s178_s6 }
  0x54   :  { %p6402_p13 = scmp.lt.s32.totalorder %s6396_s11, %s6396_s11 }
  0x56   :  { %159 = dma.hbm_to_vmem [thread:$0]  %s7655_s5, 2048, %s154_s12, [#allocation17], %s6731_s30, %s6731_s30, %s6732_s3  }
  0x57   :  { %p6403_p0 = por %p6402_p13, %p6401_p12 }
  0x59   :  { %p6404_p1 = pnand %p6403_p0, %p6397_p11 }
  0x5b   :  { %6407 = shalt.err (!%p6404_p1)
}
  0x5c   :  { %s6739_s2 = smov 192   ;;  %s6740_s29 = smov 12  }
  0x5d   :  { %183 = dma.hbm_to_vmem [thread:$0]  %s7619_s13, 3072, %s178_s6, [#allocation20], %s6739_s2, %s6739_s2, %s6740_s29  }
  0x5e   :  { %s6416_s12 = scalar_lea.vmem %s203_s0, 16  ;;  %s6420_s7 = scalar_lea.vmem %s203_s0, 32 }
  0x5f   :  { %p6417_p2 = scmp.ne.s32.totalorder %s203_s0, %s6416_s12  ;;  %p6421_p3 = scmp.lt.s32.totalorder %s203_s0, %s203_s0 }
  0x60   :  { %p6422_p4 = scmp.lt.s32.totalorder %s6420_s7, %s6416_s12 }
  0x62   :  { %p6423_p5 = por %p6422_p4, %p6421_p3 }
  0x64   :  { %p6424_p6 = pnand %p6423_p5, %p6417_p2 }
  0x66   :  { %6427 = shalt.err (!%p6424_p6)
}
  0x67   :  { %205 = dma.hbm_to_vmem [thread:$0]  %s7621_s15, 16, %s203_s0, [#allocation23]  }
  0x68   :  { %s6741_s5 = smov [#allocation25]   ;;  %s6742_s10 = smov [#allocation28]  }
  0x69   :  { %s224_s9 = sshll.u32 %s6741_s5, 4  ;;  %s247_s11 = sshll.u32 %s6742_s10, 4  ;;  %s225_s9 = int_to_ptr.vmem [resolvable:$true] %s224_s9  ;;  %s248_s11 = int_to_ptr.vmem [resolvable:$true] %s247_s11 }
  0x6a   :  { %s6436_s1 = scalar_lea.vmem %s225_s9, 128  ;;  %p6441_p8 = scmp.lt.s32.totalorder %s225_s9, %s225_s9 }
  0x6b   :  { %p6437_p7 = scmp.ne.s32.totalorder %s225_s9, %s6436_s1  ;;  %p6442_p9 = scmp.lt.s32.totalorder %s6436_s1, %s6436_s1 }
  0x6d   :  { %p6443_p10 = por %p6442_p9, %p6441_p8 }
  0x6f   :  { %p6444_p11 = pnand %p6443_p10, %p6437_p7 }
  0x71   :  { %6447 = shalt.err (!%p6444_p11)
}
  0x72   :  { %227 = dma.hbm_to_vmem [thread:$0]  %s7623_s17, 128, %s225_s9, [#allocation26]  }
  0x73   :  { %s6456_s4 = scalar_lea.vmem %s248_s11, 3072  ;;  %p6461_p13 = scmp.lt.s32.totalorder %s248_s11, %s248_s11 }
  0x74   :  { %p6457_p12 = scmp.ne.s32.totalorder %s248_s11, %s6456_s4  ;;  %p6462_p0 = scmp.lt.s32.totalorder %s6456_s4, %s6456_s4 }
  0x76   :  { %p6463_p1 = por %p6462_p0, %p6461_p13 }
  0x78   :  { %p6464_p2 = pnand %p6463_p1, %p6457_p12 }
  0x7a   :  { %6467 = shalt.err (!%p6464_p2)
}
  0x7b   :  { %253 = dma.hbm_to_vmem [thread:$0]  %s7626_s20, 3072, %s248_s11, [#allocation29], %s6731_s30, %s6731_s30, %s6732_s3  }
  0x7c   :  { %s6743_s12 = smov [#allocation31]   ;;  %s6744_s28 = smov [#allocation2]  }
  0x7d   :  { %s277_s7 = sshll.u32 %s6743_s12, 4  ;;  %s51_s17 = sshll.u32 %s6744_s28, 4  ;;  %s278_s7 = int_to_ptr.vmem [resolvable:$true] %s277_s7  ;;  %s52_s17 = int_to_ptr.vmem [resolvable:$true] %s51_s17 }
  0x7e   :  { %s6476_s8 = scalar_lea.vmem %s278_s7, 4096  ;;  %p6481_p4 = scmp.lt.s32.totalorder %s278_s7, %s278_s7 }
  0x7f   :  { %p6477_p3 = scmp.ne.s32.totalorder %s278_s7, %s6476_s8  ;;  %p6482_p5 = scmp.lt.s32.totalorder %s6476_s8, %s6476_s8 }
  0x81   :  { %p6483_p6 = por %p6482_p5, %p6481_p4 }
  0x83   :  { %p6484_p7 = pnand %p6483_p6, %p6477_p3 }
  0x85   :  { %6487 = shalt.err (!%p6484_p7)
}
  0x86   :  { %283 = dma.hbm_to_vmem [thread:$0]  %s7631_s25, 4096, %s278_s7, [#allocation32], %s6731_s30, %s6731_s30, %s6732_s3  }
  0x87   :  { %s6496_s20 = scalar_lea.vmem %s52_s17, 3072  ;;  %p6501_p9 = scmp.lt.s32.totalorder %s52_s17, %s52_s17 }
  0x88   :  { %p6497_p8 = scmp.ne.s32.totalorder %s52_s17, %s6496_s20  ;;  %p6502_p10 = scmp.lt.s32.totalorder %s6496_s20, %s6496_s20 }
  0x8a   :  { %p6503_p11 = por %p6502_p10, %p6501_p9 }
  0x8c   :  { %p6504_p12 = pnand %p6503_p11, %p6497_p8 }
  0x8e   :  { %6507 = shalt.err (!%p6504_p12)
}
  0x8f   :  { %s7656_s1 = sld [smem:[#allocation46_spill]]  ;;  %s6745_s13 = smov [#allocation6]  }
  0x90   :  { %s76_s6 = sshll.u32 %s6745_s13, 4  ;;  %s6746_s4 = smov [#allocation9]   ;;  %s77_s6 = int_to_ptr.vmem [resolvable:$true] %s76_s6 }
  0x91   :  { %s97_s25 = sshll.u32 %s6746_s4, 4  ;;  %s6516_s15 = scalar_lea.vmem %s77_s6, 16  ;;  %s98_s25 = int_to_ptr.vmem [resolvable:$true] %s97_s25 }
  0x92   :  { %p6517_p13 = scmp.ne.s32.totalorder %s77_s6, %s6516_s15  ;;  %s6520_s0 = scalar_lea.vmem %s77_s6, 32 }
  0x93   :  { %p6521_p0 = scmp.lt.s32.totalorder %s77_s6, %s77_s6  ;;  %p6522_p1 = scmp.lt.s32.totalorder %s6520_s0, %s6516_s15 }
  0x95   :  { %57 = dma.hbm_to_vmem [thread:$0]  %s7656_s1, 3072, %s52_s17, [#allocation3], %s6739_s2, %s6739_s2, %s6740_s29  }
  0x96   :  { %p6523_p2 = por %p6522_p1, %p6521_p0 }
  0x98   :  { %p6524_p3 = pnand %p6523_p2, %p6517_p13 }
  0x9a   :  { %6527 = shalt.err (!%p6524_p3)
}
  0x9b   :  { %s7657_s28 = sld [smem:[#allocation48_spill]]  ;;  %s6536_s8 = scalar_lea.vmem %s98_s25, 512 }
  0x9c   :  { %p6537_p4 = scmp.ne.s32.totalorder %s98_s25, %s6536_s8  ;;  %p6541_p5 = scmp.lt.s32.totalorder %s98_s25, %s98_s25 }
  0x9d   :  { %p6542_p6 = scmp.lt.s32.totalorder %s6536_s8, %s6536_s8 }
  0x9f   :  { %p6543_p7 = por %p6542_p6, %p6541_p5 }
  0xa1   :  { %79 = dma.hbm_to_vmem [thread:$0]  %s7657_s28, 16, %s77_s6, [#allocation5]  }
  0xa2   :  { %p6544_p8 = pnand %p6543_p7, %p6537_p4 }
  0xa4   :  { %6547 = shalt.err (!%p6544_p8)
}
  0xa5   :  { %s7658_s9 = sld [smem:[#allocation50_spill]]  ;;  %s6747_s20 = smov [#allocation12]  }
  0xa6   :  { %s119_s10 = sshll.u32 %s6747_s20, 4  ;;  %s6748_s11 = smov [#allocation15]   ;;  %s120_s10 = int_to_ptr.vmem [resolvable:$true] %s119_s10 }
  0xa7   :  { %s144_s1 = sshll.u32 %s6748_s11, 4  ;;  %s6556_s13 = scalar_lea.vmem %s120_s10, 3072  ;;  %s145_s1 = int_to_ptr.vmem [resolvable:$true] %s144_s1 }
  0xa8   :  { %p6557_p9 = scmp.ne.s32.totalorder %s120_s10, %s6556_s13  ;;  %p6561_p10 = scmp.lt.s32.totalorder %s120_s10, %s120_s10 }
  0xa9   :  { %p6562_p11 = scmp.lt.s32.totalorder %s6556_s13, %s6556_s13 }
  0xab   :  { %103 = dma.hbm_to_vmem [thread:$0]  %s7658_s9, 512, %s98_s25, [#allocation8], %s6731_s30, %s6731_s30, %s6732_s3  }
  0xac   :  { %p6563_p12 = por %p6562_p11, %p6561_p10 }
  0xae   :  { %p6564_p13 = pnand %p6563_p12, %p6557_p9 }
  0xb0   :  { %6567 = shalt.err (!%p6564_p13)
}
  0xb1   :  { %s7659_s15 = sld [smem:[#allocation52_spill]]  ;;  %s6576_s25 = scalar_lea.vmem %s145_s1, 16 }
  0xb2   :  { %p6577_p0 = scmp.ne.s32.totalorder %s145_s1, %s6576_s25  ;;  %s6580_s0 = scalar_lea.vmem %s145_s1, 32 }
  0xb3   :  { %p6581_p1 = scmp.lt.s32.totalorder %s145_s1, %s145_s1  ;;  %p6582_p2 = scmp.lt.s32.totalorder %s6580_s0, %s6576_s25 }
  0xb5   :  { %p6583_p3 = por %p6582_p2, %p6581_p1 }
  0xb7   :  { %125 = dma.hbm_to_vmem [thread:$0]  %s7659_s15, 3072, %s120_s10, [#allocation11], %s6739_s2, %s6739_s2, %s6740_s29  }
  0xb8   :  { %p6584_p4 = pnand %p6583_p3, %p6577_p0 }
  0xba   :  { %6587 = shalt.err (!%p6584_p4)
}
  0xbb   :  { %s7660_s28 = sld [smem:[#allocation54_spill]]  ;;  %s6749_s8 = smov [#allocation18]  }
  0xbc   :  { %s168_s17 = sshll.u32 %s6749_s8, 4  ;;  %s6750_s5 = smov [#allocation21]   ;;  %s169_s17 = int_to_ptr.vmem [resolvable:$true] %s168_s17 }
  0xbd   :  { %s189_s9 = sshll.u32 %s6750_s5, 4  ;;  %s6596_s20 = scalar_lea.vmem %s169_s17, 32  ;;  %s190_s9 = int_to_ptr.vmem [resolvable:$true] %s189_s9 }
  0xbe   :  { %p6597_p5 = scmp.ne.s32.totalorder %s169_s17, %s6596_s20  ;;  %p6601_p6 = scmp.lt.s32.totalorder %s169_s17, %s169_s17 }
  0xbf   :  { %p6602_p7 = scmp.lt.s32.totalorder %s6596_s20, %s6596_s20 }
  0xc1   :  { %147 = dma.hbm_to_vmem [thread:$0]  %s7660_s28, 16, %s145_s1, [#allocation14]  }
  0xc2   :  { %p6603_p8 = por %p6602_p7, %p6601_p6 }
  0xc4   :  { %p6604_p9 = pnand %p6603_p8, %p6597_p5 }
  0xc6   :  { %6607 = shalt.err (!%p6604_p9)
}
  0xc7   :  { %s7661_s10 = sld [smem:[#allocation57_spill]]  ;;  %s6616_s11 = scalar_lea.vmem %s190_s9, 1536 }
  0xc8   :  { %p6617_p10 = scmp.ne.s32.totalorder %s190_s9, %s6616_s11  ;;  %p6621_p11 = scmp.lt.s32.totalorder %s190_s9, %s190_s9 }
  0xc9   :  { %p6622_p12 = scmp.lt.s32.totalorder %s6616_s11, %s6616_s11 }
  0xcb   :  { %p6623_p13 = por %p6622_p12, %p6621_p11 }
  0xcd   :  { %171 = dma.hbm_to_vmem [thread:$0]  %s7661_s10, 32, %s169_s17, [#allocation17]  }
  0xce   :  { %p6624_p0 = pnand %p6623_p13, %p6617_p10 }
  0xd0   :  { %6627 = shalt.err (!%p6624_p0)
}
  0xd1   :  { %195 = dma.hbm_to_vmem [thread:$0]  %s7620_s14, 1536, %s190_s9, [#allocation20], %s6731_s30, %s6731_s30, %s6732_s3  }
  0xd2   :  { %s6751_s6 = smov [#allocation24]   ;;  %s6752_s15 = smov [#allocation27]  }
  0xd3   :  { %s211_s4 = sshll.u32 %s6751_s6, 4  ;;  %s235_s25 = sshll.u32 %s6752_s15, 4  ;;  %s212_s4 = int_to_ptr.vmem [resolvable:$true] %s211_s4  ;;  %s236_s25 = int_to_ptr.vmem [resolvable:$true] %s235_s25 }
  0xd4   :  { %s6636_s0 = scalar_lea.vmem %s212_s4, 2048  ;;  %p6641_p2 = scmp.lt.s32.totalorder %s212_s4, %s212_s4 }
  0xd5   :  { %p6637_p1 = scmp.ne.s32.totalorder %s212_s4, %s6636_s0  ;;  %p6642_p3 = scmp.lt.s32.totalorder %s6636_s0, %s6636_s0 }
  0xd7   :  { %p6643_p4 = por %p6642_p3, %p6641_p2 }
  0xd9   :  { %p6644_p5 = pnand %p6643_p4, %p6637_p1 }
  0xdb   :  { %6647 = shalt.err (!%p6644_p5)
}
  0xdc   :  { %217 = dma.hbm_to_vmem [thread:$0]  %s7622_s16, 2048, %s212_s4, [#allocation23], %s6731_s30, %s6731_s30, %s6732_s3  }
  0xdd   :  { %s6656_s14 = scalar_lea.vmem %s236_s25, 6144  ;;  %p6661_p7 = scmp.lt.s32.totalorder %s236_s25, %s236_s25 }
  0xde   :  { %p6657_p6 = scmp.ne.s32.totalorder %s236_s25, %s6656_s14  ;;  %p6662_p8 = scmp.lt.s32.totalorder %s6656_s14, %s6656_s14 }
  0xe0   :  { %p6663_p9 = por %p6662_p8, %p6661_p7 }
  0xe2   :  { %p6664_p10 = pnand %p6663_p9, %p6657_p6 }
  0xe4   :  { %6667 = shalt.err (!%p6664_p10)
}
  0xe5   :  { %s6753_s28 = smov 384   ;;  %s6754_s8 = smov 24  }
  0xe6   :  { %241 = dma.hbm_to_vmem [thread:$0]  %s7625_s19, 6144, %s236_s25, [#allocation26], %s6753_s28, %s6753_s28, %s6754_s8  }
  0xe7   :  { %s6755_s9 = smov [#allocation30]   ;;  %s6756_s2 = smov [#allocation33]  }
  0xe8   :  { %s261_s20 = sshll.u32 %s6755_s9, 4  ;;  %s289_s29 = sshll.u32 %s6756_s2, 4  ;;  %s262_s20 = int_to_ptr.vmem [resolvable:$true] %s261_s20  ;;  %s290_s29 = int_to_ptr.vmem [resolvable:$true] %s289_s29 }
  0xe9   :  { %s6676_s16 = scalar_lea.vmem %s262_s20, 4096  ;;  %p6681_p12 = scmp.lt.s32.totalorder %s262_s20, %s262_s20 }
  0xea   :  { %p6677_p11 = scmp.ne.s32.totalorder %s262_s20, %s6676_s16  ;;  %p6682_p13 = scmp.lt.s32.totalorder %s6676_s16, %s6676_s16 }
  0xec   :  { %p6683_p0 = por %p6682_p13, %p6681_p12 }
  0xee   :  { %p6684_p1 = pnand %p6683_p0, %p6677_p11 }
  0xf0   :  { %6687 = shalt.err (!%p6684_p1)
}
  0xf1   :  { %267 = dma.hbm_to_vmem [thread:$0]  %s7628_s22, 4096, %s262_s20, [#allocation29], %s6731_s30, %s6731_s30, %s6732_s3  }
  0xf2   :  { %s6696_s19 = scalar_lea.vmem %s290_s29, 2048  ;;  %p6701_p3 = scmp.lt.s32.totalorder %s290_s29, %s290_s29 }
  0xf3   :  { %p6697_p2 = scmp.ne.s32.totalorder %s290_s29, %s6696_s19  ;;  %p6702_p4 = scmp.lt.s32.totalorder %s6696_s19, %s6696_s19 }
  0xf5   :  { %p6703_p5 = por %p6702_p4, %p6701_p3 }
  0xf7   :  { %p6704_p6 = pnand %p6703_p5, %p6697_p2 }
  0xf9   :  { %6707 = shalt.err (!%p6704_p6)
}
  0xfa   :  { %295 = dma.hbm_to_vmem [thread:$0]  %s7632_s26, 2048, %s290_s29, [#allocation32], %s6731_s30, %s6731_s30, %s6732_s3  }
  0xfb   :  { %6708 = dma.done.wait [#allocation3], 3072  }
  0xfc   :  { %6709 = vsyncadd [#allocation3], 4294964224 }
  0xfd   :  { %6710 = dma.done.wait [#allocation5], 400  }
  0xfe   :  { %6711 = vsyncadd [#allocation5], 4294966896 }
  0xff   :  { %6712 = dma.done.wait [#allocation8], 2560  }
 0x100   :  { %6713 = vsyncadd [#allocation8], 4294964736 }
 0x101   :  { %6714 = dma.done.wait [#allocation11], 3104  }
 0x102   :  { %6715 = vsyncadd [#allocation11], 4294964192 }
 0x103   :  { %6716 = dma.done.wait [#allocation14], 784  }
 0x104   :  { %6717 = vsyncadd [#allocation14], 4294966512 }
 0x105   :  { %6718 = dma.done.wait [#allocation17], 2080  }
 0x106   :  { %6719 = vsyncadd [#allocation17], 4294965216 }
 0x107   :  { %6720 = dma.done.wait [#allocation20], 4608  }
 0x108   :  { %6721 = vsyncadd [#allocation20], 4294962688 }
 0x109   :  { %6722 = dma.done.wait [#allocation23], 2064  }
 0x10a   :  { %6723 = vsyncadd [#allocation23], 4294965232 }
 0x10b   :  { %6724 = dma.done.wait [#allocation26], 6272  }
 0x10c   :  { %6725 = vsyncadd [#allocation26], 4294961024 }
 0x10d   :  { %6726 = dma.done.wait [#allocation29], 7168  }
 0x10e   :  { %6727 = vsyncadd [#allocation29], 4294960128 }
 0x10f   :  { %6728 = dma.done.wait [#allocation32], 6144  }
 0x110   :  { %6729 = vsyncadd [#allocation32], 4294961152  ;;  %v6757_v0 = vmov 0   ;;  %v6758_v1 = vmov 0.0   ;;  %vm6759_vm0 = vmmov 0   ;;  %s7662_s30 = sld [smem:[#allocation45_spill]] }
 0x111   :  { %578 = vmatprep.mubr.bf16.mxu1 %v6757_v0  ;;  %5590 = vmatprep.subr.mxu0 %v6758_v1  ;;  %v6048_v2 = vld [vmem:[#allocation2 + $0xac] ss:$12 sps:$4 sm:$0xff]   ;;  %v6050_v3 = vld [vmem:[#allocation2 + $0xa8] ss:$12 sps:$4 sm:$0xff]   ;;  %v6053_v5 = vld [vmem:[#allocation2 + $0x90] ss:$12 sps:$4 sm:$0xff]  }
 0x112   :  { %5592 = vmatprep.mubr.msk.f32.mxu0 %vm6759_vm0, %v6758_v1  ;;  %546 = vmatprep.subr.bf16.mxu1 %v6048_v2  ;;  %v6051_v4 = vld [vmem:[#allocation2 + $0x94] ss:$12 sps:$4 sm:$0xff]   ;;  %v6054_v6 = vld [vmem:[#allocation2 + $0x7c] ss:$12 sps:$4 sm:$0xff]   ;;  %v6056_v7 = vld [vmem:[#allocation2 + $0x78] ss:$12 sps:$4 sm:$0xff]  }
 0x113   :  { %547 = vmatpush1.bf16.msra.mxu1 %v6050_v3  ;;  %v6057_v8 = vld [vmem:[#allocation2 + $0x64] ss:$12 sps:$4 sm:$0xff]   ;;  %v6059_v9 = vld [vmem:[#allocation2 + $0x60] ss:$12 sps:$4 sm:$0xff]   ;;  %v6062_v11 = vld [vmem:[#allocation2 + $0x48] ss:$12 sps:$4 sm:$0xff]  }
 0x114   :  { %548 = vmatprep.subr.bf16.mxu1 %v6051_v4  ;;  %v6060_v10 = vld [vmem:[#allocation2 + $0x4c] ss:$12 sps:$4 sm:$0xff]   ;;  %v6063_v12 = vld [vmem:[#allocation2 + $0x34] ss:$12 sps:$4 sm:$0xff]   ;;  %v6065_v13 = vld [vmem:[#allocation2 + $0x30] ss:$12 sps:$4 sm:$0xff]  }
 0x115   :  { %v6066_v14 = vld [vmem:[#allocation2 + $0x1c] ss:$12 sps:$4 sm:$0xff]   ;;  %v6068_v15 = vld [vmem:[#allocation2 + $0x18] ss:$12 sps:$4 sm:$0xff]   ;;  %v6071_v17 = vld [vmem:[#allocation2] ss:$12 sps:$4 sm:$0xff]  }
 0x116   :  { %v6069_v16 = vld [vmem:[#allocation2 + $0x4] ss:$12 sps:$4 sm:$0xff]   ;;  %v362_v18 = vld [vmem:[%s7662_s30] sm:$0x3]  ;;  %v6075_v23 = vld [vmem:[#allocation2 + $0x68] ss:$12 sps:$4 sm:$0xff]  }
 0x117   :  { %549 = vmatpush1.bf16.msra.mxu1 %v6053_v5  ;;  %v6072_v19 = vld [vmem:[#allocation2 + $0xb0] ss:$12 sps:$4 sm:$0xff]   ;;  %v417_v20 = vpack.c.bf16 %v362_v18, %v362_v18  ;;  %v6073_v21 = vld [vmem:[#allocation2 + $0x98] ss:$12 sps:$4 sm:$0xff]   ;;  %v6074_v22 = vld [vmem:[#allocation2 + $0x80] ss:$12 sps:$4 sm:$0xff]  }
 0x118   :  { %550 = vmatprep.subr.bf16.mxu1 %v6054_v6  ;;  %v6076_v24 = vld [vmem:[#allocation2 + $0x50] ss:$12 sps:$4 sm:$0xff]   ;;  %v6077_v25 = vld [vmem:[#allocation2 + $0x38] ss:$12 sps:$4 sm:$0xff]   ;;  %v6078_v26 = vld [vmem:[#allocation2 + $0x20] ss:$12 sps:$4 sm:$0xff]  }
 0x119   :  { %v6079_v27 = vld [vmem:[#allocation2 + $0x8] ss:$12 sps:$4 sm:$0xff]   ;;  %vm634_vm1 = vcmask 1041408   ;;  %v627_v28 = vld [vmem:[#allocation4] sm:$0x3f]  ;;  %vm630_vm2 = vcmask 15360  }
 0x11a   :  { %v411_v30 = vld [vmem:[#allocation7 + $0x78] sm:$0xff]  ;;  %v629_v31 = vld [vmem:[#allocation4 + $0x8] sm:$0x3f]  ;;  %v408_v37 = vld [vmem:[#allocation7 + $0x60] sm:$0xff]  ;;  %vm870_vm3 = vcmask 1045504   ;;  %vm1038_vm4 = vcmask 261120  }
 0x11b   :  { %551 = vmatpush1.bf16.msra.mxu1 %v6056_v7  ;;  %v410_v33 = vld [vmem:[#allocation7 + $0x70] sm:$0xff]  ;;  %v409_v35 = vld [vmem:[#allocation7 + $0x68] sm:$0xff]  ;;  %v407_v43 = vld [vmem:[#allocation7 + $0x58] sm:$0xff]  ;;  %vm1465_vm5 = vcmask 48128   ;;  %s7663_s4 = sld [smem:[#allocation56_spill]]  ;;  %vm1901_vm6 = vcmask 130048  }
 0x11c   :  { %552 = vmatprep.subr.bf16.mxu1 %v6057_v8  ;;  %v785_v38 = vld [vmem:[#allocation4 + $0x10] sm:$0x3f]  ;;  %v405_v45 = vld [vmem:[#allocation7 + $0x48] sm:$0xff]  ;;  %v404_v46 = vld [vmem:[#allocation7 + $0x40] sm:$0xff]  ;;  %vm2338_vm7 = vcmask 113664   ;;  %vm2834_vm8 = vcmask 64512  }
 0x11d   :  { %v406_v44 = vld [vmem:[#allocation7 + $0x50] sm:$0xff]  ;;  %v403_v47 = vld [vmem:[#allocation7 + $0x38] sm:$0xff]  ;;  %v401_v49 = vld [vmem:[#allocation7 + $0x28] sm:$0xff]  ;;  %vm3508_vm9 = vcmask 244736   ;;  %vm4734_vm10 = vcmask 506880   ;;  %s7664_s20 = sld [smem:[#allocation58_spill]] }
 0x11e   :  { %v402_v48 = vld [vmem:[#allocation7 + $0x30] sm:$0xff]  ;;  %v400_v50 = vld [vmem:[#allocation7 + $0x20] sm:$0xff]  ;;  %v399_v51 = vld [vmem:[#allocation7 + $0x18] sm:$0xff] }
 0x11f   :  { %553 = vmatpush1.bf16.msra.mxu1 %v6059_v9  ;;  %v398_v52 = vld [vmem:[#allocation7 + $0x10] sm:$0xff]  ;;  %v397_v53 = vld [vmem:[#allocation7 + $0x8] sm:$0xff]  ;;  %v396_v54 = vld [vmem:[#allocation7] sm:$0xff] }
 0x120   :  { %554 = vmatprep.subr.bf16.mxu1 %v6060_v10  ;;  %v5074_v60 = vld [vmem:[#allocation6] ss:$0 sm:$0xff] }
 0x121   :  { %v415_v18 = vld [vmem:[#allocation9 + $0x18] sm:$0xff] }
 0x123   :  { %555 = vmatpush1.bf16.msra.mxu1 %v6062_v11 }
 0x124   :  { %556 = vmatprep.subr.bf16.mxu1 %v6063_v12 }
 0x127   :  { %557 = vmatpush1.bf16.msra.mxu1 %v6065_v13 }
 0x128   :  { %558 = vmatprep.subr.bf16.mxu1 %v6066_v14 }
 0x12b   :  { %559 = vmatpush1.bf16.msra.mxu1 %v6068_v15 }
 0x12c   :  { %560 = vmatprep.subr.bf16.mxu1 %v6069_v16 }
 0x12f   :  { %561 = vmatpush1.bf16.msra.mxu1 %v6071_v17 }
 0x130   :  { %5570 = vmatprep.subr.bf16.mxu1 %v6758_v1 }
 0x132   :  { %579 = vmatmul.mubr.bf16.vlgmr.msra.gmra.mxu1 %v417_v20 }
 0x133   :  { %5571 = vmatpush3.bf16.msra.mxu1 %v6072_v19  ;;  %5586 = vmatprep.mubr.msk.bf16.mxu1 %vm6759_vm0, %v6758_v1  ;;  %v414_v19 = vld [vmem:[#allocation9 + $0x10] sm:$0xff] }
 0x134   :  { %5572 = vmatprep.subr.bf16.mxu1 %v6758_v1 }
 0x137   :  { %5573 = vmatpush3.bf16.msra.mxu1 %v6073_v21  ;;  %v412_v21 = vld [vmem:[#allocation9] sm:$0xff] }
 0x138   :  { %5574 = vmatprep.subr.bf16.mxu1 %v6758_v1 }
 0x13b   :  { %5575 = vmatpush3.bf16.msra.mxu1 %v6074_v22  ;;  %v6082_v22 = vld [vmem:[#allocation12 + $0xac] ss:$12 sps:$4 sm:$0xff]  }
 0x13c   :  { %5576 = vmatprep.subr.bf16.mxu1 %v6758_v1 }
 0x13f   :  { %5577 = vmatpush3.bf16.msra.mxu1 %v6075_v23 }
 0x140   :  { %5578 = vmatprep.subr.bf16.mxu1 %v6758_v1 }
 0x143   :  { %5579 = vmatpush3.bf16.msra.mxu1 %v6076_v24 }
 0x144   :  { %5580 = vmatprep.subr.bf16.mxu1 %v6758_v1 }
 0x147   :  { %5581 = vmatpush3.bf16.msra.mxu1 %v6077_v25 }
 0x148   :  { %5582 = vmatprep.subr.bf16.mxu1 %v6758_v1 }
 0x14b   :  { %5583 = vmatpush3.bf16.msra.mxu1 %v6078_v26 }
 0x14c   :  { %5584 = vmatprep.subr.bf16.mxu1 %v6758_v1 }
 0x14f   :  { %5585 = vmatpush3.bf16.msra.mxu1 %v6079_v27 }
 0x150   :  { %5595 = vmatprep.subr.mxu1 %v6758_v1 }
 0x152   :  { %5587 = vmatmul.mubr.bf16.vlgmr.msra.gmra.mxu1 %v417_v20  ;;  %v413_v20 = vld [vmem:[#allocation9 + $0x8] sm:$0xff] }
 0x153   :  { %5597 = vmatprep.mubr.msk.f32.mxu1 %vm6759_vm0, %v6758_v1 }
 0x1f2   :  { %v580_v29 = vpop.f32.mrf.mxu1 }
 0x1f3   :  { %5596 = vmatpush3.msk.msra.mxu1 %vm634_vm1, %v580_v29 }
 0x1f4   :  { %v582_v32 = vpop.f32.mrf.mxu1  ;;  %5598 = vmatmul.mubr.msk.f32.vlgmr.msra.gmra.mxu1 %vm630_vm2, %v627_v28  ;;  %5605 = vmatprep.subr.mxu1 %v6758_v1 }
 0x1f5   :  { %5591 = vmatpush3.msk.msra.mxu0 %vm634_vm1, %v582_v32  ;;  %5606 = vmatpush3.msra.mxu1 %v411_v30  ;;  %v416_v32 = vld [vmem:[#allocation10] sm:$0x3] }
 0x1f6   :  { %v584_v34 = vpop.f32.mrf.mxu1  ;;  %5593 = vmatmul.mubr.msk.f32.vlgmr.msra.gmra.mxu0 %vm630_vm2, %v629_v31  ;;  %5600 = vmatprep.subr.mxu0 %v6758_v1 }
 0x1f7   :  { %5602 = vmatprep.mubr.msk.f32.mxu0 %vm6759_vm0, %v6758_v1  ;;  %5607 = vmatprep.subr.mxu1 %v6758_v1  ;;  %v6080_v34 = vld [vmem:[#allocation12 + $0xa8] ss:$12 sps:$4 sm:$0xff]  }
 0x1f8   :  { %v585_v36 = vpop.f32.mrf.mxu1  ;;  %5608 = vmatpush3.msra.mxu1 %v410_v33  ;;  %5637 = vmatprep.mubr.msk.f32.mxu1 %vm6759_vm0, %v6758_v1 }
 0x1f9   :  { %5609 = vmatprep.subr.mxu1 %v6758_v1  ;;  %v6086_v36 = vld [vmem:[#allocation12 + $0x94] ss:$12 sps:$4 sm:$0xff]  }
 0x1fa   :  { %5610 = vmatpush3.msra.mxu1 %v409_v35 }
 0x1fb   :  { %5611 = vmatprep.subr.mxu1 %v6758_v1 }
 0x1fc   :  { %5612 = vmatpush3.msra.mxu1 %v408_v37 }
 0x1fd   :  { %5613 = vmatprep.subr.mxu1 %v6758_v1 }
 0x1fe   :  { %5614 = vmatpush3.msra.mxu1 %v407_v43 }
 0x1ff   :  { %5615 = vmatprep.subr.mxu1 %v6758_v1 }
 0x200   :  { %5616 = vmatpush3.msra.mxu1 %v406_v44 }
 0x201   :  { %5617 = vmatprep.subr.mxu1 %v6758_v1 }
 0x202   :  { %5618 = vmatpush3.msra.mxu1 %v405_v45 }
 0x203   :  { %5619 = vmatprep.subr.mxu1 %v6758_v1 }
 0x204   :  { %5620 = vmatpush3.msra.mxu1 %v404_v46 }
 0x205   :  { %5621 = vmatprep.subr.mxu1 %v6758_v1 }
 0x206   :  { %5622 = vmatpush3.msra.mxu1 %v403_v47 }
 0x207   :  { %5623 = vmatprep.subr.mxu1 %v6758_v1 }
 0x208   :  { %5624 = vmatpush3.msra.mxu1 %v402_v48 }
 0x209   :  { %5625 = vmatprep.subr.mxu1 %v6758_v1 }
 0x20a   :  { %5626 = vmatpush3.msra.mxu1 %v401_v49 }
 0x20b   :  { %5627 = vmatprep.subr.mxu1 %v6758_v1 }
 0x20c   :  { %5628 = vmatpush3.msra.mxu1 %v400_v50 }
 0x20d   :  { %5629 = vmatprep.subr.mxu1 %v6758_v1 }
 0x20e   :  { %5630 = vmatpush3.msra.mxu1 %v399_v51 }
 0x20f   :  { %5631 = vmatprep.subr.mxu1 %v6758_v1 }
 0x210   :  { %5632 = vmatpush3.msra.mxu1 %v398_v52 }
 0x211   :  { %5633 = vmatprep.subr.mxu1 %v6758_v1 }
 0x212   :  { %v621_v39 = vpop.f32.mrf.mxu1  ;;  %5634 = vmatpush3.msra.mxu1 %v397_v53 }
 0x213   :  { %5601 = vmatpush3.msk.msra.mxu0 %vm634_vm1, %v621_v39  ;;  %5635 = vmatprep.subr.mxu1 %v6758_v1 }
 0x214   :  { %v5588_v40 = vpop.f32.mrf.mxu1  ;;  %5603 = vmatmul.mubr.msk.f32.vlgmr.msra.gmra.mxu0 %vm630_vm2, %v785_v38  ;;  %5640 = vmatprep.subr.mxu0 %v6758_v1  ;;  %v6084_v38 = vld [vmem:[#allocation12 + $0x90] ss:$12 sps:$4 sm:$0xff]  }
 0x215   :  { %5641 = vmatpush3.msra.mxu0 %v411_v30  ;;  %5672 = vmatprep.mubr.msk.f32.mxu0 %vm6759_vm0, %v6758_v1  ;;  %v6090_v40 = vld [vmem:[#allocation12 + $0x7c] ss:$12 sps:$4 sm:$0xff]  }
 0x216   :  { %v624_v41 = vpop.f32.mrf.mxu1  ;;  %5642 = vmatprep.subr.mxu0 %v6758_v1  ;;  %5636 = vmatpush3.msra.mxu1 %v396_v54 }
 0x217   :  { %5643 = vmatpush3.msra.mxu0 %v410_v33  ;;  %5675 = vmatprep.subr.mxu1 %v6758_v1 }
 0x218   :  { %v5589_v42 = vpop.f32.mrf.mxu1  ;;  %5644 = vmatprep.subr.mxu0 %v6758_v1 }
 0x219   :  { %5645 = vmatpush3.msra.mxu0 %v409_v35  ;;  %v6083_v42 = vld [vmem:[#allocation12 + $0xb0] ss:$12 sps:$4 sm:$0xff]  }
 0x21a   :  { %5646 = vmatprep.subr.mxu0 %v6758_v1 }
 0x21b   :  { %5647 = vmatpush3.msra.mxu0 %v408_v37 }
 0x21c   :  { %5648 = vmatprep.subr.mxu0 %v6758_v1 }
 0x21d   :  { %5649 = vmatpush3.msra.mxu0 %v407_v43  ;;  %v6088_v43 = vld [vmem:[#allocation12 + $0x78] ss:$12 sps:$4 sm:$0xff]  }
 0x21e   :  { %5650 = vmatprep.subr.mxu0 %v6758_v1 }
 0x21f   :  { %5651 = vmatpush3.msra.mxu0 %v406_v44 }
 0x220   :  { %5652 = vmatprep.subr.mxu0 %v6758_v1 }
 0x221   :  { %5653 = vmatpush3.msra.mxu0 %v405_v45  ;;  %v6094_v45 = vld [vmem:[#allocation12 + $0x64] ss:$12 sps:$4 sm:$0xff]  }
 0x222   :  { %5654 = vmatprep.subr.mxu0 %v6758_v1 }
 0x223   :  { %5655 = vmatpush3.msra.mxu0 %v404_v46  ;;  %v6087_v46 = vld [vmem:[#allocation12 + $0x98] ss:$12 sps:$4 sm:$0xff]  }
 0x224   :  { %5656 = vmatprep.subr.mxu0 %v6758_v1 }
 0x225   :  { %5657 = vmatpush3.msra.mxu0 %v403_v47  ;;  %v6092_v47 = vld [vmem:[#allocation12 + $0x60] ss:$12 sps:$4 sm:$0xff]  }
 0x226   :  { %5658 = vmatprep.subr.mxu0 %v6758_v1 }
 0x227   :  { %5659 = vmatpush3.msra.mxu0 %v402_v48  ;;  %v6091_v48 = vld [vmem:[#allocation12 + $0x80] ss:$12 sps:$4 sm:$0xff]  }
 0x228   :  { %5660 = vmatprep.subr.mxu0 %v6758_v1 }
 0x229   :  { %5661 = vmatpush3.msra.mxu0 %v401_v49  ;;  %v6095_v49 = vld [vmem:[#allocation12 + $0x68] ss:$12 sps:$4 sm:$0xff]  }
 0x22a   :  { %5662 = vmatprep.subr.mxu0 %v6758_v1 }
 0x22b   :  { %5663 = vmatpush3.msra.mxu0 %v400_v50  ;;  %v6098_v50 = vld [vmem:[#allocation12 + $0x4c] ss:$12 sps:$4 sm:$0xff]  }
 0x22c   :  { %5664 = vmatprep.subr.mxu0 %v6758_v1 }
 0x22d   :  { %5665 = vmatpush3.msra.mxu0 %v399_v51  ;;  %v6096_v51 = vld [vmem:[#allocation12 + $0x48] ss:$12 sps:$4 sm:$0xff]  }
 0x22e   :  { %5666 = vmatprep.subr.mxu0 %v6758_v1 }
 0x22f   :  { %5667 = vmatpush3.msra.mxu0 %v398_v52  ;;  %v6099_v52 = vld [vmem:[#allocation12 + $0x50] ss:$12 sps:$4 sm:$0xff]  }
 0x230   :  { %5668 = vmatprep.subr.mxu0 %v6758_v1 }
 0x231   :  { %5669 = vmatpush3.msra.mxu0 %v397_v53  ;;  %v6102_v53 = vld [vmem:[#allocation12 + $0x34] ss:$12 sps:$4 sm:$0xff]  }
 0x232   :  { %5670 = vmatprep.subr.mxu0 %v6758_v1 }
 0x233   :  { %5671 = vmatpush3.msra.mxu0 %v396_v54  ;;  %v6100_v54 = vld [vmem:[#allocation12 + $0x30] ss:$12 sps:$4 sm:$0xff]  }
 0x234   :  { %5686 = vmatprep.subr.mxu0 %v6758_v1 }
 0x2b4   :  { %v780_v55 = vpop.f32.mrf.mxu1 }
 0x2b6   :  { %v704_v56 = vpop.f32.mrf.mxu0  ;;  %v5599_v57 = vpop.f32.mrf.mxu1 }
 0x2b7   :  { %v781_v59 = vadd.f32 %v780_v55, %v704_v56  ;;  %v6103_v55 = vld [vmem:[#allocation12 + $0x38] ss:$12 sps:$4 sm:$0xff]   ;;  %v6106_v56 = vld [vmem:[#allocation12 + $0x1c] ss:$12 sps:$4 sm:$0xff]  }
 0x2b8   :  { %v5594_v58 = vpop.f32.mrf.mxu0  ;;  %v6104_v57 = vld [vmem:[#allocation12 + $0x18] ss:$12 sps:$4 sm:$0xff]  }
 0x2b9   :  { %v6107_v58 = vld [vmem:[#allocation12 + $0x20] ss:$12 sps:$4 sm:$0xff]  }
 0x2d4   :  { %v858_v61 = vpop.f32.mrf.mxu0 }
 0x2d5   :  { %v862_v62 = vadd.f32 %v858_v61, %v781_v59  ;;  %v6110_v59 = vld [vmem:[#allocation12 + $0x4] ss:$12 sps:$4 sm:$0xff]   ;;  %v6111_v61 = vld [vmem:[#allocation12 + $0x8] ss:$12 sps:$4 sm:$0xff]  }
 0x2d6   :  { %v5604_v63 = vpop.f32.mrf.mxu0 }
 0x2d7   :  { %v7077_v2 = vadd.f32 %v5074_v60, %v862_v62  ;;  %v6108_v60 = vld [vmem:[#allocation12] ss:$12 sps:$4 sm:$0xff]   ;;  %v1186_v62 = vlaneseq }
 0x2d9   :  { %v871_v3 = vsel %vm870_vm3, %v7077_v2, 0.0  ;;  %v878_v4 = vmul.f32 %v7077_v2, %v7077_v2  ;;  %v7107_v63 = vshrl.u32 %v1186_v62, 7 }
 0x2da   :  { %v872_v5 = vrot.slane %v871_v3, 4 }
 0x2db   :  { %v879_v6 = vsel %vm870_vm3, %v878_v4, 0.0  ;;  %v7110_v4 = vsub.s32 0, %v7107_v63 }
 0x2dc   :  { %v873_v7 = vadd.f32 %v872_v5, %v871_v3  ;;  %v880_v8 = vrot.slane %v879_v6, 4 }
 0x2de   :  { %v874_v9 = vrot.slane %v873_v7, 2  ;;  %v881_v10 = vadd.f32 %v880_v8, %v879_v6 }
 0x2e0   :  { %v875_v11 = vadd.f32 %v874_v9, %v873_v7  ;;  %v882_v12 = vrot.slane %v881_v10, 2 }
 0x2e2   :  { %v876_v13 = vrot.slane %v875_v11, 1  ;;  %v883_v14 = vadd.f32 %v882_v12, %v881_v10 }
 0x2e4   :  { %v877_v15 = vadd.f32 %v876_v13, %v875_v11  ;;  %v884_v16 = vrot.slane %v883_v14, 1 }
 0x2e6   :  { %5638 = vmatmul.mubr.f32.vlgmr.msra.gmra.mxu1 %v877_v15  ;;  %v885_v17 = vadd.f32 %v884_v16, %v883_v14  ;;  %v1463_v15 = vld [vmem:[#allocation13 + $0x10] sm:$0xff]  ;;  %v1460_v16 = vld [vmem:[#allocation13] sm:$0xff] }
 0x2e7   :  { %5683 = vmatprep.mubr.msk.f32.mxu1 %vm6759_vm0, %v6758_v1  ;;  %5676 = vmatpush3.msra.mxu1 %v415_v18 }
 0x2e8   :  { %5673 = vmatmul.mubr.f32.vlgmr.msra.gmra.mxu0 %v885_v17  ;;  %5677 = vmatprep.subr.mxu1 %v6758_v1 }
 0x2e9   :  { %5694 = vmatprep.mubr.msk.f32.mxu0 %vm6759_vm0, %v6758_v1  ;;  %5687 = vmatpush3.msra.mxu0 %v415_v18 }
 0x2ea   :  { %5688 = vmatprep.subr.mxu0 %v6758_v1  ;;  %5678 = vmatpush3.msra.mxu1 %v414_v19 }
 0x2eb   :  { %5689 = vmatpush3.msra.mxu0 %v414_v19  ;;  %5679 = vmatprep.subr.mxu1 %v6758_v1  ;;  %v1461_v19 = vld [vmem:[#allocation13 + $0x8] sm:$0x3f] }
 0x2ec   :  { %5690 = vmatprep.subr.mxu0 %v6758_v1  ;;  %5680 = vmatpush3.msra.mxu1 %v413_v20 }
 0x2ed   :  { %5691 = vmatpush3.msra.mxu0 %v413_v20  ;;  %5681 = vmatprep.subr.mxu1 %v6758_v1 }
 0x2ee   :  { %5692 = vmatprep.subr.mxu0 %v6758_v1  ;;  %5682 = vmatpush3.msra.mxu1 %v412_v21 }
 0x2ef   :  { %5693 = vmatpush3.msra.mxu0 %v412_v21  ;;  %1379 = vmatprep.subr.bf16.mxu1 %v6082_v22  ;;  %v1464_v21 = vld [vmem:[#allocation13 + $0x18] sm:$0x3f]  ;;  %v1635_v22 = vld [vmem:[#allocation13 + $0x20] sm:$0xff] }
 0x2f0   :  { %5697 = vmatprep.subr.bf16.mxu0 %v6758_v1 }
 0x3a6   :  { %v952_v23 = vpop.f32.mrf.mxu1 }
 0x3a7   :  { %v956_v24 = vmul.f32 0.055555556, %v952_v23 }
 0x3a8   :  { %v5639_v25 = vpop.f32.mrf.mxu1  ;;  %v1023_v26 = vpop.f32.mrf.mxu0 }
 0x3a9   :  { %v1028_v27 = vmul.f32 %v956_v24, %v956_v24  ;;  %v1027_v28 = vmul.f32 0.055555556, %v1023_v26  ;;  %v1246_v25 = vld [vmem:[#allocation16 + $0x78] sm:$0xff] }
 0x3aa   :  { %v5674_v29 = vpop.f32.mrf.mxu0 }
 0x3ab   :  { %v1029_v30 = vsub.f32 %v1027_v28, %v1028_v27  ;;  %v1636_v28 = vld [vmem:[#allocation13 + $0x28] sm:$0x3f] }
 0x3ac   :  { %v1245_v29 = vld [vmem:[#allocation16 + $0x70] sm:$0xff] }
 0x3ad   :  { %v1030_v31 = vadd.f32 1e-05, %v1029_v30  ;;  %v1244_v30 = vld [vmem:[#allocation16 + $0x68] sm:$0xff] }
 0x3af   :  { %6264 = vrsqrt.f32 %v1030_v31  ;;  %v1243_v31 = vld [vmem:[#allocation16 + $0x60] sm:$0xff] }
 0x3bc   :  { %v6265_v33 = vpop.eup %6264 }
 0x3bd   :  { %v1032_v35 = vmul.f32 %v6265_v33, %v416_v32  ;;  %v1241_v33 = vld [vmem:[#allocation16 + $0x50] sm:$0xff] }
 0x3bf   :  { %v1033_v37 = vmul.f32 %v1032_v35, %v956_v24  ;;  %5684 = vmatmul.mubr.msk.f32.vlgmr.msra.gmra.mxu1 %vm1038_vm4, %v1032_v35  ;;  %v1239_v35 = vld [vmem:[#allocation16 + $0x40] sm:$0xff] }
 0x3c0   :  { %1380 = vmatpush1.bf16.msra.mxu1 %v6080_v34  ;;  %1411 = vmatprep.mubr.bf16.mxu1 %v6757_v0  ;;  %v1240_v34 = vld [vmem:[#allocation16 + $0x48] sm:$0xff] }
 0x3c1   :  { %v1035_v39 = vrot.slane %v1033_v37, 7  ;;  %1381 = vmatprep.subr.bf16.mxu1 %v6086_v36  ;;  %v1238_v36 = vld [vmem:[#allocation16 + $0x38] sm:$0xff]  ;;  %v1237_v37 = vld [vmem:[#allocation16 + $0x30] sm:$0xff] }
 0x3c3   :  { %v1037_v41 = vsub.f32 %v416_v32, %v1035_v39  ;;  %v1242_v32 = vld [vmem:[#allocation16 + $0x58] sm:$0xff]  ;;  %v1235_v39 = vld [vmem:[#allocation16 + $0x20] sm:$0xff] }
 0x3c4   :  { %1382 = vmatpush1.bf16.msra.mxu1 %v6084_v38  ;;  %v1236_v38 = vld [vmem:[#allocation16 + $0x28] sm:$0xff] }
 0x3c5   :  { %v1113_v44 = vrot.slane %v1037_v41, 1  ;;  %1383 = vmatprep.subr.bf16.mxu1 %v6090_v40  ;;  %v1234_v40 = vld [vmem:[#allocation16 + $0x18] sm:$0xff]  ;;  %v1233_v41 = vld [vmem:[#allocation16 + $0x10] sm:$0xff] }
 0x3c7   :  { %5695 = vmatmul.mubr.msk.f32.vlgmr.msra.gmra.mxu0 %vm1038_vm4, %v1113_v44 }
 0x3c8   :  { %5698 = vmatpush3.bf16.msra.mxu0 %v6083_v42  ;;  %1384 = vmatpush1.bf16.msra.mxu1 %v6088_v43  ;;  %v1232_v42 = vld [vmem:[#allocation16 + $0x8] sm:$0xff]  ;;  %v1231_v43 = vld [vmem:[#allocation16] sm:$0xff] }
 0x3c9   :  { %5699 = vmatprep.subr.bf16.mxu0 %v6758_v1  ;;  %1385 = vmatprep.subr.bf16.mxu1 %v6094_v45 }
 0x3ca   :  { %5713 = vmatprep.mubr.msk.bf16.mxu0 %vm6759_vm0, %v6758_v1 }
 0x3cc   :  { %5700 = vmatpush3.bf16.msra.mxu0 %v6087_v46  ;;  %1386 = vmatpush1.bf16.msra.mxu1 %v6092_v47 }
 0x3cd   :  { %5701 = vmatprep.subr.bf16.mxu0 %v6758_v1  ;;  %1387 = vmatprep.subr.bf16.mxu1 %v6098_v50 }
 0x3d0   :  { %5702 = vmatpush3.bf16.msra.mxu0 %v6091_v48  ;;  %1388 = vmatpush1.bf16.msra.mxu1 %v6096_v51 }
 0x3d1   :  { %5703 = vmatprep.subr.bf16.mxu0 %v6758_v1  ;;  %1389 = vmatprep.subr.bf16.mxu1 %v6102_v53 }
 0x3d4   :  { %5704 = vmatpush3.bf16.msra.mxu0 %v6095_v49  ;;  %1390 = vmatpush1.bf16.msra.mxu1 %v6100_v54  ;;  %v5110_v49 = vld [vmem:[#allocation15] ss:$0 sm:$0xff] }
 0x3d5   :  { %5705 = vmatprep.subr.bf16.mxu0 %v6758_v1  ;;  %1391 = vmatprep.subr.bf16.mxu1 %v6106_v56 }
 0x3d8   :  { %5706 = vmatpush3.bf16.msra.mxu0 %v6099_v52  ;;  %1392 = vmatpush1.bf16.msra.mxu1 %v6104_v57 }
 0x3d9   :  { %5707 = vmatprep.subr.bf16.mxu0 %v6758_v1  ;;  %1393 = vmatprep.subr.bf16.mxu1 %v6110_v59 }
 0x3dc   :  { %5708 = vmatpush3.bf16.msra.mxu0 %v6103_v55  ;;  %1394 = vmatpush1.bf16.msra.mxu1 %v6108_v60 }
 0x3dd   :  { %5709 = vmatprep.subr.bf16.mxu0 %v6758_v1 }
 0x3e0   :  { %5710 = vmatpush3.bf16.msra.mxu0 %v6107_v58 }
 0x3e1   :  { %5711 = vmatprep.subr.bf16.mxu0 %v6758_v1 }
 0x3e4   :  { %5712 = vmatpush3.bf16.msra.mxu0 %v6111_v61 }
 0x47f   :  { %v1108_v3 = vpop.f32.mrf.mxu1 }
 0x480   :  { %v1189_v6 = vrot.slane %v1108_v3, %v7110_v4 }
 0x481   :  { %v5685_v5 = vpop.f32.mrf.mxu1 }
 0x482   :  { %v1190_v8 = vmul.f32 %v1189_v6, %v7077_v2 }
 0x487   :  { %v1182_v7 = vpop.f32.mrf.mxu0 }
 0x488   :  { %v1194_v9 = vrot.slane %v1182_v7, %v7110_v4 }
 0x489   :  { %v5696_v10 = vpop.f32.mrf.mxu0 }
 0x48a   :  { %v1195_v11 = vadd.f32 %v1194_v9, %v1190_v8 }
 0x48c   :  { %v1196_v12 = vmul.f32 0.02, %v1195_v11 }
 0x48e   :  { %v1197_v13 = vmax.f32 %v1195_v11, %v1196_v12 }
 0x490   :  { %v1250_v14 = vpack.c.bf16 %v1197_v13, %v1197_v13 }
 0x492   :  { %1412 = vmatmul.mubr.bf16.vlgmr.msra.gmra.mxu1 %v1250_v14  ;;  %5714 = vmatmul.mubr.bf16.vlgmr.msra.gmra.mxu0 %v1250_v14 }
 0x493   :  { %5719 = vmatprep.mubr.msk.f32.mxu1 %vm1465_vm5, %v1463_v15  ;;  %5724 = vmatprep.mubr.msk.f32.mxu0 %vm1465_vm5, %v1460_v16  ;;  %v1248_v16 = vld [vmem:[%s7663_s4 + $0x8] sm:$0xff] }
 0x552   :  { %v1413_v17 = vpop.f32.mrf.mxu1  ;;  %v1454_v18 = vpop.f32.mrf.mxu0 }
 0x553   :  { %5722 = vmatprep.subr.msk.mxu0 %vm870_vm3, %v1413_v17 }
 0x554   :  { %v1415_v2 = vpop.f32.mrf.mxu1  ;;  %v5715_v20 = vpop.f32.mrf.mxu0  ;;  %5723 = vmatpush3.msk.msra.mxu0 %vm870_vm3, %v1413_v17  ;;  %v1247_v17 = vld [vmem:[%s7663_s4] sm:$0xff] }
 0x555   :  { %5717 = vmatprep.subr.msk.mxu1 %vm870_vm3, %v1415_v2  ;;  %5725 = vmatmul.mubr.msk.f32.vlgmr.msra.gmra.mxu0 %vm1465_vm5, %v1461_v19 }
 0x556   :  { %v1417_v23 = vpop.f32.mrf.mxu1  ;;  %v1457_v24 = vpop.f32.mrf.mxu0  ;;  %5718 = vmatpush3.msk.msra.mxu1 %vm870_vm3, %v1415_v2  ;;  %5732 = vmatprep.subr.mxu0 %v6758_v1 }
 0x557   :  { %5720 = vmatmul.mubr.msk.f32.vlgmr.msra.gmra.mxu1 %vm1465_vm5, %v1464_v21  ;;  %5727 = vmatprep.subr.msk.mxu1 %vm870_vm3, %v1454_v18 }
 0x558   :  { %v1418_v26 = vpop.f32.mrf.mxu1  ;;  %v5716_v27 = vpop.f32.mrf.mxu0  ;;  %5728 = vmatpush3.msk.msra.mxu1 %vm870_vm3, %v1454_v18  ;;  %5729 = vmatprep.mubr.msk.f32.mxu1 %vm1465_vm5, %v1635_v22  ;;  %v6114_v18 = vld [vmem:[#allocation19 + $0xac] ss:$12 sps:$4 sm:$0xff]  }
 0x559   :  { %5733 = vmatpush3.msra.mxu0 %v1246_v25  ;;  %5767 = vmatprep.subr.mxu1 %v6758_v1  ;;  %v1249_v27 = vld [vmem:[#allocation18] sm:$0x3] }
 0x55a   :  { %5734 = vmatprep.subr.mxu0 %v6758_v1  ;;  %5764 = vmatprep.mubr.msk.f32.mxu0 %vm6759_vm0, %v6758_v1 }
 0x55b   :  { %5730 = vmatmul.mubr.msk.f32.vlgmr.msra.gmra.mxu1 %vm1465_vm5, %v1636_v28  ;;  %5735 = vmatpush3.msra.mxu0 %v1245_v29 }
 0x55c   :  { %5768 = vmatpush3.msra.mxu1 %v1246_v25  ;;  %5736 = vmatprep.subr.mxu0 %v6758_v1 }
 0x55d   :  { %5769 = vmatprep.subr.mxu1 %v6758_v1  ;;  %5737 = vmatpush3.msra.mxu0 %v1244_v30 }
 0x55e   :  { %5770 = vmatpush3.msra.mxu1 %v1245_v29  ;;  %5738 = vmatprep.subr.mxu0 %v6758_v1  ;;  %v6112_v29 = vld [vmem:[#allocation19 + $0xa8] ss:$12 sps:$4 sm:$0xff]  }
 0x55f   :  { %5771 = vmatprep.subr.mxu1 %v6758_v1  ;;  %5799 = vmatprep.mubr.msk.f32.mxu1 %vm6759_vm0, %v6758_v1 }
 0x560   :  { %5772 = vmatpush3.msra.mxu1 %v1244_v30  ;;  %5739 = vmatpush3.msra.mxu0 %v1243_v31 }
 0x561   :  { %5773 = vmatprep.subr.mxu1 %v6758_v1  ;;  %5740 = vmatprep.subr.mxu0 %v6758_v1 }
 0x562   :  { %5774 = vmatpush3.msra.mxu1 %v1243_v31  ;;  %5741 = vmatpush3.msra.mxu0 %v1242_v32  ;;  %v6118_v31 = vld [vmem:[#allocation19 + $0x94] ss:$12 sps:$4 sm:$0xff]  }
 0x563   :  { %5775 = vmatprep.subr.mxu1 %v6758_v1  ;;  %5742 = vmatprep.subr.mxu0 %v6758_v1 }
 0x564   :  { %5776 = vmatpush3.msra.mxu1 %v1242_v32  ;;  %5743 = vmatpush3.msra.mxu0 %v1241_v33 }
 0x565   :  { %5777 = vmatprep.subr.mxu1 %v6758_v1  ;;  %5744 = vmatprep.subr.mxu0 %v6758_v1 }
 0x566   :  { %5778 = vmatpush3.msra.mxu1 %v1241_v33  ;;  %5745 = vmatpush3.msra.mxu0 %v1240_v34  ;;  %v6116_v33 = vld [vmem:[#allocation19 + $0x90] ss:$12 sps:$4 sm:$0xff]  }
 0x567   :  { %5779 = vmatprep.subr.mxu1 %v6758_v1  ;;  %5746 = vmatprep.subr.mxu0 %v6758_v1 }
 0x568   :  { %5780 = vmatpush3.msra.mxu1 %v1240_v34  ;;  %5747 = vmatpush3.msra.mxu0 %v1239_v35 }
 0x569   :  { %5781 = vmatprep.subr.mxu1 %v6758_v1  ;;  %5748 = vmatprep.subr.mxu0 %v6758_v1 }
 0x56a   :  { %5782 = vmatpush3.msra.mxu1 %v1239_v35  ;;  %5749 = vmatpush3.msra.mxu0 %v1238_v36  ;;  %v6122_v35 = vld [vmem:[#allocation19 + $0x7c] ss:$12 sps:$4 sm:$0xff]  }
 0x56b   :  { %5783 = vmatprep.subr.mxu1 %v6758_v1  ;;  %5750 = vmatprep.subr.mxu0 %v6758_v1 }
 0x56c   :  { %5784 = vmatpush3.msra.mxu1 %v1238_v36  ;;  %5751 = vmatpush3.msra.mxu0 %v1237_v37 }
 0x56d   :  { %5785 = vmatprep.subr.mxu1 %v6758_v1  ;;  %5752 = vmatprep.subr.mxu0 %v6758_v1 }
 0x56e   :  { %5786 = vmatpush3.msra.mxu1 %v1237_v37  ;;  %5753 = vmatpush3.msra.mxu0 %v1236_v38  ;;  %v6115_v37 = vld [vmem:[#allocation19 + $0xb0] ss:$12 sps:$4 sm:$0xff]  }
 0x56f   :  { %5787 = vmatprep.subr.mxu1 %v6758_v1  ;;  %5754 = vmatprep.subr.mxu0 %v6758_v1 }
 0x570   :  { %5788 = vmatpush3.msra.mxu1 %v1236_v38  ;;  %5755 = vmatpush3.msra.mxu0 %v1235_v39  ;;  %v6120_v38 = vld [vmem:[#allocation19 + $0x78] ss:$12 sps:$4 sm:$0xff]  }
 0x571   :  { %5789 = vmatprep.subr.mxu1 %v6758_v1  ;;  %5756 = vmatprep.subr.mxu0 %v6758_v1 }
 0x572   :  { %5790 = vmatpush3.msra.mxu1 %v1235_v39  ;;  %5757 = vmatpush3.msra.mxu0 %v1234_v40 }
 0x573   :  { %5791 = vmatprep.subr.mxu1 %v6758_v1  ;;  %5758 = vmatprep.subr.mxu0 %v6758_v1 }
 0x574   :  { %5792 = vmatpush3.msra.mxu1 %v1234_v40  ;;  %5759 = vmatpush3.msra.mxu0 %v1233_v41  ;;  %v6126_v40 = vld [vmem:[#allocation19 + $0x64] ss:$12 sps:$4 sm:$0xff]  }
 0x575   :  { %5793 = vmatprep.subr.mxu1 %v6758_v1  ;;  %5760 = vmatprep.subr.mxu0 %v6758_v1 }
 0x576   :  { %5794 = vmatpush3.msra.mxu1 %v1233_v41  ;;  %5761 = vmatpush3.msra.mxu0 %v1232_v42  ;;  %v6119_v41 = vld [vmem:[#allocation19 + $0x98] ss:$12 sps:$4 sm:$0xff]  }
 0x577   :  { %5795 = vmatprep.subr.mxu1 %v6758_v1  ;;  %5762 = vmatprep.subr.mxu0 %v6758_v1 }
 0x578   :  { %5796 = vmatpush3.msra.mxu1 %v1232_v42  ;;  %5763 = vmatpush3.msra.mxu0 %v1231_v43  ;;  %v6124_v42 = vld [vmem:[#allocation19 + $0x60] ss:$12 sps:$4 sm:$0xff]  }
 0x579   :  { %5797 = vmatprep.subr.mxu1 %v6758_v1  ;;  %5802 = vmatprep.subr.mxu0 %v6758_v1 }
 0x57a   :  { %5798 = vmatpush3.msra.mxu1 %v1231_v43  ;;  %v6123_v43 = vld [vmem:[#allocation19 + $0x80] ss:$12 sps:$4 sm:$0xff]  }
 0x57b   :  { %5809 = vmatprep.subr.mxu1 %v6758_v1 }
 0x615   :  { %v5726_v44 = vpop.f32.mrf.mxu0 }
 0x617   :  { %v5721_v45 = vpop.f32.mrf.mxu1  ;;  %v1625_v47 = vpop.f32.mrf.mxu0 }
 0x618   :  { %v1631_v48 = vadd.f32 %v5726_v44, %v5721_v45  ;;  %v6127_v44 = vld [vmem:[#allocation19 + $0x68] ss:$12 sps:$4 sm:$0xff]   ;;  %v6130_v45 = vld [vmem:[#allocation19 + $0x4c] ss:$12 sps:$4 sm:$0xff]  }
 0x619   :  { %v1541_v46 = vpop.f32.mrf.mxu1 }
 0x61a   :  { %v1626_v51 = vadd.f32 %v1625_v47, %v1541_v46  ;;  %v6128_v46 = vld [vmem:[#allocation19 + $0x48] ss:$12 sps:$4 sm:$0xff]   ;;  %v6131_v47 = vld [vmem:[#allocation19 + $0x50] ss:$12 sps:$4 sm:$0xff]  }
 0x61b   :  { %v5731_v50 = vpop.f32.mrf.mxu1 }
 0x61c   :  { %v1722_v52 = vadd.f32 %v5731_v50, %v1631_v48  ;;  %v6134_v48 = vld [vmem:[#allocation19 + $0x34] ss:$12 sps:$4 sm:$0xff]   ;;  %v6135_v50 = vld [vmem:[#allocation19 + $0x38] ss:$12 sps:$4 sm:$0xff]  }
 0x61d   :  { %v1712_v53 = vpop.f32.mrf.mxu1 }
 0x61e   :  { %v7165_v54 = vadd.f32 %v5110_v49, %v1722_v52  ;;  %v1721_v55 = vadd.f32 %v1712_v53, %v1626_v51  ;;  %v6138_v51 = vld [vmem:[#allocation19 + $0x1c] ss:$12 sps:$4 sm:$0xff]   ;;  %v6136_v52 = vld [vmem:[#allocation19 + $0x18] ss:$12 sps:$4 sm:$0xff]   ;;  %v6139_v53 = vld [vmem:[#allocation19 + $0x20] ss:$12 sps:$4 sm:$0xff]  }
 0x620   :  { %v1731_v56 = vsel %vm870_vm3, %v7165_v54, 0.0  ;;  %v1740_v57 = vmul.f32 %v7165_v54, %v7165_v54  ;;  %v7171_v58 = vadd.f32 %v5110_v49, %v1721_v55  ;;  %v6132_v49 = vld [vmem:[#allocation19 + $0x30] ss:$12 sps:$4 sm:$0xff]  }
 0x621   :  { %v6142_v55 = vld [vmem:[#allocation19 + $0x4] ss:$12 sps:$4 sm:$0xff]  }
 0x622   :  { %v1741_v59 = vsel %vm870_vm3, %v1740_v57, 0.0  ;;  %v1732_v60 = vadd.f32 %v1731_v56, %v7171_v58  ;;  %v1739_v61 = vmul.f32 %v7171_v58, %v7171_v58  ;;  %v6140_v56 = vld [vmem:[#allocation19] ss:$12 sps:$4 sm:$0xff]   ;;  %v6143_v57 = vld [vmem:[#allocation19 + $0x8] ss:$12 sps:$4 sm:$0xff]  }
 0x624   :  { %v1733_v62 = vrot.slane %v1732_v60, 4  ;;  %v1742_v3 = vadd.f32 %v1741_v59, %v1739_v61 }
 0x626   :  { %v1734_v5 = vadd.f32 %v1733_v62, %v1732_v60  ;;  %v1743_v6 = vrot.slane %v1742_v3, 4 }
 0x628   :  { %v1735_v7 = vrot.slane %v1734_v5, 2  ;;  %v1744_v8 = vadd.f32 %v1743_v6, %v1742_v3 }
 0x62a   :  { %v1736_v9 = vadd.f32 %v1735_v7, %v1734_v5  ;;  %v1745_v10 = vrot.slane %v1744_v8, 2 }
 0x62c   :  { %v1737_v11 = vrot.slane %v1736_v9, 1  ;;  %v1746_v12 = vadd.f32 %v1745_v10, %v1744_v8 }
 0x62e   :  { %v1738_v13 = vadd.f32 %v1737_v11, %v1736_v9  ;;  %v1747_v14 = vrot.slane %v1746_v12, 1 }
 0x630   :  { %5765 = vmatmul.mubr.f32.vlgmr.msra.gmra.mxu0 %v1738_v13  ;;  %v1748_v15 = vadd.f32 %v1747_v14, %v1746_v12 }
 0x631   :  { %5806 = vmatprep.mubr.msk.f32.mxu0 %vm6759_vm0, %v6758_v1  ;;  %5803 = vmatpush3.msra.mxu0 %v1248_v16 }
 0x632   :  { %5800 = vmatmul.mubr.f32.vlgmr.msra.gmra.mxu1 %v1748_v15  ;;  %5804 = vmatprep.subr.mxu0 %v6758_v1  ;;  %v2334_v15 = vld [vmem:[#allocation21 + $0x20] sm:$0xff] }
 0x633   :  { %5813 = vmatprep.mubr.msk.f32.mxu1 %vm6759_vm0, %v6758_v1  ;;  %5810 = vmatpush3.msra.mxu1 %v1248_v16  ;;  %v2329_v16 = vld [vmem:[#allocation21] sm:$0xff] }
 0x634   :  { %5811 = vmatprep.subr.mxu1 %v6758_v1  ;;  %5805 = vmatpush3.msra.mxu0 %v1247_v17 }
 0x635   :  { %5812 = vmatpush3.msra.mxu1 %v1247_v17  ;;  %2245 = vmatprep.subr.bf16.mxu0 %v6114_v18 }
 0x636   :  { %5816 = vmatprep.subr.bf16.mxu1 %v6758_v1 }
 0x6f0   :  { %v1815_v19 = vpop.f32.mrf.mxu0 }
 0x6f1   :  { %v1819_v2 = vmul.f32 0.010204081, %v1815_v19 }
 0x6f2   :  { %v5766_v20 = vpop.f32.mrf.mxu0  ;;  %v1886_v21 = vpop.f32.mrf.mxu1 }
 0x6f3   :  { %v1891_v22 = vmul.f32 %v1819_v2, %v1819_v2  ;;  %v1890_v23 = vmul.f32 0.010204081, %v1886_v21 }
 0x6f4   :  { %v5801_v24 = vpop.f32.mrf.mxu1 }
 0x6f5   :  { %v1892_v25 = vsub.f32 %v1890_v23, %v1891_v22  ;;  %v2330_v22 = vld [vmem:[#allocation21 + $0x8] sm:$0xff]  ;;  %v2331_v23 = vld [vmem:[#allocation21 + $0x10] sm:$0xff] }
 0x6f6   :  { %v2335_v24 = vld [vmem:[#allocation21 + $0x28] sm:$0xff] }
 0x6f7   :  { %v1893_v26 = vadd.f32 1e-05, %v1892_v25  ;;  %v2336_v25 = vld [vmem:[#allocation21 + $0x30] sm:$0xff] }
 0x6f9   :  { %6266 = vrsqrt.f32 %v1893_v26  ;;  %v2332_v26 = vld [vmem:[#allocation21 + $0x18] sm:$0x3f] }
 0x706   :  { %v6267_v28 = vpop.eup %6266 }
 0x707   :  { %v1895_v30 = vmul.f32 %v6267_v28, %v1249_v27  ;;  %v2540_v28 = vld [vmem:[#allocation21 + $0x40] sm:$0xff] }
 0x709   :  { %v1896_v32 = vmul.f32 %v1895_v30, %v1819_v2  ;;  %5807 = vmatmul.mubr.msk.f32.vlgmr.msra.gmra.mxu0 %vm1901_vm6, %v1895_v30  ;;  %v2542_v30 = vld [vmem:[#allocation21 + $0x50] sm:$0xff] }
 0x70a   :  { %2246 = vmatpush1.bf16.msra.mxu0 %v6112_v29  ;;  %2277 = vmatprep.mubr.bf16.mxu0 %v6757_v0  ;;  %v2541_v29 = vld [vmem:[#allocation21 + $0x48] sm:$0xff] }
 0x70b   :  { %v1898_v34 = vrot.slane %v1896_v32, 7  ;;  %2247 = vmatprep.subr.bf16.mxu0 %v6118_v31  ;;  %v2543_v31 = vld [vmem:[#allocation21 + $0x58] sm:$0x3f] }
 0x70c   :  { %v2113_v32 = vld [vmem:[#allocation24 + $0x78] sm:$0xff] }
 0x70d   :  { %v1900_v36 = vsub.f32 %v1249_v27, %v1898_v34  ;;  %v2337_v27 = vld [vmem:[#allocation21 + $0x38] sm:$0x3f]  ;;  %v2111_v34 = vld [vmem:[#allocation24 + $0x68] sm:$0xff] }
 0x70e   :  { %2248 = vmatpush1.bf16.msra.mxu0 %v6116_v33  ;;  %v2112_v33 = vld [vmem:[#allocation24 + $0x70] sm:$0xff] }
 0x70f   :  { %v1976_v39 = vrot.slane %v1900_v36, 1  ;;  %2249 = vmatprep.subr.bf16.mxu0 %v6122_v35  ;;  %v2110_v35 = vld [vmem:[#allocation24 + $0x60] sm:$0xff]  ;;  %v2109_v36 = vld [vmem:[#allocation24 + $0x58] sm:$0xff] }
 0x711   :  { %5814 = vmatmul.mubr.msk.f32.vlgmr.msra.gmra.mxu1 %vm1901_vm6, %v1976_v39  ;;  %v2106_v39 = vld [vmem:[#allocation24 + $0x40] sm:$0xff] }
 0x712   :  { %5817 = vmatpush3.bf16.msra.mxu1 %v6115_v37  ;;  %2250 = vmatpush1.bf16.msra.mxu0 %v6120_v38  ;;  %v2108_v37 = vld [vmem:[#allocation24 + $0x50] sm:$0xff]  ;;  %v2107_v38 = vld [vmem:[#allocation24 + $0x48] sm:$0xff] }
 0x713   :  { %5818 = vmatprep.subr.bf16.mxu1 %v6758_v1  ;;  %2251 = vmatprep.subr.bf16.mxu0 %v6126_v40  ;;  %v2105_v40 = vld [vmem:[#allocation24 + $0x38] sm:$0xff] }
 0x714   :  { %5832 = vmatprep.mubr.msk.bf16.mxu1 %vm6759_vm0, %v6758_v1 }
 0x716   :  { %5819 = vmatpush3.bf16.msra.mxu1 %v6119_v41  ;;  %2252 = vmatpush1.bf16.msra.mxu0 %v6124_v42  ;;  %v2104_v41 = vld [vmem:[#allocation24 + $0x30] sm:$0xff]  ;;  %v2103_v42 = vld [vmem:[#allocation24 + $0x28] sm:$0xff] }
 0x717   :  { %5820 = vmatprep.subr.bf16.mxu1 %v6758_v1  ;;  %2253 = vmatprep.subr.bf16.mxu0 %v6130_v45  ;;  %v2100_v45 = vld [vmem:[#allocation24 + $0x10] sm:$0xff] }
 0x71a   :  { %5821 = vmatpush3.bf16.msra.mxu1 %v6123_v43  ;;  %2254 = vmatpush1.bf16.msra.mxu0 %v6128_v46  ;;  %v2102_v43 = vld [vmem:[#allocation24 + $0x20] sm:$0xff]  ;;  %v2099_v46 = vld [vmem:[#allocation24 + $0x8] sm:$0xff] }
 0x71b   :  { %5822 = vmatprep.subr.bf16.mxu1 %v6758_v1  ;;  %2255 = vmatprep.subr.bf16.mxu0 %v6134_v48 }
 0x71e   :  { %5823 = vmatpush3.bf16.msra.mxu1 %v6127_v44  ;;  %2256 = vmatpush1.bf16.msra.mxu0 %v6132_v49  ;;  %v2101_v44 = vld [vmem:[#allocation24 + $0x18] sm:$0xff] }
 0x71f   :  { %5824 = vmatprep.subr.bf16.mxu1 %v6758_v1  ;;  %2257 = vmatprep.subr.bf16.mxu0 %v6138_v51 }
 0x722   :  { %5825 = vmatpush3.bf16.msra.mxu1 %v6131_v47  ;;  %2258 = vmatpush1.bf16.msra.mxu0 %v6136_v52  ;;  %v2098_v47 = vld [vmem:[#allocation24] sm:$0xff] }
 0x723   :  { %5826 = vmatprep.subr.bf16.mxu1 %v6758_v1  ;;  %2259 = vmatprep.subr.bf16.mxu0 %v6142_v55 }
 0x726   :  { %5827 = vmatpush3.bf16.msra.mxu1 %v6135_v50  ;;  %2260 = vmatpush1.bf16.msra.mxu0 %v6140_v56 }
 0x727   :  { %5828 = vmatprep.subr.bf16.mxu1 %v6758_v1 }
 0x72a   :  { %5829 = vmatpush3.bf16.msra.mxu1 %v6139_v53 }
 0x72b   :  { %5830 = vmatprep.subr.bf16.mxu1 %v6758_v1 }
 0x72e   :  { %5831 = vmatpush3.bf16.msra.mxu1 %v6143_v57 }
 0x7c9   :  { %v1971_v59 = vpop.f32.mrf.mxu0 }
 0x7ca   :  { %v2052_v61 = vrot.slane %v1971_v59, %v7110_v4 }
 0x7cb   :  { %v5808_v60 = vpop.f32.mrf.mxu0 }
 0x7cc   :  { %v2053_v3 = vmul.f32 %v2052_v61, %v7171_v58  ;;  %v2054_v5 = vmul.f32 %v2052_v61, %v7165_v54 }
 0x7d1   :  { %v2045_v62 = vpop.f32.mrf.mxu1 }
 0x7d2   :  { %v2058_v6 = vrot.slane %v2045_v62, %v7110_v4  ;;  %v5152_v62 = vld [vmem:[#allocation22] ss:$0 sm:$0xff] }
 0x7d3   :  { %v5815_v7 = vpop.f32.mrf.mxu1 }
 0x7d4   :  { %v2059_v8 = vadd.f32 %v2058_v6, %v2053_v3  ;;  %v2060_v9 = vadd.f32 %v2058_v6, %v2054_v5 }
 0x7d6   :  { %v2061_v10 = vmul.f32 0.02, %v2059_v8  ;;  %v2062_v11 = vmul.f32 0.02, %v2060_v9 }
 0x7d8   :  { %v2063_v12 = vmax.f32 %v2059_v8, %v2061_v10  ;;  %v2064_v13 = vmax.f32 %v2060_v9, %v2062_v11 }
 0x7da   :  { %v2116_v14 = vpack.c.bf16 %v2064_v13, %v2063_v12 }
 0x7dc   :  { %2278 = vmatmul.mubr.bf16.vlgmr.msra.gmra.mxu0 %v2116_v14  ;;  %5833 = vmatmul.mubr.bf16.vlgmr.msra.gmra.mxu1 %v2116_v14 }
 0x7dd   :  { %5840 = vmatprep.mubr.msk.f32.mxu0 %vm2338_vm7, %v2334_v15  ;;  %5850 = vmatprep.mubr.msk.f32.mxu1 %vm2338_vm7, %v2329_v16 }
 0x89c   :  { %v2279_v54 = vpop.f32.mrf.mxu0  ;;  %v2322_v58 = vpop.f32.mrf.mxu1 }
 0x89e   :  { %v2281_v17 = vpop.f32.mrf.mxu0  ;;  %v5834_v18 = vpop.f32.mrf.mxu1 }
 0x8a0   :  { %v2283_v19 = vpop.f32.mrf.mxu0  ;;  %v2325_v2 = vpop.f32.mrf.mxu1 }
 0x8a1   :  { %5846 = vmatprep.subr.msk.mxu1 %vm870_vm3, %v2283_v19 }
 0x8a2   :  { %v2285_v20 = vpop.f32.mrf.mxu0  ;;  %v5835_v21 = vpop.f32.mrf.mxu1  ;;  %5847 = vmatpush3.msk.msra.mxu1 %vm870_vm3, %v2283_v19 }
 0x8a3   :  { %5836 = vmatprep.subr.msk.mxu0 %vm870_vm3, %v2285_v20  ;;  %5848 = vmatprep.subr.mxu1 %v2279_v54 }
 0x8a4   :  { %5837 = vmatpush3.msk.msra.mxu0 %vm870_vm3, %v2285_v20  ;;  %5849 = vmatpush3.msra.mxu1 %v2279_v54 }
 0x8a5   :  { %5838 = vmatprep.subr.mxu0 %v2281_v17  ;;  %5851 = vmatmul.mubr.msk.f32.vlgmr.msra.gmra.mxu1 %vm2338_vm7, %v2330_v22 }
 0x8a6   :  { %5839 = vmatpush3.msra.mxu0 %v2281_v17  ;;  %5853 = vmatprep.mubr.msk.f32.mxu1 %vm2338_vm7, %v2331_v23 }
 0x8a7   :  { %5841 = vmatmul.mubr.msk.f32.vlgmr.msra.gmra.mxu0 %vm2338_vm7, %v2335_v24  ;;  %5856 = vmatprep.subr.msk.mxu0 %vm870_vm3, %v2325_v2 }
 0x8a8   :  { %5857 = vmatpush3.msk.msra.mxu0 %vm870_vm3, %v2325_v2  ;;  %5843 = vmatprep.mubr.msk.f32.mxu0 %vm2338_vm7, %v2336_v25 }
 0x8a9   :  { %5858 = vmatprep.subr.mxu0 %v2322_v58  ;;  %5854 = vmatmul.mubr.msk.f32.gmra.mxu1 %vm2338_vm7, %v2332_v26 }
 0x8aa   :  { %5859 = vmatpush3.msra.mxu0 %v2322_v58  ;;  %5866 = vmatprep.subr.mxu1 %v6758_v1 }
 0x8ab   :  { %5844 = vmatmul.mubr.msk.f32.gmra.mxu0 %vm2338_vm7, %v2337_v27  ;;  %5901 = vmatprep.subr.mxu0 %v6758_v1 }
 0x8ac   :  { %5860 = vmatprep.mubr.msk.f32.mxu0 %vm2338_vm7, %v2540_v28  ;;  %5898 = vmatprep.mubr.msk.f32.mxu1 %vm6759_vm0, %v6758_v1 }
 0x8ad   :  { %5867 = vmatpush3.msra.mxu1 %v2113_v32 }
 0x8ae   :  { %5868 = vmatprep.subr.mxu1 %v6758_v1 }
 0x8af   :  { %5861 = vmatmul.mubr.msk.f32.vlgmr.msra.gmra.mxu0 %vm2338_vm7, %v2541_v29  ;;  %5869 = vmatpush3.msra.mxu1 %v2112_v33 }
 0x8b0   :  { %5863 = vmatprep.mubr.msk.f32.mxu0 %vm2338_vm7, %v2542_v30  ;;  %5902 = vmatpush3.msra.mxu0 %v2113_v32 }
 0x8b1   :  { %5903 = vmatprep.subr.mxu0 %v6758_v1  ;;  %5870 = vmatprep.subr.mxu1 %v6758_v1 }
 0x8b2   :  { %5904 = vmatpush3.msra.mxu0 %v2112_v33  ;;  %5871 = vmatpush3.msra.mxu1 %v2111_v34 }
 0x8b3   :  { %5864 = vmatmul.mubr.msk.f32.gmra.mxu0 %vm2338_vm7, %v2543_v31  ;;  %5905 = vmatprep.subr.mxu0 %v6758_v1 }
 0x8b4   :  { %5933 = vmatprep.mubr.msk.f32.mxu0 %vm6759_vm0, %v6758_v1  ;;  %5906 = vmatpush3.msra.mxu0 %v2111_v34 }
 0x8b5   :  { %5872 = vmatprep.subr.mxu1 %v6758_v1  ;;  %5907 = vmatprep.subr.mxu0 %v6758_v1 }
 0x8b6   :  { %5873 = vmatpush3.msra.mxu1 %v2110_v35  ;;  %5908 = vmatpush3.msra.mxu0 %v2110_v35 }
 0x8b7   :  { %5874 = vmatprep.subr.mxu1 %v6758_v1  ;;  %5909 = vmatprep.subr.mxu0 %v6758_v1 }
 0x8b8   :  { %5875 = vmatpush3.msra.mxu1 %v2109_v36  ;;  %5910 = vmatpush3.msra.mxu0 %v2109_v36 }
 0x8b9   :  { %5876 = vmatprep.subr.mxu1 %v6758_v1  ;;  %5911 = vmatprep.subr.mxu0 %v6758_v1 }
 0x8ba   :  { %5877 = vmatpush3.msra.mxu1 %v2108_v37  ;;  %5912 = vmatpush3.msra.mxu0 %v2108_v37  ;;  %v2114_v37 = vld [vmem:[#allocation25] sm:$0xff] }
 0x8bb   :  { %5878 = vmatprep.subr.mxu1 %v6758_v1  ;;  %5913 = vmatprep.subr.mxu0 %v6758_v1 }
 0x8bc   :  { %5879 = vmatpush3.msra.mxu1 %v2107_v38  ;;  %5914 = vmatpush3.msra.mxu0 %v2107_v38  ;;  %v6144_v38 = vld [vmem:[#allocation27 + $0x150] ss:$24 sps:$4 sm:$0xff]  }
 0x8bd   :  { %5880 = vmatprep.subr.mxu1 %v6758_v1  ;;  %5915 = vmatprep.subr.mxu0 %v6758_v1 }
 0x8be   :  { %5881 = vmatpush3.msra.mxu1 %v2106_v39  ;;  %5916 = vmatpush3.msra.mxu0 %v2106_v39  ;;  %v6146_v39 = vld [vmem:[#allocation27 + $0x154] ss:$24 sps:$4 sm:$0xff]  }
 0x8bf   :  { %5882 = vmatprep.subr.mxu1 %v6758_v1  ;;  %5917 = vmatprep.subr.mxu0 %v6758_v1 }
 0x8c0   :  { %5883 = vmatpush3.msra.mxu1 %v2105_v40  ;;  %5918 = vmatpush3.msra.mxu0 %v2105_v40  ;;  %v6152_v40 = vld [vmem:[#allocation27 + $0x124] ss:$24 sps:$4 sm:$0xff]  }
 0x8c1   :  { %5884 = vmatprep.subr.mxu1 %v6758_v1  ;;  %5919 = vmatprep.subr.mxu0 %v6758_v1 }
 0x8c2   :  { %5885 = vmatpush3.msra.mxu1 %v2104_v41  ;;  %5920 = vmatpush3.msra.mxu0 %v2104_v41  ;;  %v6150_v41 = vld [vmem:[#allocation27 + $0x120] ss:$24 sps:$4 sm:$0xff]  }
 0x8c3   :  { %5886 = vmatprep.subr.mxu1 %v6758_v1  ;;  %5921 = vmatprep.subr.mxu0 %v6758_v1 }
 0x8c4   :  { %5887 = vmatpush3.msra.mxu1 %v2103_v42  ;;  %5922 = vmatpush3.msra.mxu0 %v2103_v42  ;;  %v6158_v42 = vld [vmem:[#allocation27 + $0xf4] ss:$24 sps:$4 sm:$0xff]  }
 0x8c5   :  { %5888 = vmatprep.subr.mxu1 %v6758_v1  ;;  %5923 = vmatprep.subr.mxu0 %v6758_v1 }
 0x8c6   :  { %5889 = vmatpush3.msra.mxu1 %v2102_v43  ;;  %5924 = vmatpush3.msra.mxu0 %v2102_v43  ;;  %v6156_v43 = vld [vmem:[#allocation27 + $0xf0] ss:$24 sps:$4 sm:$0xff]  }
 0x8c7   :  { %5890 = vmatprep.subr.mxu1 %v6758_v1  ;;  %5925 = vmatprep.subr.mxu0 %v6758_v1 }
 0x8c8   :  { %5891 = vmatpush3.msra.mxu1 %v2101_v44  ;;  %5926 = vmatpush3.msra.mxu0 %v2101_v44  ;;  %v6164_v44 = vld [vmem:[#allocation27 + $0xc4] ss:$24 sps:$4 sm:$0xff]  }
 0x8c9   :  { %5892 = vmatprep.subr.mxu1 %v6758_v1  ;;  %5927 = vmatprep.subr.mxu0 %v6758_v1 }
 0x8ca   :  { %5893 = vmatpush3.msra.mxu1 %v2100_v45  ;;  %5928 = vmatpush3.msra.mxu0 %v2100_v45  ;;  %v6162_v45 = vld [vmem:[#allocation27 + $0xc0] ss:$24 sps:$4 sm:$0xff]  }
 0x8cb   :  { %5894 = vmatprep.subr.mxu1 %v6758_v1  ;;  %5929 = vmatprep.subr.mxu0 %v6758_v1 }
 0x8cc   :  { %5895 = vmatpush3.msra.mxu1 %v2099_v46  ;;  %5930 = vmatpush3.msra.mxu0 %v2099_v46 }
 0x8cd   :  { %5896 = vmatprep.subr.mxu1 %v6758_v1  ;;  %5931 = vmatprep.subr.mxu0 %v6758_v1 }
 0x8ce   :  { %5897 = vmatpush3.msra.mxu1 %v2098_v47  ;;  %5932 = vmatpush3.msra.mxu0 %v2098_v47 }
 0x8cf   :  { %5936 = vmatprep.subr.mxu1 %v6758_v1  ;;  %3332 = vmatprep.subr.bf16.mxu0 %v6146_v39 }
 0x965   :  { %v5852_v48 = vpop.f32.mrf.mxu1 }
 0x967   :  { %v5842_v49 = vpop.f32.mrf.mxu0  ;;  %v2520_v51 = vpop.f32.mrf.mxu1 }
 0x968   :  { %v2526_v56 = vadd.f32 %v5852_v48, %v5842_v49 }
 0x969   :  { %v2420_v50 = vpop.f32.mrf.mxu0  ;;  %v5855_v53 = vpop.f32.mrf.mxu1 }
 0x96a   :  { %v2521_v59 = vadd.f32 %v2520_v51, %v2420_v50 }
 0x96b   :  { %v5845_v52 = vpop.f32.mrf.mxu0  ;;  %v2530_v61 = vpop.f32.mrf.mxu1 }
 0x96c   :  { %v2536_v5 = vadd.f32 %v5855_v53, %v5845_v52 }
 0x96d   :  { %v2430_v55 = vpop.f32.mrf.mxu0 }
 0x96e   :  { %v2531_v8 = vadd.f32 %v2530_v61, %v2430_v55 }
 0x96f   :  { %v5862_v57 = vpop.f32.mrf.mxu0 }
 0x970   :  { %v2645_v60 = vadd.f32 %v5862_v57, %v2526_v56  ;;  %v2115_v56 = vld [vmem:[%s7624_s18] sm:$0x3] }
 0x971   :  { %v2625_v3 = vpop.f32.mrf.mxu0 }
 0x972   :  { %v2644_v6 = vadd.f32 %v2625_v3, %v2521_v59  ;;  %v7261_v9 = vadd.f32 %v5152_v62, %v2645_v60  ;;  %v6149_v60 = vld [vmem:[#allocation27 + $0x15c] ss:$24 sps:$4 sm:$0xff]  }
 0x973   :  { %v5865_v7 = vpop.f32.mrf.mxu0 }
 0x974   :  { %v7263_v10 = vadd.f32 %v5152_v62, %v2644_v6  ;;  %v2647_v11 = vadd.f32 %v5865_v7, %v2536_v5  ;;  %v2669_v16 = vmul.f32 %v7261_v9, %v7261_v9  ;;  %v6147_v5 = vld [vmem:[#allocation27 + $0x158] ss:$24 sps:$4 sm:$0xff]   ;;  %v6155_v7 = vld [vmem:[#allocation27 + $0x12c] ss:$24 sps:$4 sm:$0xff]  }
 0x975   :  { %v2635_v12 = vpop.f32.mrf.mxu0 }
 0x976   :  { %v2668_v13 = vmul.f32 %v7263_v10, %v7263_v10  ;;  %v7267_v14 = vadd.f32 %v5152_v62, %v2647_v11  ;;  %v2646_v15 = vadd.f32 %v2635_v12, %v2531_v8  ;;  %v2658_v54 = vadd.f32 %v7261_v9, %v7263_v10  ;;  %v6153_v8 = vld [vmem:[#allocation27 + $0x128] ss:$24 sps:$4 sm:$0xff]   ;;  %v6161_v11 = vld [vmem:[#allocation27 + $0xfc] ss:$24 sps:$4 sm:$0xff]   ;;  %v6159_v12 = vld [vmem:[#allocation27 + $0xf8] ss:$24 sps:$4 sm:$0xff]  }
 0x978   :  { %v7273_v58 = vadd.f32 %v5152_v62, %v2646_v15  ;;  %v2671_v17 = vmul.f32 %v7267_v14, %v7267_v14  ;;  %v2672_v18 = vadd.f32 %v2669_v16, %v2668_v13  ;;  %v2660_v20 = vsel %vm870_vm3, %v7267_v14, 0.0  ;;  %v6167_v13 = vld [vmem:[#allocation27 + $0xcc] ss:$24 sps:$4 sm:$0xff]   ;;  %v6165_v15 = vld [vmem:[#allocation27 + $0xc8] ss:$24 sps:$4 sm:$0xff]  }
 0x979   :  { %v6170_v16 = vld [vmem:[#allocation27 + $0x94] ss:$24 sps:$4 sm:$0xff]  }
 0x97a   :  { %v2659_v19 = vadd.f32 %v2658_v54, %v7273_v58  ;;  %v2670_v2 = vmul.f32 %v7273_v58, %v7273_v58  ;;  %v2674_v23 = vsel %vm870_vm3, %v2671_v17, 0.0  ;;  %v6168_v54 = vld [vmem:[#allocation27 + $0x90] ss:$24 sps:$4 sm:$0xff]   ;;  %v6173_v17 = vld [vmem:[#allocation27 + $0x9c] ss:$24 sps:$4 sm:$0xff]  }
 0x97c   :  { %v2661_v21 = vadd.f32 %v2660_v20, %v2659_v19  ;;  %v2673_v22 = vadd.f32 %v2672_v18, %v2670_v2  ;;  %v6171_v18 = vld [vmem:[#allocation27 + $0x98] ss:$24 sps:$4 sm:$0xff]   ;;  %v6176_v2 = vld [vmem:[#allocation27 + $0x64] ss:$24 sps:$4 sm:$0xff]   ;;  %v6177_v20 = vld [vmem:[#allocation27 + $0x68] ss:$24 sps:$4 sm:$0xff]  }
 0x97d   :  { %v6174_v19 = vld [vmem:[#allocation27 + $0x60] ss:$24 sps:$4 sm:$0xff]  }
 0x97e   :  { %v2662_v24 = vrot.slane %v2661_v21, 4  ;;  %v2675_v25 = vadd.f32 %v2674_v23, %v2673_v22  ;;  %v6182_v22 = vld [vmem:[#allocation27 + $0x34] ss:$24 sps:$4 sm:$0xff]   ;;  %v6180_v23 = vld [vmem:[#allocation27 + $0x30] ss:$24 sps:$4 sm:$0xff]  }
 0x980   :  { %v2663_v26 = vadd.f32 %v2662_v24, %v2661_v21  ;;  %v2676_v27 = vrot.slane %v2675_v25, 4  ;;  %v6179_v21 = vld [vmem:[#allocation27 + $0x6c] ss:$24 sps:$4 sm:$0xff]   ;;  %v6185_v24 = vld [vmem:[#allocation27 + $0x3c] ss:$24 sps:$4 sm:$0xff]  }
 0x982   :  { %v2664_v28 = vrot.slane %v2663_v26, 2  ;;  %v2677_v29 = vadd.f32 %v2676_v27, %v2675_v25  ;;  %v6183_v25 = vld [vmem:[#allocation27 + $0x38] ss:$24 sps:$4 sm:$0xff]  }
 0x983   :  { %v6186_v27 = vld [vmem:[#allocation27] ss:$24 sps:$4 sm:$0xff]  }
 0x984   :  { %v2665_v30 = vadd.f32 %v2664_v28, %v2663_v26  ;;  %v2678_v31 = vrot.slane %v2677_v29, 2  ;;  %v6188_v26 = vld [vmem:[#allocation27 + $0x4] ss:$24 sps:$4 sm:$0xff]   ;;  %v6189_v28 = vld [vmem:[#allocation27 + $0x8] ss:$24 sps:$4 sm:$0xff]  }
 0x986   :  { %v2666_v32 = vrot.slane %v2665_v30, 1  ;;  %v2679_v33 = vadd.f32 %v2678_v31, %v2677_v29  ;;  %v6191_v29 = vld [vmem:[#allocation27 + $0xc] ss:$24 sps:$4 sm:$0xff]  }
 0x988   :  { %v2667_v34 = vadd.f32 %v2666_v32, %v2665_v30  ;;  %v2680_v35 = vrot.slane %v2679_v33, 1  ;;  %v6194_v30 = vld [vmem:[#allocation27 + $0x164] ss:$24 sps:$4 sm:$0xff]  }
 0x98a   :  { %5899 = vmatmul.mubr.f32.vlgmr.msra.gmra.mxu1 %v2667_v34  ;;  %v2681_v36 = vadd.f32 %v2680_v35, %v2679_v33 }
 0x98b   :  { %5938 = vmatprep.mubr.msk.f32.mxu1 %vm6759_vm0, %v6758_v1  ;;  %5937 = vmatpush3.msra.mxu1 %v2114_v37 }
 0x98c   :  { %5934 = vmatmul.mubr.f32.vlgmr.msra.gmra.mxu0 %v2681_v36  ;;  %5941 = vmatprep.subr.mxu1 %v6758_v1 }
 0x98d   :  { %3364 = vmatprep.mubr.bf16.mxu0 %v6757_v0  ;;  %3333 = vmatpush1.bf16.msra.mxu0 %v6144_v38 }
 0x98e   :  { %3334 = vmatprep.subr.bf16.mxu0 %v6152_v40 }
 0x991   :  { %3335 = vmatpush1.bf16.msra.mxu0 %v6150_v41 }
 0x992   :  { %3336 = vmatprep.subr.bf16.mxu0 %v6158_v42 }
 0x995   :  { %3337 = vmatpush1.bf16.msra.mxu0 %v6156_v43 }
 0x996   :  { %3338 = vmatprep.subr.bf16.mxu0 %v6164_v44 }
 0x999   :  { %3339 = vmatpush1.bf16.msra.mxu0 %v6162_v45 }
 0x99a   :  { %3340 = vmatprep.subr.bf16.mxu0 %v6170_v16 }
 0x99d   :  { %3341 = vmatpush1.bf16.msra.mxu0 %v6168_v54 }
 0x99e   :  { %3342 = vmatprep.subr.bf16.mxu0 %v6176_v2 }
 0x9a1   :  { %3343 = vmatpush1.bf16.msra.mxu0 %v6174_v19 }
 0x9a2   :  { %3344 = vmatprep.subr.bf16.mxu0 %v6182_v22 }
 0x9a5   :  { %3345 = vmatpush1.bf16.msra.mxu0 %v6180_v23 }
 0x9a6   :  { %3346 = vmatprep.subr.bf16.mxu0 %v6188_v26  ;;  %v3491_v26 = vld [vmem:[#allocation28] sm:$0xff] }
 0x9a9   :  { %3347 = vmatpush1.bf16.msra.mxu0 %v6186_v27  ;;  %v3501_v27 = vld [vmem:[#allocation28 + $0x48] sm:$0xff] }
 0x9aa   :  { %3438 = vmatprep.subr.bf16.mxu0 %v6194_v30  ;;  %v3493_v30 = vld [vmem:[#allocation28 + $0x10] sm:$0xff] }
 0xa4a   :  { %v2748_v46 = vpop.f32.mrf.mxu1 }
 0xa4b   :  { %v2752_v47 = vmul.f32 0.0022222223, %v2748_v46 }
 0xa4c   :  { %v5900_v48 = vpop.f32.mrf.mxu1  ;;  %v2819_v49 = vpop.f32.mrf.mxu0 }
 0xa4d   :  { %v2824_v50 = vmul.f32 %v2752_v47, %v2752_v47  ;;  %v2823_v51 = vmul.f32 0.0022222223, %v2819_v49  ;;  %v6192_v49 = vld [vmem:[#allocation27 + $0x160] ss:$24 sps:$4 sm:$0xff]  }
 0xa4e   :  { %v5935_v52 = vpop.f32.mrf.mxu0 }
 0xa4f   :  { %v2825_v53 = vsub.f32 %v2823_v51, %v2824_v50  ;;  %v6195_v52 = vld [vmem:[#allocation27 + $0x130] ss:$24 sps:$4 sm:$0xff]  }
 0xa51   :  { %v2826_v55 = vadd.f32 1e-05, %v2825_v53 }
 0xa53   :  { %6268 = vrsqrt.f32 %v2826_v55  ;;  %v6198_v55 = vld [vmem:[#allocation27 + $0x100] ss:$24 sps:$4 sm:$0xff]  }
 0xa60   :  { %v6269_v57 = vpop.eup %6268 }
 0xa61   :  { %v2828_v59 = vmul.f32 %v6269_v57, %v2115_v56  ;;  %v6203_v57 = vld [vmem:[#allocation27 + $0xd4] ss:$24 sps:$4 sm:$0xff]  }
 0xa63   :  { %v2829_v61 = vmul.f32 %v2828_v59, %v2752_v47  ;;  %5939 = vmatmul.mubr.msk.f32.vlgmr.msra.gmra.mxu1 %vm2834_vm8, %v2828_v59  ;;  %v6201_v59 = vld [vmem:[#allocation27 + $0xd0] ss:$24 sps:$4 sm:$0xff]  }
 0xa64   :  { %5942 = vmatpush3.msra.mxu1 %v2114_v37  ;;  %5943 = vmatprep.mubr.msk.f32.mxu1 %vm6759_vm0, %v6758_v1 }
 0xa65   :  { %v2831_v62 = vrot.slane %v2829_v61, 7  ;;  %3385 = vmatprep.subr.bf16.mxu1 %v6149_v60  ;;  %v6206_v60 = vld [vmem:[#allocation27 + $0xa4] ss:$24 sps:$4 sm:$0xff]   ;;  %v6204_v61 = vld [vmem:[#allocation27 + $0xa0] ss:$24 sps:$4 sm:$0xff]  }
 0xa67   :  { %v2833_v3 = vsub.f32 %v2115_v56, %v2831_v62  ;;  %v6209_v62 = vld [vmem:[#allocation27 + $0x74] ss:$24 sps:$4 sm:$0xff]  }
 0xa69   :  { %v2909_v6 = vrot.slane %v2833_v3, 1  ;;  %v6207_v3 = vld [vmem:[#allocation27 + $0x70] ss:$24 sps:$4 sm:$0xff]  }
 0xa6b   :  { %5944 = vmatmul.mubr.msk.f32.vlgmr.msra.gmra.mxu1 %vm2834_vm8, %v2909_v6  ;;  %v6210_v6 = vld [vmem:[#allocation27 + $0x40] ss:$24 sps:$4 sm:$0xff]  }
 0xa6c   :  { %3386 = vmatpush1.bf16.msra.mxu1 %v6147_v5  ;;  %3417 = vmatprep.mubr.bf16.mxu1 %v6757_v0  ;;  %v6212_v5 = vld [vmem:[#allocation27 + $0x44] ss:$24 sps:$4 sm:$0xff]  }
 0xa6d   :  { %3387 = vmatprep.subr.bf16.mxu1 %v6155_v7  ;;  %v6215_v7 = vld [vmem:[#allocation27 + $0x14] ss:$24 sps:$4 sm:$0xff]  }
 0xa70   :  { %3388 = vmatpush1.bf16.msra.mxu1 %v6153_v8  ;;  %v6213_v8 = vld [vmem:[#allocation27 + $0x10] ss:$24 sps:$4 sm:$0xff]  }
 0xa71   :  { %3389 = vmatprep.subr.bf16.mxu1 %v6161_v11 }
 0xa74   :  { %3390 = vmatpush1.bf16.msra.mxu1 %v6159_v12 }
 0xa75   :  { %3391 = vmatprep.subr.bf16.mxu1 %v6167_v13 }
 0xa78   :  { %3392 = vmatpush1.bf16.msra.mxu1 %v6165_v15 }
 0xa79   :  { %3393 = vmatprep.subr.bf16.mxu1 %v6173_v17 }
 0xa7c   :  { %3394 = vmatpush1.bf16.msra.mxu1 %v6171_v18 }
 0xa7d   :  { %3395 = vmatprep.subr.bf16.mxu1 %v6179_v21 }
 0xa80   :  { %3396 = vmatpush1.bf16.msra.mxu1 %v6177_v20 }
 0xa81   :  { %3397 = vmatprep.subr.bf16.mxu1 %v6185_v24 }
 0xa84   :  { %3398 = vmatpush1.bf16.msra.mxu1 %v6183_v25 }
 0xa85   :  { %3399 = vmatprep.subr.bf16.mxu1 %v6191_v29  ;;  %v3502_v29 = vld [vmem:[#allocation28 + $0x50] sm:$0xff] }
 0xa88   :  { %3400 = vmatpush1.bf16.msra.mxu1 %v6189_v28  ;;  %v3492_v28 = vld [vmem:[#allocation28 + $0x8] sm:$0xff] }
 0xb23   :  { %v2904_v31 = vpop.f32.mrf.mxu1 }
 0xb24   :  { %v2985_v33 = vrot.slane %v2904_v31, %v7110_v4 }
 0xb25   :  { %v5940_v32 = vpop.f32.mrf.mxu1 }
 0xb26   :  { %v2986_v35 = vmul.f32 %v2985_v33, %v7263_v10  ;;  %v2987_v36 = vmul.f32 %v2985_v33, %v7261_v9  ;;  %v2988_v39 = vmul.f32 %v2985_v33, %v7273_v58  ;;  %v2989_v40 = vmul.f32 %v2985_v33, %v7267_v14  ;;  %v6197_v10 = vld [vmem:[#allocation27 + $0x134] ss:$24 sps:$4 sm:$0xff]   ;;  %v6200_v14 = vld [vmem:[#allocation27 + $0x104] ss:$24 sps:$4 sm:$0xff]  }
 0xb27   :  { %v3503_v32 = vld [vmem:[#allocation28 + $0x58] sm:$0xff] }
 0xb28   :  { %v3494_v33 = vld [vmem:[#allocation28 + $0x18] sm:$0xff] }
 0xb2b   :  { %v2978_v34 = vpop.f32.mrf.mxu1 }
 0xb2c   :  { %v2993_v37 = vrot.slane %v2978_v34, %v7110_v4 }
 0xb2d   :  { %v5945_v38 = vpop.f32.mrf.mxu1 }
 0xb2e   :  { %v2994_v41 = vadd.f32 %v2993_v37, %v2986_v35  ;;  %v2995_v42 = vadd.f32 %v2993_v37, %v2987_v36  ;;  %v2996_v45 = vadd.f32 %v2993_v37, %v2988_v39  ;;  %v2997_v46 = vadd.f32 %v2993_v37, %v2989_v40  ;;  %v3504_v36 = vld [vmem:[#allocation28 + $0x60] sm:$0xff]  ;;  %v3505_v40 = vld [vmem:[#allocation28 + $0x68] sm:$0xff] }
 0xb2f   :  { %v3495_v37 = vld [vmem:[#allocation28 + $0x20] sm:$0xff] }
 0xb30   :  { %v2998_v43 = vmul.f32 0.02, %v2994_v41  ;;  %v2999_v44 = vmul.f32 0.02, %v2995_v42  ;;  %v3000_v51 = vmul.f32 0.02, %v2996_v45 }
 0xb31   :  { %v3001_v9 = vmul.f32 0.02, %v2997_v46 }
 0xb32   :  { %v3002_v47 = vmax.f32 %v2994_v41, %v2998_v43  ;;  %v3003_v48 = vmax.f32 %v2995_v42, %v2999_v44  ;;  %v3004_v58 = vmax.f32 %v2996_v45, %v3000_v51  ;;  %v3496_v41 = vld [vmem:[#allocation28 + $0x28] sm:$0xff]  ;;  %v3506_v44 = vld [vmem:[#allocation28 + $0x70] sm:$0xff]  ;;  %v3799_v51 = vld [vmem:[#allocation28 + $0x98] sm:$0xff] }
 0xb33   :  { %v3005_v53 = vmax.f32 %v2997_v46, %v3001_v9  ;;  %v3497_v46 = vld [vmem:[#allocation28 + $0x30] sm:$0xff]  ;;  %v3800_v9 = vld [vmem:[#allocation28 + $0xa0] sm:$0xff] }
 0xb34   :  { %v3090_v50 = vpack.c.bf16 %v3003_v48, %v3002_v47  ;;  %v3507_v47 = vld [vmem:[#allocation28 + $0x78] sm:$0x3f] }
 0xb35   :  { %v3091_v56 = vpack.c.bf16 %v3005_v53, %v3004_v58  ;;  %v3498_v48 = vld [vmem:[#allocation28 + $0x38] sm:$0x3f] }
 0xb36   :  { %3365 = vmatmul.mubr.bf16.vlgmr.msra.gmra.mxu0 %v3090_v50  ;;  %3418 = vmatmul.mubr.bf16.vlgmr.msra.gmra.mxu1 %v3090_v50  ;;  %v3803_v58 = vld [vmem:[#allocation28 + $0xb8] sm:$0x3f] }
 0xb37   :  { %3439 = vmatpush1.bf16.msra.mxu0 %v6192_v49  ;;  %3374 = vmatprep.mubr.bf16.mxu0 %v6757_v0  ;;  %v3796_v49 = vld [vmem:[#allocation28 + $0x80] sm:$0xff]  ;;  %v3086_v53 = vld [vmem:[#allocation30 + $0xf8] sm:$0xff] }
 0xb38   :  { %3440 = vmatprep.subr.bf16.mxu0 %v6197_v10  ;;  %3427 = vmatprep.mubr.bf16.mxu1 %v6757_v0  ;;  %v3798_v10 = vld [vmem:[#allocation28 + $0x90] sm:$0xff] }
 0xb3b   :  { %3441 = vmatpush1.bf16.msra.mxu0 %v6195_v52  ;;  %v3801_v52 = vld [vmem:[#allocation28 + $0xa8] sm:$0xff] }
 0xb3c   :  { %3442 = vmatprep.subr.bf16.mxu0 %v6200_v14  ;;  %v3802_v14 = vld [vmem:[#allocation28 + $0xb0] sm:$0xff] }
 0xb3e   :  { %3375 = vmatmul.mubr.bf16.gmra.mxu0 %v3091_v56  ;;  %3428 = vmatmul.mubr.bf16.gmra.mxu1 %v3091_v56 }
 0xb3f   :  { %3443 = vmatpush1.bf16.msra.mxu0 %v6198_v55  ;;  %3470 = vmatprep.mubr.bf16.mxu0 %v6757_v0  ;;  %v3070_v55 = vld [vmem:[#allocation30 + $0x78] sm:$0xff] }
 0xb40   :  { %3444 = vmatprep.subr.bf16.mxu0 %v6203_v57  ;;  %3603 = vmatprep.mubr.f32.mxu1 %v6758_v1  ;;  %v3069_v57 = vld [vmem:[#allocation30 + $0x70] sm:$0xff] }
 0xb43   :  { %3445 = vmatpush1.bf16.msra.mxu0 %v6201_v59  ;;  %v3084_v59 = vld [vmem:[#allocation30 + $0xe8] sm:$0xff] }
 0xb44   :  { %3446 = vmatprep.subr.bf16.mxu0 %v6206_v60  ;;  %v3068_v60 = vld [vmem:[#allocation30 + $0x68] sm:$0xff] }
 0xb47   :  { %3447 = vmatpush1.bf16.msra.mxu0 %v6204_v61  ;;  %v3083_v61 = vld [vmem:[#allocation30 + $0xe0] sm:$0xff] }
 0xb48   :  { %3448 = vmatprep.subr.bf16.mxu0 %v6209_v62  ;;  %v3067_v62 = vld [vmem:[#allocation30 + $0x60] sm:$0xff] }
 0xb4b   :  { %3449 = vmatpush1.bf16.msra.mxu0 %v6207_v3  ;;  %v3082_v3 = vld [vmem:[#allocation30 + $0xd8] sm:$0xff] }
 0xb4c   :  { %3450 = vmatprep.subr.bf16.mxu0 %v6212_v5  ;;  %v3066_v5 = vld [vmem:[#allocation30 + $0x58] sm:$0xff] }
 0xb4f   :  { %3451 = vmatpush1.bf16.msra.mxu0 %v6210_v6  ;;  %v3081_v6 = vld [vmem:[#allocation30 + $0xd0] sm:$0xff] }
 0xb50   :  { %3452 = vmatprep.subr.bf16.mxu0 %v6215_v7  ;;  %v3065_v7 = vld [vmem:[#allocation30 + $0x50] sm:$0xff] }
 0xb53   :  { %3453 = vmatpush1.bf16.msra.mxu0 %v6213_v8  ;;  %v3080_v8 = vld [vmem:[#allocation30 + $0xc8] sm:$0xff] }
 0xb56   :  { %3471 = vmatmul.mubr.bf16.vlgmr.msra.gmra.mxu0 %v3090_v50  ;;  %v3797_v50 = vld [vmem:[#allocation28 + $0x88] sm:$0xff] }
 0xb57   :  { %3480 = vmatprep.mubr.bf16.mxu0 %v6757_v0  ;;  %v3500_v0 = vld [vmem:[#allocation28 + $0x40] sm:$0xff] }
 0xb5e   :  { %3481 = vmatmul.mubr.bf16.gmra.mxu0 %v3091_v56  ;;  %v3085_v56 = vld [vmem:[#allocation30 + $0xf0] sm:$0xff] }
 0xb5f   :  { %3746 = vmatprep.mubr.f32.mxu0 %v6758_v1 }
 0xbf6   :  { %v3366_v11 = vpop.f32.mrf.mxu0  ;;  %v3419_v12 = vpop.f32.mrf.mxu1 }
 0xbf8   :  { %v3368_v13 = vpop.f32.mrf.mxu0  ;;  %v3421_v15 = vpop.f32.mrf.mxu1 }
 0xbfa   :  { %v3370_v16 = vpop.f32.mrf.mxu0  ;;  %v3423_v54 = vpop.f32.mrf.mxu1 }
 0xbfc   :  { %v3372_v17 = vpop.f32.mrf.mxu0  ;;  %v3425_v18 = vpop.f32.mrf.mxu1 }
 0xbfe   :  { %v3376_v19 = vpop.f32.mrf.mxu0  ;;  %v3429_v2 = vpop.f32.mrf.mxu1 }
 0xc00   :  { %v3378_v20 = vpop.f32.mrf.mxu0  ;;  %v3431_v21 = vpop.f32.mrf.mxu1 }
 0xc02   :  { %v3380_v22 = vpop.f32.mrf.mxu0  ;;  %v3433_v23 = vpop.f32.mrf.mxu1 }
 0xc04   :  { %v3382_v24 = vpop.f32.mrf.mxu0  ;;  %v3435_v25 = vpop.f32.mrf.mxu1 }
 0xc05   :  { %5203 = vmatprep.subr.msk.mxu1 %vm870_vm3, %v3435_v25  ;;  %5213 = vmatprep.subr.msk.mxu0 %vm870_vm3, %v3382_v24  ;;  %v3057_v24 = vld [vmem:[#allocation30 + $0x10] sm:$0xff]  ;;  %v3072_v25 = vld [vmem:[#allocation30 + $0x88] sm:$0xff] }
 0xc06   :  { %5204 = vmatpush1.msk.msra.mxu1 %vm870_vm3, %v3433_v23  ;;  %5214 = vmatpush1.msk.msra.mxu0 %vm870_vm3, %v3380_v22  ;;  %v3058_v22 = vld [vmem:[#allocation30 + $0x18] sm:$0xff]  ;;  %v3073_v23 = vld [vmem:[#allocation30 + $0x90] sm:$0xff] }
 0xc07   :  { %3565 = vmatprep.subr.mxu1 %v3431_v21  ;;  %3708 = vmatprep.subr.mxu0 %v3378_v20  ;;  %v3059_v20 = vld [vmem:[#allocation30 + $0x20] sm:$0xff]  ;;  %v3074_v21 = vld [vmem:[#allocation30 + $0x98] sm:$0xff] }
 0xc08   :  { %3566 = vmatpush1.msra.mxu1 %v3429_v2  ;;  %3709 = vmatpush1.msra.mxu0 %v3376_v19  ;;  %v3060_v19 = vld [vmem:[#allocation30 + $0x28] sm:$0xff]  ;;  %v3075_v2 = vld [vmem:[#allocation30 + $0xa0] sm:$0xff] }
 0xc09   :  { %3567 = vmatprep.subr.mxu1 %v3425_v18  ;;  %3710 = vmatprep.subr.mxu0 %v3372_v17  ;;  %v3061_v17 = vld [vmem:[#allocation30 + $0x30] sm:$0xff]  ;;  %v3076_v18 = vld [vmem:[#allocation30 + $0xa8] sm:$0xff] }
 0xc0a   :  { %3568 = vmatpush1.msra.mxu1 %v3423_v54  ;;  %3711 = vmatpush1.msra.mxu0 %v3370_v16  ;;  %v3062_v16 = vld [vmem:[#allocation30 + $0x38] sm:$0xff]  ;;  %v3077_v54 = vld [vmem:[#allocation30 + $0xb0] sm:$0xff] }
 0xc0b   :  { %3569 = vmatprep.subr.mxu1 %v3421_v15  ;;  %3712 = vmatprep.subr.mxu0 %v3368_v13  ;;  %v3063_v13 = vld [vmem:[#allocation30 + $0x40] sm:$0xff]  ;;  %v3078_v15 = vld [vmem:[#allocation30 + $0xb8] sm:$0xff] }
 0xc0c   :  { %3570 = vmatpush1.msra.mxu1 %v3419_v12  ;;  %3713 = vmatpush1.msra.mxu0 %v3366_v11  ;;  %v3064_v11 = vld [vmem:[#allocation30 + $0x48] sm:$0xff]  ;;  %v3079_v12 = vld [vmem:[#allocation30 + $0xc0] sm:$0xff] }
 0xc0d   :  { %5205 = vmatmul.mubr.msk.f32.vlgmr.msra.gmra.mxu1 %vm3508_vm9, %v3500_v0  ;;  %5215 = vmatmul.mubr.msk.f32.vlgmr.msra.gmra.mxu0 %vm3508_vm9, %v3491_v26  ;;  %v3056_v0 = vld [vmem:[#allocation30 + $0x8] sm:$0xff]  ;;  %v3071_v26 = vld [vmem:[#allocation30 + $0x80] sm:$0xff] }
 0xc0e   :  { %3609 = vmatprep.mubr.f32.mxu1 %v6758_v1  ;;  %3752 = vmatprep.mubr.f32.mxu0 %v6758_v1 }
 0xc0f   :  { %5468 = vmatprep.subr.mxu0 %v3086_v53 }
 0xc10   :  { %5469 = vmatpush3.msra.mxu0 %v3070_v55 }
 0xc11   :  { %5206 = vmatmul.mubr.msk.f32.gmra.mxu1 %vm3508_vm9, %v3501_v27  ;;  %5216 = vmatmul.mubr.msk.f32.gmra.mxu0 %vm3508_vm9, %v3492_v28  ;;  %v3055_v27 = vld [vmem:[#allocation30] sm:$0xff] }
 0xc12   :  { %3615 = vmatprep.mubr.f32.mxu1 %v6758_v1  ;;  %3758 = vmatprep.mubr.f32.mxu0 %v6758_v1 }
 0xc13   :  { %5470 = vmatprep.subr.mxu0 %v3085_v56 }
 0xc14   :  { %5471 = vmatpush3.msra.mxu0 %v3069_v57 }
 0xc15   :  { %5207 = vmatmul.mubr.msk.f32.gmra.mxu1 %vm3508_vm9, %v3502_v29  ;;  %5217 = vmatmul.mubr.msk.f32.gmra.mxu0 %vm3508_vm9, %v3493_v30 }
 0xc16   :  { %v3472_v31 = vpop.f32.mrf.mxu0  ;;  %3621 = vmatprep.mubr.f32.mxu1 %v6758_v1  ;;  %3764 = vmatprep.mubr.f32.mxu0 %v6758_v1 }
 0xc17   :  { %5472 = vmatprep.subr.mxu0 %v3084_v59 }
 0xc18   :  { %v3474_v34 = vpop.f32.mrf.mxu0  ;;  %5473 = vmatpush3.msra.mxu0 %v3068_v60 }
 0xc19   :  { %5208 = vmatmul.mubr.msk.f32.gmra.mxu1 %vm3508_vm9, %v3503_v32  ;;  %5218 = vmatmul.mubr.msk.f32.gmra.mxu0 %vm3508_vm9, %v3494_v33 }
 0xc1a   :  { %v3476_v35 = vpop.f32.mrf.mxu0  ;;  %3627 = vmatprep.mubr.f32.mxu1 %v6758_v1  ;;  %3770 = vmatprep.mubr.f32.mxu0 %v6758_v1 }
 0xc1b   :  { %5474 = vmatprep.subr.mxu0 %v3083_v61 }
 0xc1c   :  { %v3478_v38 = vpop.f32.mrf.mxu0  ;;  %5475 = vmatpush3.msra.mxu0 %v3067_v62 }
 0xc1d   :  { %5209 = vmatmul.mubr.msk.f32.gmra.mxu1 %vm3508_vm9, %v3504_v36  ;;  %5219 = vmatmul.mubr.msk.f32.gmra.mxu0 %vm3508_vm9, %v3495_v37 }
 0xc1e   :  { %v3482_v39 = vpop.f32.mrf.mxu0  ;;  %3633 = vmatprep.mubr.f32.mxu1 %v6758_v1  ;;  %3776 = vmatprep.mubr.f32.mxu0 %v6758_v1 }
 0xc1f   :  { %5476 = vmatprep.subr.mxu0 %v3082_v3 }
 0xc20   :  { %v3484_v42 = vpop.f32.mrf.mxu0  ;;  %5477 = vmatpush3.msra.mxu0 %v3066_v5 }
 0xc21   :  { %5210 = vmatmul.mubr.msk.f32.gmra.mxu1 %vm3508_vm9, %v3505_v40  ;;  %5220 = vmatmul.mubr.msk.f32.gmra.mxu0 %vm3508_vm9, %v3496_v41 }
 0xc22   :  { %v3486_v43 = vpop.f32.mrf.mxu0  ;;  %3639 = vmatprep.mubr.f32.mxu1 %v6758_v1  ;;  %3782 = vmatprep.mubr.f32.mxu0 %v6758_v1 }
 0xc23   :  { %5478 = vmatprep.subr.mxu0 %v3081_v6 }
 0xc24   :  { %v3488_v45 = vpop.f32.mrf.mxu0  ;;  %5479 = vmatpush3.msra.mxu0 %v3065_v7 }
 0xc25   :  { %5223 = vmatprep.subr.msk.mxu1 %vm870_vm3, %v3488_v45  ;;  %5211 = vmatmul.mubr.msk.f32.gmra.mxu1 %vm3508_vm9, %v3506_v44 }
 0xc26   :  { %5224 = vmatpush1.msk.msra.mxu1 %vm870_vm3, %v3486_v43  ;;  %3645 = vmatprep.mubr.f32.mxu1 %v6758_v1 }
 0xc27   :  { %3860 = vmatprep.subr.mxu1 %v3484_v42  ;;  %5221 = vmatmul.mubr.msk.f32.gmra.mxu0 %vm3508_vm9, %v3497_v46 }
 0xc28   :  { %3861 = vmatpush1.msra.mxu1 %v3482_v39  ;;  %3788 = vmatprep.mubr.f32.mxu0 %v6758_v1 }
 0xc29   :  { %3862 = vmatprep.subr.mxu1 %v3478_v38  ;;  %5212 = vmatmul.mubr.msk.f32.gmra.mxu1 %vm3508_vm9, %v3507_v47 }
 0xc2a   :  { %3863 = vmatpush1.msra.mxu1 %v3476_v35  ;;  %3898 = vmatprep.mubr.f32.mxu1 %v6758_v1 }
 0xc2b   :  { %3864 = vmatprep.subr.mxu1 %v3474_v34  ;;  %5222 = vmatmul.mubr.msk.f32.gmra.mxu0 %vm3508_vm9, %v3498_v48 }
 0xc2c   :  { %3865 = vmatpush1.msra.mxu1 %v3472_v31  ;;  %5480 = vmatprep.subr.mxu0 %v3080_v8 }
 0xc2d   :  { %5225 = vmatmul.mubr.msk.f32.vlgmr.msra.gmra.mxu1 %vm3508_vm9, %v3796_v49  ;;  %5503 = vmatprep.subr.mxu1 %v3086_v53 }
 0xc2e   :  { %3904 = vmatprep.mubr.f32.mxu1 %v6758_v1  ;;  %5504 = vmatpush3.msra.mxu1 %v3070_v55 }
 0xc2f   :  { %5505 = vmatprep.subr.mxu1 %v3085_v56  ;;  %5481 = vmatpush3.msra.mxu0 %v3064_v11 }
 0xc30   :  { %5506 = vmatpush3.msra.mxu1 %v3069_v57  ;;  %5482 = vmatprep.subr.mxu0 %v3079_v12  ;;  %v3054_v57 = vld [vmem:[%s7627_s21] sm:$0x3] }
 0xc31   :  { %5226 = vmatmul.mubr.msk.f32.gmra.mxu1 %vm3508_vm9, %v3797_v50  ;;  %5507 = vmatprep.subr.mxu1 %v3084_v59 }
 0xc32   :  { %3910 = vmatprep.mubr.f32.mxu1 %v6758_v1  ;;  %5508 = vmatpush3.msra.mxu1 %v3068_v60  ;;  %v3970_v60 = vsub.s32 1, %v7107_v63 }
 0xc33   :  { %5509 = vmatprep.subr.mxu1 %v3083_v61  ;;  %5483 = vmatpush3.msra.mxu0 %v3063_v13 }
 0xc34   :  { %5510 = vmatpush3.msra.mxu1 %v3067_v62  ;;  %5484 = vmatprep.subr.mxu0 %v3078_v15 }
 0xc35   :  { %5227 = vmatmul.mubr.msk.f32.gmra.mxu1 %vm3508_vm9, %v3798_v10  ;;  %5511 = vmatprep.subr.mxu1 %v3082_v3 }
 0xc36   :  { %3916 = vmatprep.mubr.f32.mxu1 %v6758_v1  ;;  %5512 = vmatpush3.msra.mxu1 %v3066_v5 }
 0xc37   :  { %5513 = vmatprep.subr.mxu1 %v3081_v6  ;;  %5485 = vmatpush3.msra.mxu0 %v3062_v16 }
 0xc38   :  { %5514 = vmatpush3.msra.mxu1 %v3065_v7  ;;  %5486 = vmatprep.subr.mxu0 %v3077_v54 }
 0xc39   :  { %5228 = vmatmul.mubr.msk.f32.gmra.mxu1 %vm3508_vm9, %v3799_v51  ;;  %5515 = vmatprep.subr.mxu1 %v3080_v8 }
 0xc3a   :  { %3922 = vmatprep.mubr.f32.mxu1 %v6758_v1  ;;  %5516 = vmatpush3.msra.mxu1 %v3064_v11  ;;  %v7368_v11 = vrot.slane %v3054_v57, %v7110_v4 }
 0xc3b   :  { %5517 = vmatprep.subr.mxu1 %v3079_v12  ;;  %5487 = vmatpush3.msra.mxu0 %v3061_v17 }
 0xc3c   :  { %5518 = vmatpush3.msra.mxu1 %v3063_v13  ;;  %5488 = vmatprep.subr.mxu0 %v3076_v18 }
 0xc3d   :  { %5229 = vmatmul.mubr.msk.f32.gmra.mxu1 %vm3508_vm9, %v3800_v9  ;;  %5519 = vmatprep.subr.mxu1 %v3078_v15 }
 0xc3e   :  { %3928 = vmatprep.mubr.f32.mxu1 %v6758_v1  ;;  %5520 = vmatpush3.msra.mxu1 %v3062_v16 }
 0xc3f   :  { %5521 = vmatprep.subr.mxu1 %v3077_v54  ;;  %5489 = vmatpush3.msra.mxu0 %v3060_v19 }
 0xc40   :  { %5522 = vmatpush3.msra.mxu1 %v3061_v17  ;;  %5490 = vmatprep.subr.mxu0 %v3075_v2 }
 0xc41   :  { %5230 = vmatmul.mubr.msk.f32.gmra.mxu1 %vm3508_vm9, %v3801_v52  ;;  %5523 = vmatprep.subr.mxu1 %v3076_v18 }
 0xc42   :  { %3934 = vmatprep.mubr.f32.mxu1 %v6758_v1  ;;  %5524 = vmatpush3.msra.mxu1 %v3060_v19 }
 0xc43   :  { %5525 = vmatprep.subr.mxu1 %v3075_v2  ;;  %5491 = vmatpush3.msra.mxu0 %v3059_v20  ;;  %v7370_v2 = vrot.slane %v3054_v57, %v3970_v60 }
 0xc44   :  { %5526 = vmatpush3.msra.mxu1 %v3059_v20  ;;  %5492 = vmatprep.subr.mxu0 %v3074_v21 }
 0xc45   :  { %5231 = vmatmul.mubr.msk.f32.gmra.mxu1 %vm3508_vm9, %v3802_v14  ;;  %5527 = vmatprep.subr.mxu1 %v3074_v21 }
 0xc46   :  { %3940 = vmatprep.mubr.f32.mxu1 %v6758_v1  ;;  %5493 = vmatpush3.msra.mxu0 %v3058_v22 }
 0xc47   :  { %5528 = vmatpush3.msra.mxu1 %v3058_v22  ;;  %5494 = vmatprep.subr.mxu0 %v3073_v23 }
 0xc48   :  { %5529 = vmatprep.subr.mxu1 %v3073_v23  ;;  %5495 = vmatpush3.msra.mxu0 %v3057_v24 }
 0xc49   :  { %5232 = vmatmul.mubr.msk.f32.gmra.mxu1 %vm3508_vm9, %v3803_v58  ;;  %5496 = vmatprep.subr.mxu0 %v3072_v25 }
 0xc4a   :  { %5530 = vmatpush3.msra.mxu1 %v3057_v24  ;;  %5497 = vmatpush3.msra.mxu0 %v3056_v0 }
 0xc4b   :  { %5531 = vmatprep.subr.mxu1 %v3072_v25  ;;  %5498 = vmatprep.subr.mxu0 %v3071_v26 }
 0xc4c   :  { %5532 = vmatpush3.msra.mxu1 %v3056_v0  ;;  %5499 = vmatpush3.msra.mxu0 %v3055_v27 }
 0xc4d   :  { %5533 = vmatprep.subr.mxu1 %v3071_v26 }
 0xc4e   :  { %5534 = vmatpush3.msra.mxu1 %v3055_v27 }
 0xccd   :  { %v3605_v28 = vpop.f32.mrf.mxu1  ;;  %v3748_v29 = vpop.f32.mrf.mxu0 }
 0xcce   :  { %v3749_v62 = vadd.f32 %v3748_v29, %v3605_v28 }
 0xccf   :  { %v3607_v30 = vpop.f32.mrf.mxu1  ;;  %v3750_v31 = vpop.f32.mrf.mxu0 }
 0xcd0   :  { %v3751_v8 = vadd.f32 %v3750_v31, %v3607_v30 }
 0xcd1   :  { %v3611_v32 = vpop.f32.mrf.mxu1  ;;  %v3754_v33 = vpop.f32.mrf.mxu0 }
 0xcd2   :  { %v3755_v56 = vadd.f32 %v3754_v33, %v3611_v32 }
 0xcd3   :  { %v3613_v34 = vpop.f32.mrf.mxu1  ;;  %v3756_v36 = vpop.f32.mrf.mxu0 }
 0xcd4   :  { %v3757_v3 = vadd.f32 %v3756_v36, %v3613_v34 }
 0xcd5   :  { %v3617_v35 = vpop.f32.mrf.mxu1  ;;  %v3760_v39 = vpop.f32.mrf.mxu0 }
 0xcd6   :  { %v3761_v5 = vadd.f32 %v3760_v39, %v3617_v35 }
 0xcd7   :  { %v3619_v37 = vpop.f32.mrf.mxu1  ;;  %v3762_v42 = vpop.f32.mrf.mxu0 }
 0xcd8   :  { %v3763_v12 = vadd.f32 %v3762_v42, %v3619_v37 }
 0xcd9   :  { %v3623_v38 = vpop.f32.mrf.mxu1  ;;  %v3766_v45 = vpop.f32.mrf.mxu0 }
 0xcda   :  { %v3767_v17 = vadd.f32 %v3766_v45, %v3623_v38 }
 0xcdb   :  { %v3625_v40 = vpop.f32.mrf.mxu1  ;;  %v3768_v48 = vpop.f32.mrf.mxu0 }
 0xcdc   :  { %v3769_v22 = vadd.f32 %v3768_v48, %v3625_v40 }
 0xcdd   :  { %v3629_v41 = vpop.f32.mrf.mxu1  ;;  %v3772_v10 = vpop.f32.mrf.mxu0 }
 0xcde   :  { %v3773_v23 = vadd.f32 %v3772_v10, %v3629_v41 }
 0xcdf   :  { %v3631_v43 = vpop.f32.mrf.mxu1  ;;  %v3774_v52 = vpop.f32.mrf.mxu0 }
 0xce0   :  { %v3775_v31 = vadd.f32 %v3774_v52, %v3631_v43 }
 0xce1   :  { %v3635_v44 = vpop.f32.mrf.mxu1  ;;  %v3778_v53 = vpop.f32.mrf.mxu0 }
 0xce2   :  { %v3779_v36 = vadd.f32 %v3778_v53, %v3635_v44 }
 0xce3   :  { %v3637_v46 = vpop.f32.mrf.mxu1  ;;  %v3780_v61 = vpop.f32.mrf.mxu0 }
 0xce4   :  { %v3781_v37 = vadd.f32 %v3780_v61, %v3637_v46 }
 0xce5   :  { %v3641_v47 = vpop.f32.mrf.mxu1 }
 0xce7   :  { %v3643_v49 = vpop.f32.mrf.mxu1  ;;  %v3784_v18 = vpop.f32.mrf.mxu0 }
 0xce8   :  { %v3785_v38 = vadd.f32 %v3784_v18, %v3641_v47 }
 0xce9   :  { %v7359_v50 = vpop.f32.mrf.mxu1  ;;  %v3786_v28 = vpop.f32.mrf.mxu0 }
 0xcea   :  { %v3787_v48 = vadd.f32 %v3786_v28, %v3643_v49 }
 0xceb   :  { %v7361_v51 = vpop.f32.mrf.mxu1  ;;  %v3790_v10 = vpop.f32.mrf.mxu0 }
 0xced   :  { %v3900_v9 = vpop.f32.mrf.mxu1 }
 0xcee   :  { %v3947_v13 = vadd.f32 %v3900_v9, %v3749_v62 }
 0xcef   :  { %v3902_v14 = vpop.f32.mrf.mxu1 }
 0xcf0   :  { %v3948_v19 = vadd.f32 %v3902_v14, %v3751_v8  ;;  %v7376_v25 = vadd.f32 %v7368_v11, %v3947_v13 }
 0xcf1   :  { %v3906_v58 = vpop.f32.mrf.mxu1 }
 0xcf2   :  { %v3949_v6 = vadd.f32 %v3906_v58, %v3755_v56  ;;  %v7385_v32 = vadd.f32 %v7370_v2, %v3948_v19  ;;  %v4018_v40 = vmul.f32 %v7376_v25, %v7376_v25 }
 0xcf3   :  { %v3908_v55 = vpop.f32.mrf.mxu1 }
 0xcf4   :  { %v3950_v15 = vadd.f32 %v3908_v55, %v3757_v3  ;;  %v7373_v63 = vadd.f32 %v7368_v11, %v3949_v6  ;;  %v4019_v9 = vmul.f32 %v7385_v32, %v7385_v32  ;;  %v3792_v6 = vpop.f32.mrf.mxu0 }
 0xcf5   :  { %v3912_v59 = vpop.f32.mrf.mxu1 }
 0xcf6   :  { %v3951_v16 = vadd.f32 %v3912_v59, %v3761_v5  ;;  %v7379_v0 = vadd.f32 %v7370_v2, %v3950_v15  ;;  %v4020_v33 = vmul.f32 %v7373_v63, %v7373_v63  ;;  %v3990_v52 = vadd.f32 %v7373_v63, %v7376_v25 }
 0xcf7   :  { %v3914_v7 = vpop.f32.mrf.mxu1  ;;  %v3791_v15 = vadd.f32 %v3790_v10, %v7359_v50 }
 0xcf8   :  { %v3952_v20 = vadd.f32 %v3914_v7, %v3763_v12  ;;  %v7382_v26 = vadd.f32 %v7368_v11, %v3951_v16  ;;  %v4021_v41 = vmul.f32 %v7379_v0, %v7379_v0  ;;  %v4034_v14 = vadd.f32 %v4020_v33, %v4018_v40 }
 0xcf9   :  { %v3918_v54 = vpop.f32.mrf.mxu1  ;;  %v4004_v49 = vadd.f32 %v7379_v0, %v7385_v32 }
 0xcfa   :  { %v3953_v24 = vadd.f32 %v3918_v54, %v3767_v17  ;;  %v7390_v34 = vadd.f32 %v7370_v2, %v3952_v20  ;;  %v4022_v42 = vmul.f32 %v7382_v26, %v7382_v26  ;;  %v4048_v59 = vadd.f32 %v4021_v41, %v4019_v9 }
 0xcfb   :  { %v3920_v21 = vpop.f32.mrf.mxu1  ;;  %v3991_v60 = vadd.f32 %v3990_v52, %v7382_v26 }
 0xcfc   :  { %v3954_v29 = vadd.f32 %v3920_v21, %v3769_v22  ;;  %v7393_v39 = vadd.f32 %v7368_v11, %v3953_v24  ;;  %v4023_v58 = vmul.f32 %v7390_v34, %v7390_v34  ;;  %v4035_v61 = vadd.f32 %v4034_v14, %v4022_v42 }
 0xcfd   :  { %v3924_v27 = vpop.f32.mrf.mxu1  ;;  %v4005_v5 = vadd.f32 %v4004_v49, %v7390_v34  ;;  %v3793_v22 = vadd.f32 %v3792_v6, %v7361_v51 }
 0xcfe   :  { %v3955_v30 = vadd.f32 %v3924_v27, %v3773_v23  ;;  %v7402_v44 = vadd.f32 %v7370_v2, %v3954_v29  ;;  %v4024_v55 = vmul.f32 %v7393_v39, %v7393_v39  ;;  %v4049_v13 = vadd.f32 %v4048_v59, %v4023_v58 }
 0xcff   :  { %v3926_v35 = vpop.f32.mrf.mxu1  ;;  %v3992_v16 = vadd.f32 %v3991_v60, %v7393_v39 }
 0xd00   :  { %v3956_v43 = vadd.f32 %v3926_v35, %v3775_v31  ;;  %v7405_v46 = vadd.f32 %v7368_v11, %v3955_v30  ;;  %v4025_v7 = vmul.f32 %v7402_v44, %v7402_v44  ;;  %v4036_v18 = vadd.f32 %v4035_v61, %v4024_v55 }
 0xd01   :  { %v3930_v45 = vpop.f32.mrf.mxu1  ;;  %v4006_v19 = vadd.f32 %v4005_v5, %v7402_v44 }
 0xd02   :  { %v3957_v47 = vadd.f32 %v3930_v45, %v3779_v36  ;;  %v7418_v56 = vadd.f32 %v7370_v2, %v3956_v43  ;;  %v4026_v8 = vmul.f32 %v7405_v46, %v7405_v46  ;;  %v3993_v23 = vadd.f32 %v3992_v16, %v7405_v46 }
 0xd03   :  { %v3932_v53 = vpop.f32.mrf.mxu1  ;;  %v4050_v28 = vadd.f32 %v4049_v13, %v4025_v7 }
 0xd04   :  { %v3958_v57 = vadd.f32 %v3932_v53, %v3781_v37  ;;  %v7422_v62 = vadd.f32 %v7368_v11, %v3957_v47  ;;  %v4027_v20 = vmul.f32 %v7418_v56, %v7418_v56  ;;  %v4037_v29 = vadd.f32 %v4036_v18, %v4026_v8 }
 0xd05   :  { %v3936_v3 = vpop.f32.mrf.mxu1  ;;  %v4007_v30 = vadd.f32 %v4006_v19, %v7418_v56 }
 0xd06   :  { %v3959_v12 = vadd.f32 %v3936_v3, %v3785_v38  ;;  %v7432_v54 = vadd.f32 %v7370_v2, %v3958_v57  ;;  %v4028_v50 = vmul.f32 %v7422_v62, %v7422_v62  ;;  %v3994_v33 = vadd.f32 %v3993_v23, %v7422_v62 }
 0xd07   :  { %v3938_v17 = vpop.f32.mrf.mxu1  ;;  %v4051_v38 = vadd.f32 %v4050_v28, %v4027_v20 }
 0xd08   :  { %v7438_v21 = vadd.f32 %v7368_v11, %v3959_v12  ;;  %v3960_v24 = vadd.f32 %v3938_v17, %v3787_v48  ;;  %v4029_v35 = vmul.f32 %v7432_v54, %v7432_v54  ;;  %v4038_v42 = vadd.f32 %v4037_v29, %v4028_v50 }
 0xd09   :  { %v3942_v27 = vpop.f32.mrf.mxu1  ;;  %v4008_v43 = vadd.f32 %v4007_v30, %v7432_v54 }
 0xd0a   :  { %v3961_v31 = vadd.f32 %v3942_v27, %v3791_v15  ;;  %v4030_v51 = vmul.f32 %v7438_v21, %v7438_v21  ;;  %v7451_v36 = vadd.f32 %v7370_v2, %v3960_v24  ;;  %v3995_v45 = vadd.f32 %v3994_v33, %v7438_v21 }
 0xd0b   :  { %v3944_v37 = vpop.f32.mrf.mxu1 }
 0xd0c   :  { %v7454_v40 = vadd.f32 %v7368_v11, %v3961_v31  ;;  %v3962_v41 = vadd.f32 %v3944_v37, %v3793_v22  ;;  %v4031_v48 = vmul.f32 %v7451_v36, %v7451_v36  ;;  %v4052_v11 = vadd.f32 %v4051_v38, %v4029_v35  ;;  %v3087_v37 = vld [vmem:[%s7629_s23] sm:$0xff]  ;;  %v6218_v38 = vld [vmem:[#allocation31 + $0x74] ss:$8 sps:$4 sm:$0xff]  }
 0xd0d   :  { %v4039_v52 = vadd.f32 %v4038_v42, %v4030_v51  ;;  %v4009_v14 = vadd.f32 %v4008_v43, %v7451_v36  ;;  %v3088_v51 = vld [vmem:[%s7629_s23 + $0x8] sm:$0xff] }
 0xd0e   :  { %v3996_v10 = vsel %vm870_vm3, %v7454_v40, 0.0  ;;  %v4032_v47 = vmul.f32 %v7454_v40, %v7454_v40  ;;  %v7465_v9 = vadd.f32 %v7370_v2, %v3962_v41  ;;  %v4053_v57 = vadd.f32 %v4052_v11, %v4031_v48  ;;  %4247 = vmatprep.subr.mxu0 %v3088_v51  ;;  %4322 = vmatprep.subr.mxu1 %v3088_v51  ;;  %v6255_v51 = vld [vmem:[#allocation31 + $0xa0] ss:$8 sps:$4 sm:$0xff]  }
 0xd0f   :  { %v3997_v58 = vadd.f32 %v3996_v10, %v3995_v45 }
 0xd10   :  { %v4040_v53 = vsel %vm870_vm3, %v4032_v47, 0.0  ;;  %v4010_v49 = vsel %vm870_vm3, %v7465_v9, 0.0  ;;  %v4033_v55 = vmul.f32 %v7465_v9, %v7465_v9 }
 0xd11   :  { %v3998_v59 = vrot.slane %v3997_v58, 4  ;;  %v4041_v60 = vadd.f32 %v4040_v53, %v4039_v52  ;;  %v4011_v61 = vadd.f32 %v4010_v49, %v4009_v14  ;;  %v6216_v49 = vld [vmem:[#allocation31 + $0x70] ss:$8 sps:$4 sm:$0xff]  }
 0xd12   :  { %v4054_v2 = vsel %vm870_vm3, %v4033_v55, 0.0 }
 0xd13   :  { %v3999_v3 = vadd.f32 %v3998_v59, %v3997_v58  ;;  %v4042_v5 = vrot.slane %v4041_v60, 4  ;;  %v4012_v6 = vrot.slane %v4011_v61, 4  ;;  %v4055_v7 = vadd.f32 %v4054_v2, %v4053_v57  ;;  %v3089_v58 = vld [vmem:[%s7630_s24] sm:$0x3]  ;;  %v6224_v2 = vld [vmem:[#allocation31 + $0x54] ss:$8 sps:$4 sm:$0xff]  }
 0xd14   :  { %v6221_v57 = vld [vmem:[#allocation31 + $0x64] ss:$8 sps:$4 sm:$0xff]  }
 0xd15   :  { %v4000_v8 = vrot.slane %v3999_v3, 2  ;;  %v4043_v12 = vadd.f32 %v4042_v5, %v4041_v60  ;;  %v4013_v13 = vadd.f32 %v4012_v6, %v4011_v61  ;;  %v4056_v15 = vrot.slane %v4055_v7, 4  ;;  %v6219_v60 = vld [vmem:[#allocation31 + $0x60] ss:$8 sps:$4 sm:$0xff]   ;;  %v6222_v5 = vld [vmem:[#allocation31 + $0x50] ss:$8 sps:$4 sm:$0xff]  }
 0xd17   :  { %v4001_v16 = vadd.f32 %v4000_v8, %v3999_v3  ;;  %v4044_v17 = vrot.slane %v4043_v12, 2  ;;  %v4014_v18 = vrot.slane %v4013_v13, 2  ;;  %v4057_v19 = vadd.f32 %v4056_v15, %v4055_v7  ;;  %v6227_v7 = vld [vmem:[#allocation31 + $0x44] ss:$8 sps:$4 sm:$0xff]   ;;  %v6225_v8 = vld [vmem:[#allocation31 + $0x40] ss:$8 sps:$4 sm:$0xff]  }
 0xd18   :  { %v6233_v15 = vld [vmem:[#allocation31 + $0x24] ss:$8 sps:$4 sm:$0xff]  }
 0xd19   :  { %v4015_v20 = vadd.f32 %v4014_v18, %v4013_v13  ;;  %v4058_v22 = vrot.slane %v4057_v19, 2  ;;  %v4045_v23 = vadd.f32 %v4044_v17, %v4043_v12  ;;  %v4002_v50 = vrot.slane %v4001_v16, 1  ;;  %v6230_v12 = vld [vmem:[#allocation31 + $0x34] ss:$8 sps:$4 sm:$0xff]   ;;  %v6228_v13 = vld [vmem:[#allocation31 + $0x30] ss:$8 sps:$4 sm:$0xff]  }
 0xd1a   :  { %v6236_v17 = vld [vmem:[#allocation31 + $0x14] ss:$8 sps:$4 sm:$0xff]   ;;  %v6234_v18 = vld [vmem:[#allocation31 + $0x10] ss:$8 sps:$4 sm:$0xff]  }
 0xd1b   :  { %v4016_v24 = vrot.slane %v4015_v20, 1  ;;  %v4059_v27 = vadd.f32 %v4058_v22, %v4057_v19  ;;  %v4046_v28 = vrot.slane %v4045_v23, 1  ;;  %v4003_v31 = vadd.f32 %v4002_v50, %v4001_v16  ;;  %v6231_v16 = vld [vmem:[#allocation31 + $0x20] ss:$8 sps:$4 sm:$0xff]   ;;  %v6239_v19 = vld [vmem:[#allocation31 + $0x4] ss:$8 sps:$4 sm:$0xff]  }
 0xd1c   :  { %v6242_v22 = vld [vmem:[#allocation31 + $0xf4] ss:$8 sps:$4 sm:$0xff]   ;;  %v6245_v50 = vld [vmem:[#allocation31 + $0xe4] ss:$8 sps:$4 sm:$0xff]  }
 0xd1d   :  { %v4017_v29 = vadd.f32 %v4016_v24, %v4015_v20  ;;  %v4060_v30 = vrot.slane %v4059_v27, 1  ;;  %v4047_v35 = vadd.f32 %v4046_v28, %v4045_v23  ;;  %v6237_v20 = vld [vmem:[#allocation31] ss:$8 sps:$4 sm:$0xff]   ;;  %v6240_v23 = vld [vmem:[#allocation31 + $0xf0] ss:$8 sps:$4 sm:$0xff]  }
 0xd1e   :  { %v6243_v24 = vld [vmem:[#allocation31 + $0xe0] ss:$8 sps:$4 sm:$0xff]   ;;  %v6246_v28 = vld [vmem:[#allocation31 + $0xd0] ss:$8 sps:$4 sm:$0xff]  }
 0xd1f   :  { %4126 = vmatprep.mubr.f32.mxu0 %v4017_v29  ;;  %v4061_v33 = vadd.f32 %v4060_v30, %v4059_v27  ;;  %v6248_v27 = vld [vmem:[#allocation31 + $0xd4] ss:$8 sps:$4 sm:$0xff]   ;;  %v6251_v29 = vld [vmem:[#allocation31 + $0xc4] ss:$8 sps:$4 sm:$0xff]   ;;  %v6249_v30 = vld [vmem:[#allocation31 + $0xc0] ss:$8 sps:$4 sm:$0xff]  }
 0xd20   :  { %4127 = vmatmul.mubr.f32.vlgmr.msra.gmra.mxu0 %v4003_v31  ;;  %v6254_v31 = vld [vmem:[#allocation31 + $0xb4] ss:$8 sps:$4 sm:$0xff]  }
 0xd21   :  { %4197 = vmatprep.mubr.f32.mxu1 %v4061_v33  ;;  %4281 = vmatprep.mubr.f32.mxu0 %v6758_v1  ;;  %v6252_v33 = vld [vmem:[#allocation31 + $0xb0] ss:$8 sps:$4 sm:$0xff]  }
 0xd22   :  { %4198 = vmatmul.mubr.f32.vlgmr.msra.gmra.mxu1 %v4047_v35  ;;  %4248 = vmatpush1.msra.mxu0 %v3087_v37  ;;  %v6257_v35 = vld [vmem:[#allocation31 + $0xa4] ss:$8 sps:$4 sm:$0xff]  }
 0xd23   :  { %4356 = vmatprep.mubr.f32.mxu1 %v6758_v1  ;;  %4323 = vmatpush1.msra.mxu1 %v3087_v37  ;;  %v6260_v37 = vld [vmem:[#allocation31 + $0x94] ss:$8 sps:$4 sm:$0xff]  }
 0xd24   :  { %4644 = vmatprep.subr.bf16.mxu0 %v6218_v38  ;;  %v6258_v38 = vld [vmem:[#allocation31 + $0x90] ss:$8 sps:$4 sm:$0xff]  }
 0xde0   :  { %v5500_v41 = vpop.f32.mrf.mxu0 }
 0xde2   :  { %v5501_v42 = vpop.f32.mrf.mxu0  ;;  %v5535_v43 = vpop.f32.mrf.mxu1 }
 0xde3   :  { %v5502_v45 = vadd.f32 %v5501_v42, %v5500_v41  ;;  %v6263_v41 = vld [vmem:[#allocation31 + $0x84] ss:$8 sps:$4 sm:$0xff]   ;;  %v6261_v42 = vld [vmem:[#allocation31 + $0x80] ss:$8 sps:$4 sm:$0xff]  }
 0xde4   :  { %v5536_v48 = vpop.f32.mrf.mxu1 }
 0xde5   :  { %v4132_v1 = vmul.f32 0.0005202914, %v5502_v45  ;;  %v5537_v10 = vadd.f32 %v5536_v48, %v5535_v43 }
 0xde7   :  { %v4204_v47 = vmul.f32 %v4132_v1, %v4132_v1  ;;  %v4203_v11 = vmul.f32 0.0005202914, %v5537_v10 }
 0xde9   :  { %v4205_v52 = vsub.f32 %v4203_v11, %v4204_v47 }
 0xdeb   :  { %v4206_v14 = vadd.f32 1e-05, %v4205_v52 }
 0xded   :  { %6270 = vrsqrt.f32 %v4206_v14 }
 0xdfa   :  { %v6271_v53 = vpop.eup %6270 }
 0xdfb   :  { %v4208_v55 = vmul.f32 %v6271_v53, %v3089_v58 }
 0xdfd   :  { %v4209_v59 = vmul.f32 %v4208_v55, %v4132_v1  ;;  %5233 = vmatmul.mubr.msk.f32.vlgmr.msra.gmra.mxu0 %vm2834_vm8, %v4208_v55 }
 0xdfe   :  { %4645 = vmatpush1.bf16.msra.mxu0 %v6216_v49 }
 0xdff   :  { %v4211_v61 = vrot.slane %v4209_v59, 7  ;;  %4646 = vmatprep.subr.bf16.mxu0 %v6221_v57 }
 0xe01   :  { %v4213_v3 = vsub.f32 %v3089_v58, %v4211_v61 }
 0xe02   :  { %4647 = vmatpush1.bf16.msra.mxu0 %v6219_v60 }
 0xe03   :  { %v4289_v6 = vrot.slane %v4213_v3, 1  ;;  %4648 = vmatprep.subr.bf16.mxu0 %v6224_v2 }
 0xe05   :  { %5234 = vmatmul.mubr.msk.f32.vlgmr.msra.gmra.mxu1 %vm2834_vm8, %v4289_v6 }
 0xe06   :  { %4649 = vmatpush1.bf16.msra.mxu0 %v6222_v5 }
 0xe07   :  { %4650 = vmatprep.subr.bf16.mxu0 %v6227_v7 }
 0xe0a   :  { %4651 = vmatpush1.bf16.msra.mxu0 %v6225_v8 }
 0xe0b   :  { %4652 = vmatprep.subr.bf16.mxu0 %v6230_v12 }
 0xe0e   :  { %4653 = vmatpush1.bf16.msra.mxu0 %v6228_v13 }
 0xe0f   :  { %4654 = vmatprep.subr.bf16.mxu0 %v6233_v15 }
 0xe12   :  { %4655 = vmatpush1.bf16.msra.mxu0 %v6231_v16 }
 0xe13   :  { %4656 = vmatprep.subr.bf16.mxu0 %v6236_v17 }
 0xe16   :  { %4657 = vmatpush1.bf16.msra.mxu0 %v6234_v18 }
 0xe17   :  { %4658 = vmatprep.subr.bf16.mxu0 %v6239_v19 }
 0xe1a   :  { %4659 = vmatpush1.bf16.msra.mxu0 %v6237_v20 }
 0xe1b   :  { %4660 = vmatprep.subr.bf16.mxu0 %v6242_v22 }
 0xe1e   :  { %4661 = vmatpush2.bf16.msra.mxu0 %v6240_v23 }
 0xe1f   :  { %4662 = vmatprep.subr.bf16.mxu0 %v6245_v50 }
 0xe22   :  { %4663 = vmatpush2.bf16.msra.mxu0 %v6243_v24 }
 0xe23   :  { %4664 = vmatprep.subr.bf16.mxu0 %v6248_v27 }
 0xe26   :  { %4665 = vmatpush2.bf16.msra.mxu0 %v6246_v28 }
 0xe27   :  { %4666 = vmatprep.subr.bf16.mxu0 %v6251_v29 }
 0xe2a   :  { %4667 = vmatpush2.bf16.msra.mxu0 %v6249_v30 }
 0xe2b   :  { %4668 = vmatprep.subr.bf16.mxu0 %v6254_v31 }
 0xe2e   :  { %4669 = vmatpush2.bf16.msra.mxu0 %v6252_v33 }
 0xe2f   :  { %4670 = vmatprep.subr.bf16.mxu0 %v6257_v35 }
 0xe32   :  { %4671 = vmatpush2.bf16.msra.mxu0 %v6255_v51 }
 0xe33   :  { %4672 = vmatprep.subr.bf16.mxu0 %v6260_v37 }
 0xe36   :  { %4673 = vmatpush2.bf16.msra.mxu0 %v6258_v38 }
 0xe37   :  { %4674 = vmatprep.subr.bf16.mxu0 %v6263_v41 }
 0xe3a   :  { %4675 = vmatpush2.bf16.msra.mxu0 %v6261_v42 }
 0xebd   :  { %v4283_v43 = vpop.f32.mrf.mxu0 }
 0xebe   :  { %v7488_v48 = vrot.slane %v4283_v43, %v7110_v4 }
 0xebf   :  { %v4285_v45 = vpop.f32.mrf.mxu0 }
 0xec0   :  { %v4370_v1 = vrot.slane %v4285_v45, %v7110_v4  ;;  %v4371_v11 = vmul.f32 %v7488_v48, %v7376_v25  ;;  %v4373_v52 = vmul.f32 %v7488_v48, %v7373_v63  ;;  %v4375_v25 = vmul.f32 %v7488_v48, %v7382_v26 }
 0xec1   :  { %v4377_v63 = vmul.f32 %v7488_v48, %v7393_v39  ;;  %v4379_v28 = vmul.f32 %v7488_v48, %v7405_v46  ;;  %v4381_v29 = vmul.f32 %v7488_v48, %v7422_v62 }
 0xec2   :  { %v4372_v58 = vmul.f32 %v4370_v1, %v7385_v32  ;;  %v4374_v49 = vmul.f32 %v4370_v1, %v7379_v0  ;;  %v4376_v59 = vmul.f32 %v4370_v1, %v7390_v34  ;;  %v4378_v60 = vmul.f32 %v4370_v1, %v7402_v44 }
 0xec3   :  { %v4380_v5 = vmul.f32 %v4370_v1, %v7418_v56  ;;  %v4382_v6 = vmul.f32 %v4370_v1, %v7432_v54  ;;  %v4384_v30 = vmul.f32 %v4370_v1, %v7451_v36  ;;  %v4386_v31 = vmul.f32 %v4370_v1, %v7465_v9 }
 0xec4   :  { %v4383_v36 = vmul.f32 %v7488_v48, %v7438_v21  ;;  %v4385_v9 = vmul.f32 %v7488_v48, %v7454_v40  ;;  %v4726_v40 = vld [vmem:[#allocation33 + $0x40] sm:$0xff] }
 0xec5   :  { %v4358_v10 = vpop.f32.mrf.mxu1  ;;  %5962 = vmatprep.mubr.msk.f32.mxu1 %vm4734_vm10, %v4726_v40  ;;  %v4717_v48 = vld [vmem:[#allocation33] sm:$0xff] }
 0xec6   :  { %v7492_v47 = vrot.slane %v4358_v10, %v7110_v4 }
 0xec7   :  { %v4360_v14 = vpop.f32.mrf.mxu1 }
 0xec8   :  { %v4394_v53 = vrot.slane %v4360_v14, %v7110_v4  ;;  %v4395_v55 = vadd.f32 %v7492_v47, %v4371_v11  ;;  %v4397_v57 = vadd.f32 %v7492_v47, %v4373_v52  ;;  %v4399_v44 = vadd.f32 %v7492_v47, %v4375_v25 }
 0xec9   :  { %v4401_v8 = vadd.f32 %v7492_v47, %v4377_v63  ;;  %v4403_v51 = vadd.f32 %v7492_v47, %v4379_v28  ;;  %v4405_v37 = vadd.f32 %v7492_v47, %v4381_v29  ;;  %v4724_v28 = vld [vmem:[#allocation33 + $0x38] sm:$0xff] }
 0xeca   :  { %v4396_v61 = vadd.f32 %v4394_v53, %v4372_v58  ;;  %v4398_v32 = vadd.f32 %v4394_v53, %v4374_v49  ;;  %v4411_v2 = vmul.f32 0.02, %v4395_v55  ;;  %v4413_v4 = vmul.f32 0.02, %v4397_v57 }
 0xecb   :  { %v4400_v3 = vadd.f32 %v4394_v53, %v4376_v59  ;;  %v4402_v0 = vadd.f32 %v4394_v53, %v4378_v60  ;;  %v4404_v17 = vadd.f32 %v4394_v53, %v4380_v5  ;;  %v4406_v20 = vadd.f32 %v4394_v53, %v4382_v6 }
 0xecc   :  { %v4412_v7 = vmul.f32 0.02, %v4396_v61  ;;  %v4414_v34 = vmul.f32 0.02, %v4398_v32  ;;  %v4427_v26 = vmax.f32 %v4395_v55, %v4411_v2  ;;  %v4429_v12 = vmax.f32 %v4397_v57, %v4413_v4 }
 0xecd   :  { %v4416_v13 = vmul.f32 0.02, %v4400_v3  ;;  %v4418_v39 = vmul.f32 0.02, %v4402_v0  ;;  %v4415_v23 = vmul.f32 0.02, %v4399_v44  ;;  %v4408_v42 = vadd.f32 %v4394_v53, %v4384_v30 }
 0xece   :  { %v4428_v15 = vmax.f32 %v4396_v61, %v4412_v7  ;;  %v4430_v16 = vmax.f32 %v4398_v32, %v4414_v34  ;;  %v4476_v56 = vpack.c.bf16 %v4429_v12, %v4427_v26  ;;  %v4417_v54 = vmul.f32 0.02, %v4401_v8 }
 0xecf   :  { %v4432_v18 = vmax.f32 %v4400_v3, %v4416_v13  ;;  %v4434_v19 = vmax.f32 %v4402_v0, %v4418_v39  ;;  %v4420_v24 = vmul.f32 0.02, %v4404_v17  ;;  %v4422_v27 = vmul.f32 0.02, %v4406_v20 }
 0xed0   :  { %v4477_v22 = vpack.c.bf16 %v4430_v16, %v4428_v15  ;;  %v4431_v33 = vmax.f32 %v4399_v44, %v4415_v23  ;;  %v4433_v35 = vmax.f32 %v4401_v8, %v4417_v54  ;;  %v4410_v43 = vadd.f32 %v4394_v53, %v4386_v31  ;;  %v4718_v15 = vld [vmem:[#allocation33 + $0x8] sm:$0xff]  ;;  %v4719_v16 = vld [vmem:[#allocation33 + $0x10] sm:$0xff]  ;;  %v5285_v31 = vld [vmem:[%s7633_s27] ss:$0 sm:$0xff] }
 0xed1   :  { %v4479_v50 = vpack.c.bf16 %v4434_v19, %v4432_v18  ;;  %v4436_v38 = vmax.f32 %v4404_v17, %v4420_v24  ;;  %v4438_v41 = vmax.f32 %v4406_v20, %v4422_v27  ;;  %v4419_v46 = vmul.f32 0.02, %v4403_v51  ;;  %v4727_v17 = vld [vmem:[#allocation33 + $0x48] sm:$0xff]  ;;  %v4728_v18 = vld [vmem:[#allocation33 + $0x50] sm:$0xff]  ;;  %v4720_v19 = vld [vmem:[#allocation33 + $0x18] sm:$0xff] }
 0xed2   :  { %4676 = vmatprep.mubr.bf16.mxu0 %v4477_v22  ;;  %v4478_v45 = vpack.c.bf16 %v4433_v35, %v4431_v33  ;;  %v4421_v10 = vmul.f32 0.02, %v4405_v37  ;;  %v4424_v62 = vmul.f32 0.02, %v4408_v42  ;;  %v4426_v52 = vmul.f32 0.02, %v4410_v43 }
 0xed3   :  { %4677 = vmatmul.mubr.bf16.vlgmr.msra.gmra.mxu0 %v4476_v56  ;;  %v4481_v11 = vpack.c.bf16 %v4438_v41, %v4436_v38  ;;  %v4435_v1 = vmax.f32 %v4403_v51, %v4419_v46  ;;  %v4407_v58 = vadd.f32 %v7492_v47, %v4383_v36  ;;  %v4409_v53 = vadd.f32 %v7492_v47, %v4385_v9  ;;  %v4721_v20 = vld [vmem:[#allocation33 + $0x20] sm:$0xff]  ;;  %v4729_v22 = vld [vmem:[#allocation33 + $0x58] sm:$0xff]  ;;  %v4722_v23 = vld [vmem:[#allocation33 + $0x28] sm:$0xff] }
 0xed4   :  { %4686 = vmatprep.mubr.bf16.mxu0 %v4479_v50  ;;  %v4437_v14 = vmax.f32 %v4405_v37, %v4421_v10  ;;  %v4440_v49 = vmax.f32 %v4408_v42, %v4424_v62  ;;  %v4442_v55 = vmax.f32 %v4410_v43, %v4426_v52  ;;  %v4730_v56 = vld [vmem:[#allocation33 + $0x60] sm:$0xff]  ;;  %v4731_v54 = vld [vmem:[#allocation33 + $0x68] sm:$0xff]  ;;  %v4732_v50 = vld [vmem:[#allocation33 + $0x70] sm:$0xff] }
 0xed5   :  { %v4423_v59 = vmul.f32 0.02, %v4407_v58  ;;  %v4425_v60 = vmul.f32 0.02, %v4409_v53  ;;  %v4733_v24 = vld [vmem:[#allocation33 + $0x78] sm:$0xff]  ;;  %v4723_v27 = vld [vmem:[#allocation33 + $0x30] sm:$0xff] }
 0xed6   :  { %v4480_v57 = vpack.c.bf16 %v4437_v14, %v4435_v1  ;;  %v4483_v25 = vpack.c.bf16 %v4442_v55, %v4440_v49 }
 0xed7   :  { %v4439_v63 = vmax.f32 %v4407_v58, %v4423_v59  ;;  %v4441_v21 = vmax.f32 %v4409_v53, %v4425_v60 }
 0xed9   :  { %v4482_v61 = vpack.c.bf16 %v4441_v21, %v4439_v63 }
 0xedb   :  { %4687 = vmatmul.mubr.bf16.gmra.mxu0 %v4478_v45 }
 0xedc   :  { %4696 = vmatprep.mubr.bf16.mxu0 %v4481_v11 }
 0xee3   :  { %4697 = vmatmul.mubr.bf16.gmra.mxu0 %v4480_v57 }
 0xee4   :  { %4706 = vmatprep.mubr.bf16.mxu0 %v4483_v25 }
 0xeeb   :  { %4707 = vmatmul.mubr.bf16.gmra.mxu0 %v4482_v61 }
 0xeec   :  { %5990 = vmatprep.mubr.msk.f32.mxu0 %vm4734_vm10, %v4717_v48 }
 0xf93   :  { %v7529_v47 = vpop.f32.mrf.mxu0 }
 0xf95   :  { %v4680_v32 = vpop.f32.mrf.mxu0 }
 0xf97   :  { %v7531_v2 = vpop.f32.mrf.mxu0 }
 0xf99   :  { %v4684_v4 = vpop.f32.mrf.mxu0 }
 0xf9b   :  { %v7533_v3 = vpop.f32.mrf.mxu0 }
 0xf9d   :  { %v4690_v0 = vpop.f32.mrf.mxu0 }
 0xf9f   :  { %v7535_v5 = vpop.f32.mrf.mxu0 }
 0xfa1   :  { %v4694_v6 = vpop.f32.mrf.mxu0 }
 0xfa3   :  { %v7537_v7 = vpop.f32.mrf.mxu0 }
 0xfa5   :  { %v4700_v34 = vpop.f32.mrf.mxu0 }
 0xfa7   :  { %v4702_v44 = vpop.f32.mrf.mxu0 }
 0xfa9   :  { %v4704_v8 = vpop.f32.mrf.mxu0 }
 0xfab   :  { %v4708_v26 = vpop.f32.mrf.mxu0 }
 0xfad   :  { %v4710_v12 = vpop.f32.mrf.mxu0 }
 0xfaf   :  { %v4712_v13 = vpop.f32.mrf.mxu0 }
 0xfb0   :  { %5974 = vmatprep.subr.msk.mxu0 %vm870_vm3, %v4712_v13 }
 0xfb1   :  { %v4714_v39 = vpop.f32.mrf.mxu0  ;;  %5975 = vmatpush3.msk.msra.mxu0 %vm870_vm3, %v4712_v13 }
 0xfb2   :  { %5946 = vmatprep.subr.msk.mxu1 %vm870_vm3, %v4714_v39  ;;  %5976 = vmatprep.subr.mxu0 %v4708_v26 }
 0xfb3   :  { %5947 = vmatpush3.msk.msra.mxu1 %vm870_vm3, %v4714_v39  ;;  %5977 = vmatpush3.msra.mxu0 %v4708_v26 }
 0xfb4   :  { %5948 = vmatprep.subr.mxu1 %v4710_v12  ;;  %5978 = vmatprep.subr.mxu0 %v4702_v44 }
 0xfb5   :  { %5949 = vmatpush3.msra.mxu1 %v4710_v12  ;;  %5979 = vmatpush3.msra.mxu0 %v4702_v44 }
 0xfb6   :  { %5950 = vmatprep.subr.mxu1 %v4704_v8  ;;  %5980 = vmatprep.subr.mxu0 %v7537_v7 }
 0xfb7   :  { %5951 = vmatpush3.msra.mxu1 %v4704_v8  ;;  %5981 = vmatpush3.msra.mxu0 %v7537_v7 }
 0xfb8   :  { %5952 = vmatprep.subr.mxu1 %v4700_v34  ;;  %5982 = vmatprep.subr.mxu0 %v7535_v5 }
 0xfb9   :  { %5953 = vmatpush3.msra.mxu1 %v4700_v34  ;;  %5983 = vmatpush3.msra.mxu0 %v7535_v5 }
 0xfba   :  { %5954 = vmatprep.subr.mxu1 %v4694_v6  ;;  %5984 = vmatprep.subr.mxu0 %v7533_v3 }
 0xfbb   :  { %5955 = vmatpush3.msra.mxu1 %v4694_v6  ;;  %5985 = vmatpush3.msra.mxu0 %v7533_v3 }
 0xfbc   :  { %5956 = vmatprep.subr.mxu1 %v4690_v0  ;;  %5986 = vmatprep.subr.mxu0 %v7531_v2 }
 0xfbd   :  { %5957 = vmatpush3.msra.mxu1 %v4690_v0  ;;  %5987 = vmatpush3.msra.mxu0 %v7531_v2 }
 0xfbe   :  { %5958 = vmatprep.subr.mxu1 %v4684_v4  ;;  %5988 = vmatprep.subr.mxu0 %v7529_v47 }
 0xfbf   :  { %5959 = vmatpush3.msra.mxu1 %v4684_v4  ;;  %5989 = vmatpush3.msra.mxu0 %v7529_v47 }
 0xfc0   :  { %5960 = vmatprep.subr.mxu1 %v4680_v32  ;;  %5991 = vmatmul.mubr.msk.f32.vlgmr.msra.gmra.mxu0 %vm4734_vm10, %v4718_v15 }
 0xfc1   :  { %5961 = vmatpush3.msra.mxu1 %v4680_v32  ;;  %5993 = vmatprep.mubr.msk.f32.mxu0 %vm4734_vm10, %v4719_v16 }
 0xfc2   :  { %6002 = vmatprep.subr.msk.mxu1 %vm870_vm3, %v4712_v13  ;;  %5963 = vmatmul.mubr.msk.f32.vlgmr.msra.gmra.mxu1 %vm4734_vm10, %v4727_v17 }
 0xfc3   :  { %6010 = vmatpush3.msk.msra.mxu1 %vm870_vm3, %v4712_v13  ;;  %5965 = vmatprep.mubr.msk.f32.mxu1 %vm4734_vm10, %v4728_v18 }
 0xfc4   :  { %6003 = vmatprep.subr.mxu1 %v4708_v26  ;;  %5994 = vmatmul.mubr.msk.f32.gmra.mxu0 %vm4734_vm10, %v4720_v19 }
 0xfc5   :  { %6011 = vmatpush3.msra.mxu1 %v4708_v26  ;;  %5996 = vmatprep.mubr.msk.f32.mxu0 %vm4734_vm10, %v4721_v20 }
 0xfc6   :  { %6004 = vmatprep.subr.mxu1 %v4702_v44  ;;  %5966 = vmatmul.mubr.msk.f32.gmra.mxu1 %vm4734_vm10, %v4729_v22 }
 0xfc7   :  { %6012 = vmatpush3.msra.mxu1 %v4702_v44  ;;  %5968 = vmatprep.mubr.msk.f32.mxu1 %vm4734_vm10, %v4730_v56 }
 0xfc8   :  { %6005 = vmatprep.subr.mxu1 %v7537_v7  ;;  %5997 = vmatmul.mubr.msk.f32.gmra.mxu0 %vm4734_vm10, %v4722_v23 }
 0xfc9   :  { %6013 = vmatpush3.msra.mxu1 %v7537_v7 }
 0xfca   :  { %6006 = vmatprep.subr.mxu1 %v7535_v5  ;;  %5969 = vmatmul.mubr.msk.f32.gmra.mxu1 %vm4734_vm10, %v4731_v54 }
 0xfcb   :  { %6014 = vmatpush3.msra.mxu1 %v7535_v5  ;;  %5971 = vmatprep.mubr.msk.f32.mxu1 %vm4734_vm10, %v4732_v50 }
 0xfcc   :  { %6007 = vmatprep.subr.mxu1 %v7533_v3 }
 0xfcd   :  { %6015 = vmatpush3.msra.mxu1 %v7533_v3 }
 0xfce   :  { %6008 = vmatprep.subr.mxu1 %v7531_v2  ;;  %5972 = vmatmul.mubr.msk.f32.gmra.mxu1 %vm4734_vm10, %v4733_v24 }
 0xfcf   :  { %6016 = vmatpush3.msra.mxu1 %v7531_v2  ;;  %5999 = vmatprep.mubr.msk.f32.mxu1 %vm4734_vm10, %v4723_v27 }
 0xfd0   :  { %6009 = vmatprep.subr.mxu1 %v7529_v47 }
 0xfd1   :  { %6017 = vmatpush3.msra.mxu1 %v7529_v47 }
 0xfd2   :  { %6000 = vmatmul.mubr.msk.f32.vlgmr.msra.gmra.mxu1 %vm4734_vm10, %v4724_v28 }
0x1080   :  { %v5992_v29 = vpop.f32.mrf.mxu0 }
0x1082   :  { %v5964_v30 = vpop.f32.mrf.mxu1  ;;  %v4960_v33 = vpop.f32.mrf.mxu0 }
0x1083   :  { %v4966_v35 = vadd.f32 %v5992_v29, %v5964_v30 }
0x1084   :  { %v4828_v51 = vpop.f32.mrf.mxu1  ;;  %v5995_v37 = vpop.f32.mrf.mxu0 }
0x1085   :  { %v5006_v38 = vadd.f32 %v5285_v31, %v4966_v35  ;;  %v4961_v41 = vadd.f32 %v4960_v33, %v4828_v51 }
0x1086   :  { %v5967_v42 = vpop.f32.mrf.mxu1  ;;  %v4970_v43 = vpop.f32.mrf.mxu0 }
0x1087   :  { %6272 = vtanh.f32 %v5006_v38  ;;  %v5005_v45 = vadd.f32 %v5285_v31, %v4961_v41  ;;  %v4976_v46 = vadd.f32 %v5995_v37, %v5967_v42 }
0x1088   :  { %v4838_v10 = vpop.f32.mrf.mxu1  ;;  %v5998_v11 = vpop.f32.mrf.mxu0 }
0x1089   :  { %6274 = vtanh.f32 %v5005_v45  ;;  %v5008_v62 = vadd.f32 %v5285_v31, %v4976_v46  ;;  %v4971_v52 = vadd.f32 %v4970_v43, %v4838_v10 }
0x108a   :  { %v5970_v36 = vpop.f32.mrf.mxu1  ;;  %v4980_v9 = vpop.f32.mrf.mxu0 }
0x108b   :  { %6276 = vtanh.f32 %v5008_v62  ;;  %v5007_v1 = vadd.f32 %v5285_v31, %v4971_v52  ;;  %v4986_v14 = vadd.f32 %v5998_v11, %v5970_v36 }
0x108c   :  { %v4848_v58 = vpop.f32.mrf.mxu1 }
0x108d   :  { %6278 = vtanh.f32 %v5007_v1  ;;  %v5010_v53 = vadd.f32 %v5285_v31, %v4986_v14  ;;  %v4981_v49 = vadd.f32 %v4980_v9, %v4848_v58 }
0x108e   :  { %v5973_v55 = vpop.f32.mrf.mxu1 }
0x108f   :  { %6280 = vtanh.f32 %v5010_v53  ;;  %v5009_v57 = vadd.f32 %v5285_v31, %v4981_v49 }
0x1090   :  { %v4858_v59 = vpop.f32.mrf.mxu1 }
0x1091   :  { %6282 = vtanh.f32 %v5009_v57 }
0x1092   :  { %v6001_v60 = vpop.f32.mrf.mxu1 }
0x1093   :  { %v4996_v25 = vadd.f32 %v6001_v60, %v5973_v55 }
0x1094   :  { %v6273_v63 = vpop.eup %6272  ;;  %v4990_v21 = vpop.f32.mrf.mxu1 }
0x1095   :  { %5022 = vst [vmem:[%s7664_s20 + $0x8] sm:$0xff] %v6273_v63  ;;  %v5012_v61 = vadd.f32 %v5285_v31, %v4996_v25  ;;  %v4991_v40 = vadd.f32 %v4990_v21, %v4858_v59 }
0x1096   :  { %v6275_v48 = vpop.eup %6274 }
0x1097   :  { %5021 = vst [vmem:[%s7664_s20] sm:$0xff] %v6275_v48  ;;  %6284 = vtanh.f32 %v5012_v61  ;;  %v5011_v47 = vadd.f32 %v5285_v31, %v4991_v40 }
0x1098   :  { %v6277_v32 = vpop.eup %6276 }
0x1099   :  { %5024 = vst [vmem:[%s7664_s20 + $0x18] sm:$0xff] %v6277_v32  ;;  %6286 = vtanh.f32 %v5011_v47 }
0x109a   :  { %v6279_v2 = vpop.eup %6278 }
0x109b   :  { %5023 = vst [vmem:[%s7664_s20 + $0x10] sm:$0xff] %v6279_v2 }
0x109c   :  { %v6281_v4 = vpop.eup %6280 }
0x109d   :  { %5026 = vst [vmem:[%s7664_s20 + $0x28] sm:$0xff] %v6281_v4 }
0x109e   :  { %v6283_v3 = vpop.eup %6282 }
0x109f   :  { %5025 = vst [vmem:[%s7664_s20 + $0x20] sm:$0xff] %v6283_v3 }
0x10a4   :  { %v6285_v0 = vpop.eup %6284 }
0x10a5   :  { %5028 = vst [vmem:[%s7664_s20 + $0x38] sm:$0xff] %v6285_v0 }
0x10a6   :  { %v6287_v5 = vpop.eup %6286 }
0x10a7   :  { %5027 = vst [vmem:[%s7664_s20 + $0x30] sm:$0xff] %v6287_v5 }
0x10a8   :  { %5033 = vsyncpa [#allocation3], 1 }
0x10a9   :  { %5034 = vsyncpa [#allocation5], 1 }
0x10aa   :  { %5035 = vsyncpa [#allocation8], 1 }
0x10ab   :  { %5036 = vsyncpa [#allocation11], 1 }
0x10ac   :  { %5037 = vsyncpa [#allocation14], 1 }
0x10ad   :  { %5038 = vsyncpa [#allocation17], 1 }
0x10ae   :  { %5039 = vsyncpa [#allocation20], 1 }
0x10af   :  { %5040 = vsyncpa [#allocation23], 1 }
0x10b0   :  { %5041 = vsyncpa [#allocation26], 1 }
0x10b1   :  { %5042 = vsyncpa [#allocation29], 1 }
0x10b2   :  { %5043 = vsyncpa [#allocation32], 1 }

</bundles_post_ra>
